<compile_context>
chip_gen: v7x
topology: tpu7x:2x2x1
jax: 0.10.0
libtpu: 0.0.40
codegen_flags: <defaults>
</compile_context>

<pallas_src>
import math

import jax
import jax.numpy as jnp
from jax.experimental import pallas as pl
from jax.experimental.pallas import tpu as pltpu

# ---- module hyper-parameters (flag='d' branch of the PyTorch module) ----
D_MODEL = 300        # Norm / linear in-out size for flag='d'
D_PAD   = 384        # padded model dim: 3 * 128 lanes
D_FF    = 2048       # FeedForward inner size
HIDDEN  = 64         # MultiHeadAttention hidden_size
HEADS   = 4
D_K     = HIDDEN // HEADS
EPS     = 1e-6
NEG_INF = -1.0e9


def encoder_layer_kernel(
    x_ref, mask_ref,
    a1_ref, bn1_ref, a2_ref, bn2_ref,          # Norm params (1, D_PAD) f32
    wqkv_ref, bqkv_ref,                        # fused QKV (D_PAD, 3H) bf16, (1, 3H) f32
    wo_ref, bo_ref,                            # out proj (H, D_PAD) bf16, (1, D_PAD) f32
    w1_ref, bf1_ref, w2_ref, bf2_ref,          # feed-forward bf16 weights, f32 bias
    out_ref,
):
    TB, S, DP = x_ref.shape
    rows = TB * S

    # Lane-validity mask: only the first 300 of the 384 padded lanes are real.
    lane = jax.lax.broadcasted_iota(jnp.int32, (1, DP), 1)
    real = lane < D_MODEL

    def layernorm(x, alpha, bias):
        # Padded lanes of x are exactly zero everywhere (padded input; both
        # residual adds keep them zero), so sum over DP == sum over D_MODEL.
        mean = jnp.sum(x, axis=-1, keepdims=True) * (1.0 / D_MODEL)
        diff = x - mean
        dm = jnp.where(real, diff, 0.0)                    # exclude padded lanes
        var = jnp.sum(dm * dm, axis=-1, keepdims=True) * (1.0 / (D_MODEL - 1))
        inv = pl.reciprocal(jnp.sqrt(var) + EPS, approx=False)   # EUP, exact
        # alpha/bias are zero on padded lanes -> padded output lanes stay zero.
        return alpha * diff * inv + bias

    x = x_ref[...].reshape(rows, DP)                       # (rows, 384) f32

    # Mask bias, hoisted: (B,1,S) key mask broadcast over query positions,
    # matching masked_fill(mask.unsqueeze(1) == 0, -1e9) in the reference.
    mask_bias = jnp.broadcast_to(
        jnp.where(mask_ref[...] == 0, NEG_INF, 0.0).astype(jnp.float32),
        (TB, S, S))

    # ------------------ sub-layer 1: self-attention --------------------
    x2 = layernorm(x, a1_ref[...], bn1_ref[...])
    qkv = jnp.dot(x2.astype(jnp.bfloat16), wqkv_ref[...],
                  preferred_element_type=jnp.float32) + bqkv_ref[...]
    qkv_b = qkv.astype(jnp.bfloat16).reshape(TB, S, 3 * HIDDEN)   # single cast

    inv_sqrt_dk = 1.0 / math.sqrt(D_K)
    ctx_heads = []
    for h in range(HEADS):                                 # static loop, 4 heads
        q_lo = 0 * HIDDEN + h * D_K
        k_lo = 1 * HIDDEN + h * D_K
        v_lo = 2 * HIDDEN + h * D_K
        qh = qkv_b[:, :, q_lo:q_lo + D_K]                  # (TB, S, dk) bf16
        kh = qkv_b[:, :, k_lo:k_lo + D_K]
        vh = qkv_b[:, :, v_lo:v_lo + D_K]
        s = jnp.einsum('bqd,bkd->bqk', qh, kh,
                       preferred_element_type=jnp.float32) * inv_sqrt_dk
        s = s + mask_bias
        m = jnp.max(s, axis=-1, keepdims=True)
        e = jnp.exp(s - m)
        p = e * pl.reciprocal(jnp.sum(e, axis=-1, keepdims=True), approx=False)
        ctx_heads.append(
            jnp.einsum('bqk,bkd->bqd', p.astype(jnp.bfloat16), vh,
                       preferred_element_type=jnp.float32))       # (TB, S, dk)

    # Single output-projection matmul on the concatenated head context.
    ctx = jnp.concatenate(ctx_heads, axis=-1).reshape(rows, HIDDEN)
    attn = jnp.dot(ctx.astype(jnp.bfloat16), wo_ref[...],
                   preferred_element_type=jnp.float32) + bo_ref[...]
    x = x + attn                                           # residual 1

    # ------------------ sub-layer 2: feed-forward -----------------------
    x2 = layernorm(x, a2_ref[...], bn2_ref[...])
    h1 = jnp.maximum(
        jnp.dot(x2.astype(jnp.bfloat16), w1_ref[...],
                preferred_element_type=jnp.float32) + bf1_ref[...], 0.0)
    ff = jnp.dot(h1.astype(jnp.bfloat16), w2_ref[...],
                 preferred_element_type=jnp.float32) + bf2_ref[...]
    out_ref[...] = (x + ff).reshape(TB, S, DP)             # residual 2


def _tile_config(B, S):
    """Pick batch-tile size TB (rows = TB*S) and a VMEM budget.

    Prefers MXU/lane-aligned row counts (multiple of 256, fallback 128),
    rows up to 512 (1024 + larger VMEM budget on 128-MiB-VMEM chips), and on
    64-MiB-VMEM chips (v7x, 2 TensorCores) at least 2 grid steps so both
    cores receive batch tiles."""
    max_rows, vmem_limit, prefer_two_steps = 512, 44 << 20, True
    try:
        if pltpu.get_tpu_info().vmem_capacity_bytes >= (96 << 20):
            max_rows, vmem_limit, prefer_two_steps = 1024, 72 << 20, False
    except Exception:
        pass                                            # safe defaults everywhere

    def score(tb):
        rows_ = tb * S
        steps = B // tb
        align = 256 if rows_ % 256 == 0 else (128 if rows_ % 128 == 0 else 1)
        two = (steps >= 2) if prefer_two_steps else True
        return (two, align, min(rows_, 512), rows_)

    cands = [d for d in range(1, B + 1) if B % d == 0 and d * S <= max_rows]
    if not cands:
        cands = [1]
    return max(cands, key=score), vmem_limit


def _pad_cols(a, target=D_PAD):
    return jnp.pad(a, ((0, 0), (0, target - a.shape[1])))


def _pad_rows(a, target=D_PAD):
    return jnp.pad(a, ((0, target - a.shape[0]), (0, 0)))


def _pad_params(params):
    """Zero-pad the 300-wide axes of all params to D_PAD=384."""
    (a1, b1, a2, b2, wqkv, bqkv, wo, bo, w1, bf1, w2, bf2) = params
    return (_pad_cols(a1), _pad_cols(b1), _pad_cols(a2), _pad_cols(b2),
            _pad_rows(wqkv), bqkv,
            _pad_cols(wo), _pad_cols(bo),
            _pad_rows(w1), bf1,
            _pad_cols(w2), _pad_cols(bf2))


def encoder_layer(x, mask, params):
    B, S, D = x.shape
    assert D == D_MODEL
    TB, vmem_limit = _tile_config(B, S)

    xp = jnp.pad(x, ((0, 0), (0, 0), (0, D_PAD - D_MODEL)))   # lane-dense input
    pp = _pad_params(params)

    def full(arr):
        nd = arr.ndim
        return pl.BlockSpec(arr.shape, lambda b, _nd=nd: (0,) * _nd)
    # TODO(synk): on v7x, pipeline_mode=pl.Buffered(1) on these constant-index
    # weight specs would reclaim ~3 MiB of double-buffered VMEM.

    in_specs = (
        [pl.BlockSpec((TB, S, D_PAD), lambda b: (b, 0, 0)),    # x tile
         pl.BlockSpec((TB, 1, S), lambda b: (b, 0, 0))]        # mask tile
        + [full(p) for p in pp]                                # weights / norm
    )

    flops = (2 * B * S * D_PAD * 3 * HIDDEN                    # fused QKV
             + 2 * 2 * B * S * S * HIDDEN                      # scores + context
             + 2 * B * S * HIDDEN * D_PAD                      # output projection
             + 2 * 2 * B * S * D_PAD * D_FF)                   # feed-forward
    bytes_accessed = (2 * B * S * D_PAD * 4                    # x in + out (f32)
                      + B * S * 4                              # mask
                      + sum(int(p.size) * p.dtype.itemsize for p in pp))
    cost = pl.CostEstimate(flops=flops,
                           transcendentals=B * HEADS * S * S,
                           bytes_accessed=bytes_accessed)

    out = pl.pallas_call(
        encoder_layer_kernel,
        out_shape=jax.ShapeDtypeStruct((B, S, D_PAD), jnp.float32),
        grid=(B // TB,),
        in_specs=in_specs,
        out_specs=pl.BlockSpec((TB, S, D_PAD), lambda b: (b, 0, 0)),
        compiler_params=pltpu.CompilerParams(
            dimension_semantics=("parallel",),                 # batch tiles independent
            vmem_limit_bytes=vmem_limit,
        ),
        cost_estimate=cost,
    )(xp, mask, *pp)
    return out[..., :D_MODEL]                                  # drop padded lanes


def init_params(key):
    """Deterministic init. PyTorch nn.Linear weights are (out, in); build that
    way, transpose to (in, out) so the kernel does x @ W, store weights bf16
    (f32 accumulation in the kernel), biases/norm params in f32. Unpadded —
    padding to D_PAD happens in the wrapper."""
    ks = jax.random.split(key, 8)
    scale = 0.02

    def lin(k, out_dim, in_dim):
        w = scale * jax.random.normal(k, (out_dim, in_dim), jnp.float32)
        b = jnp.zeros((1, out_dim), jnp.float32)
        return w.T.astype(jnp.bfloat16), b                 # (in, out) bf16, (1, out) f32

    alpha1 = jnp.ones((1, D_MODEL), jnp.float32)
    bias1  = jnp.zeros((1, D_MODEL), jnp.float32)
    alpha2 = jnp.ones((1, D_MODEL), jnp.float32)
    bias2  = jnp.zeros((1, D_MODEL), jnp.float32)

    wq, bq = lin(ks[0], HIDDEN, D_MODEL)
    wk, bk = lin(ks[1], HIDDEN, D_MODEL)
    wv, bv = lin(ks[2], HIDDEN, D_MODEL)
    # fused QKV: query | key | value along the output dim
    wqkv = jnp.concatenate([wq, wk, wv], axis=1)           # (D, 3*HIDDEN) bf16
    bqkv = jnp.concatenate([bq, bk, bv], axis=1)           # (1, 3*HIDDEN) f32

    wo, bo = lin(ks[3], D_MODEL, HIDDEN)
    w1, b1 = lin(ks[4], D_FF, D_MODEL)
    w2, b2 = lin(ks[5], D_MODEL, D_FF)

    return (alpha1, bias1, alpha2, bias2,
            wqkv, bqkv, wo, bo,
            w1, b1, w2, b2)


if __name__ == "__main__":
    key = jax.random.PRNGKey(0)
    k_x, k_p = jax.random.split(key)

    B, S = 4, 8
    x = jax.random.normal(k_x, (B, S, D_MODEL), jnp.float32)
    # mask: (B, 1, S); mark last position of batches 1 and 3 as padding
    mask = jnp.ones((B, 1, S), jnp.int32)
    mask = mask.at[1, 0, S - 1].set(0).at[3, 0, S - 1].set(0)

    params = init_params(k_p)

    out = encoder_layer(x, mask, params)
    jax.block_until_ready(out)
    assert out.shape == (B, S, D_MODEL)
    print("KERNEL_OK")
</pallas_src>

<mosaic_0001>
module attributes {stable_mosaic.version = 11 : i64} {
  func.func @encoder_layer_kernel(%arg0: i32, %arg1: memref<2x8x384xf32, #tpu.memory_space<vmem>>, %arg2: memref<2x1x8xi32, #tpu.memory_space<vmem>>, %arg3: memref<1x384xf32, #tpu.memory_space<vmem>>, %arg4: memref<1x384xf32, #tpu.memory_space<vmem>>, %arg5: memref<1x384xf32, #tpu.memory_space<vmem>>, %arg6: memref<1x384xf32, #tpu.memory_space<vmem>>, %arg7: memref<384x192xbf16, #tpu.memory_space<vmem>>, %arg8: memref<1x192xf32, #tpu.memory_space<vmem>>, %arg9: memref<64x384xbf16, #tpu.memory_space<vmem>>, %arg10: memref<1x384xf32, #tpu.memory_space<vmem>>, %arg11: memref<384x2048xbf16, #tpu.memory_space<vmem>>, %arg12: memref<1x2048xf32, #tpu.memory_space<vmem>>, %arg13: memref<2048x384xbf16, #tpu.memory_space<vmem>>, %arg14: memref<1x384xf32, #tpu.memory_space<vmem>>, %arg15: memref<2x8x384xf32, #tpu.memory_space<vmem>>) attributes {dimension_semantics = [#tpu.dimension_semantics<parallel>], iteration_bounds = array<i64: 2>, scalar_prefetch = 0 : i64, scratch_operands = 0 : i64, tpu.core_type = #tpu.core_type<tc>, window_params = [{transform_indices = @transform_0, window_bounds = array<i64: 2, 8, 384>}, {transform_indices = @transform_1, window_bounds = array<i64: 2, 1, 8>}, {pipeline_mode = #tpu.pipeline_mode<synchronous>, transform_indices = @transform_2, window_bounds = array<i64: 1, 384>}, {pipeline_mode = #tpu.pipeline_mode<synchronous>, transform_indices = @transform_3, window_bounds = array<i64: 1, 384>}, {pipeline_mode = #tpu.pipeline_mode<synchronous>, transform_indices = @transform_4, window_bounds = array<i64: 1, 384>}, {pipeline_mode = #tpu.pipeline_mode<synchronous>, transform_indices = @transform_5, window_bounds = array<i64: 1, 384>}, {pipeline_mode = #tpu.pipeline_mode<synchronous>, transform_indices = @transform_6, window_bounds = array<i64: 384, 192>}, {pipeline_mode = #tpu.pipeline_mode<synchronous>, transform_indices = @transform_7, window_bounds = array<i64: 1, 192>}, {pipeline_mode = #tpu.pipeline_mode<synchronous>, transform_indices = @transform_8, window_bounds = array<i64: 64, 384>}, {pipeline_mode = #tpu.pipeline_mode<synchronous>, transform_indices = @transform_9, window_bounds = array<i64: 1, 384>}, {pipeline_mode = #tpu.pipeline_mode<synchronous>, transform_indices = @transform_10, window_bounds = array<i64: 384, 2048>}, {pipeline_mode = #tpu.pipeline_mode<synchronous>, transform_indices = @transform_11, window_bounds = array<i64: 1, 2048>}, {pipeline_mode = #tpu.pipeline_mode<synchronous>, transform_indices = @transform_12, window_bounds = array<i64: 2048, 384>}, {pipeline_mode = #tpu.pipeline_mode<synchronous>, transform_indices = @transform_13, window_bounds = array<i64: 1, 384>}, {transform_indices = @transform_14, window_bounds = array<i64: 2, 8, 384>}]} {
    %0 = tpu.iota {dimensions = array<i32: 1>} : vector<1x384xi32>
    %c300_i32 = arith.constant 300 : i32
    %1 = vector.broadcast %c300_i32 : i32 to vector<1x384xi32>
    %2 = arith.cmpi slt, %0, %1 : vector<1x384xi32>
    %c0 = arith.constant 0 : index
    %c0_0 = arith.constant 0 : index
    %c0_1 = arith.constant 0 : index
    %3 = vector.load %arg1[%c0, %c0_0, %c0_1] : memref<2x8x384xf32, #tpu.memory_space<vmem>>, vector<2x8x384xf32>
    %4 = vector.shape_cast %3 : vector<2x8x384xf32> to vector<16x384xf32>
    %c0_2 = arith.constant 0 : index
    %c0_3 = arith.constant 0 : index
    %c0_4 = arith.constant 0 : index
    %5 = vector.load %arg2[%c0_2, %c0_3, %c0_4] : memref<2x1x8xi32, #tpu.memory_space<vmem>>, vector<2x1x8xi32>
    %c0_i32 = arith.constant 0 : i32
    %6 = vector.broadcast %c0_i32 : i32 to vector<2x1x8xi32>
    %7 = arith.cmpi eq, %5, %6 : vector<2x1x8xi32>
    %cst = arith.constant -1.000000e+09 : f32
    %cst_5 = arith.constant 0.000000e+00 : f32
    %8 = vector.broadcast %cst : f32 to vector<2x1x8xf32>
    %9 = vector.broadcast %cst_5 : f32 to vector<2x1x8xf32>
    %10 = arith.select %7, %8, %9 : vector<2x1x8xi1>, vector<2x1x8xf32>
    %11 = vector.shape_cast %10 : vector<2x1x8xf32> to vector<2x1x8xf32>
    %12 = vector.broadcast %11 : vector<2x1x8xf32> to vector<2x8x8xf32>
    %c0_6 = arith.constant 0 : index
    %c0_7 = arith.constant 0 : index
    %13 = vector.load %arg3[%c0_6, %c0_7] : memref<1x384xf32, #tpu.memory_space<vmem>>, vector<1x384xf32>
    %c0_8 = arith.constant 0 : index
    %c0_9 = arith.constant 0 : index
    %14 = vector.load %arg4[%c0_8, %c0_9] : memref<1x384xf32, #tpu.memory_space<vmem>>, vector<1x384xf32>
    %cst_10 = arith.constant dense<0.000000e+00> : vector<16xf32>
    %15 = vector.multi_reduction <add>, %4, %cst_10 [1] : vector<16x384xf32> to vector<16xf32>
    %16 = vector.shape_cast %15 : vector<16xf32> to vector<16x1xf32>
    %cst_11 = arith.constant 0.00333333341 : f32
    %17 = vector.broadcast %cst_11 : f32 to vector<16x1xf32>
    %18 = arith.mulf %16, %17 : vector<16x1xf32>
    %19 = vector.broadcast %18 : vector<16x1xf32> to vector<16x384xf32>
    %20 = arith.subf %4, %19 : vector<16x384xf32>
    %cst_12 = arith.constant 0.000000e+00 : f32
    %21 = vector.shape_cast %2 : vector<1x384xi1> to vector<1x384xi1>
    %22 = vector.broadcast %21 : vector<1x384xi1> to vector<16x384xi1>
    %23 = vector.broadcast %cst_12 : f32 to vector<16x384xf32>
    %24 = arith.select %22, %20, %23 : vector<16x384xi1>, vector<16x384xf32>
    %25 = arith.mulf %24, %24 : vector<16x384xf32>
    %cst_13 = arith.constant dense<0.000000e+00> : vector<16xf32>
    %26 = vector.multi_reduction <add>, %25, %cst_13 [1] : vector<16x384xf32> to vector<16xf32>
    %27 = vector.shape_cast %26 : vector<16xf32> to vector<16x1xf32>
    %cst_14 = arith.constant 0.00334448158 : f32
    %28 = vector.broadcast %cst_14 : f32 to vector<16x1xf32>
    %29 = arith.mulf %27, %28 : vector<16x1xf32>
    %30 = math.sqrt %29 : vector<16x1xf32>
    %cst_15 = arith.constant 9.99999997E-7 : f32
    %31 = vector.broadcast %cst_15 : f32 to vector<16x1xf32>
    %32 = arith.addf %30, %31 : vector<16x1xf32>
    %33 = tpu.reciprocal %32 : vector<16x1xf32> -> vector<16x1xf32>
    %34 = vector.broadcast %13 : vector<1x384xf32> to vector<16x384xf32>
    %35 = arith.mulf %34, %20 : vector<16x384xf32>
    %36 = vector.broadcast %33 : vector<16x1xf32> to vector<16x384xf32>
    %37 = arith.mulf %35, %36 : vector<16x384xf32>
    %38 = vector.broadcast %14 : vector<1x384xf32> to vector<16x384xf32>
    %39 = arith.addf %37, %38 : vector<16x384xf32>
    %40 = arith.truncf %39 : vector<16x384xf32> to vector<16x384xbf16>
    %c0_16 = arith.constant 0 : index
    %c0_17 = arith.constant 0 : index
    %41 = vector.load %arg7[%c0_16, %c0_17] : memref<384x192xbf16, #tpu.memory_space<vmem>>, vector<384x192xbf16>
    %cst_18 = arith.constant dense<0.000000e+00> : vector<16x192xf32>
    %42 = tpu.matmul %40, %41, %cst_18 {dimension_numbers = #tpu.dot_dimension_numbers<[1], [0], [0], [1], [0, 0, 1, 1], [], []>} : vector<16x384xbf16>, vector<384x192xbf16>, vector<16x192xf32> -> vector<16x192xf32>
    %c0_19 = arith.constant 0 : index
    %c0_20 = arith.constant 0 : index
    %43 = vector.load %arg8[%c0_19, %c0_20] : memref<1x192xf32, #tpu.memory_space<vmem>>, vector<1x192xf32>
    %44 = vector.broadcast %43 : vector<1x192xf32> to vector<16x192xf32>
    %45 = arith.addf %42, %44 : vector<16x192xf32>
    %46 = arith.truncf %45 : vector<16x192xf32> to vector<16x192xbf16>
    %47 = vector.shape_cast %46 : vector<16x192xbf16> to vector<2x8x192xbf16>
    %48 = vector.extract_strided_slice %47 {offsets = [0, 0, 0], sizes = [2, 8, 16], strides = [1, 1, 1]} : vector<2x8x192xbf16> to vector<2x8x16xbf16>
    %49 = vector.extract_strided_slice %47 {offsets = [0, 0, 64], sizes = [2, 8, 16], strides = [1, 1, 1]} : vector<2x8x192xbf16> to vector<2x8x16xbf16>
    %50 = vector.extract_strided_slice %47 {offsets = [0, 0, 128], sizes = [2, 8, 16], strides = [1, 1, 1]} : vector<2x8x192xbf16> to vector<2x8x16xbf16>
    "tpu.trace_start"() <{level = 10 : i32, message = "bqd,bkd->bqk"}> : () -> ()
    %cst_21 = arith.constant dense<0.000000e+00> : vector<2x8x8xf32>
    %51 = tpu.matmul %48, %49, %cst_21 {dimension_numbers = #tpu.dot_dimension_numbers<[2], [2], [1], [1], [0, 0, 0, 1, 1, 1], [0], [0]>} : vector<2x8x16xbf16>, vector<2x8x16xbf16>, vector<2x8x8xf32> -> vector<2x8x8xf32>
    "tpu.trace_stop"() : () -> ()
    %cst_22 = arith.constant 2.500000e-01 : f32
    %52 = vector.broadcast %cst_22 : f32 to vector<2x8x8xf32>
    %53 = arith.mulf %51, %52 : vector<2x8x8xf32>
    %54 = arith.addf %53, %12 : vector<2x8x8xf32>
    %cst_23 = arith.constant dense<0xFF800000> : vector<2x8xf32>
    %55 = vector.multi_reduction <maximumf>, %54, %cst_23 [2] : vector<2x8x8xf32> to vector<2x8xf32>
    %56 = vector.shape_cast %55 : vector<2x8xf32> to vector<2x8x1xf32>
    %57 = vector.broadcast %56 : vector<2x8x1xf32> to vector<2x8x8xf32>
    %58 = arith.subf %54, %57 : vector<2x8x8xf32>
    %59 = math.exp %58 : vector<2x8x8xf32>
    %cst_24 = arith.constant dense<0.000000e+00> : vector<2x8xf32>
    %60 = vector.multi_reduction <add>, %59, %cst_24 [2] : vector<2x8x8xf32> to vector<2x8xf32>
    %61 = vector.shape_cast %60 : vector<2x8xf32> to vector<2x8x1xf32>
    %62 = tpu.reciprocal %61 : vector<2x8x1xf32> -> vector<2x8x1xf32>
    %63 = vector.broadcast %62 : vector<2x8x1xf32> to vector<2x8x8xf32>
    %64 = arith.mulf %59, %63 : vector<2x8x8xf32>
    %65 = arith.truncf %64 : vector<2x8x8xf32> to vector<2x8x8xbf16>
    "tpu.trace_start"() <{level = 10 : i32, message = "bqk,bkd->bqd"}> : () -> ()
    %cst_25 = arith.constant dense<0.000000e+00> : vector<2x8x16xf32>
    %66 = tpu.matmul %65, %50, %cst_25 {dimension_numbers = #tpu.dot_dimension_numbers<[2], [1], [1], [2], [0, 0, 0, 1, 1, 2], [0], [0]>} : vector<2x8x8xbf16>, vector<2x8x16xbf16>, vector<2x8x16xf32> -> vector<2x8x16xf32>
    "tpu.trace_stop"() : () -> ()
    %67 = vector.extract_strided_slice %47 {offsets = [0, 0, 16], sizes = [2, 8, 16], strides = [1, 1, 1]} : vector<2x8x192xbf16> to vector<2x8x16xbf16>
    %68 = vector.extract_strided_slice %47 {offsets = [0, 0, 80], sizes = [2, 8, 16], strides = [1, 1, 1]} : vector<2x8x192xbf16> to vector<2x8x16xbf16>
    %69 = vector.extract_strided_slice %47 {offsets = [0, 0, 144], sizes = [2, 8, 16], strides = [1, 1, 1]} : vector<2x8x192xbf16> to vector<2x8x16xbf16>
    "tpu.trace_start"() <{level = 10 : i32, message = "bqd,bkd->bqk"}> : () -> ()
    %cst_26 = arith.constant dense<0.000000e+00> : vector<2x8x8xf32>
    %70 = tpu.matmul %67, %68, %cst_26 {dimension_numbers = #tpu.dot_dimension_numbers<[2], [2], [1], [1], [0, 0, 0, 1, 1, 1], [0], [0]>} : vector<2x8x16xbf16>, vector<2x8x16xbf16>, vector<2x8x8xf32> -> vector<2x8x8xf32>
    "tpu.trace_stop"() : () -> ()
    %cst_27 = arith.constant 2.500000e-01 : f32
    %71 = vector.broadcast %cst_27 : f32 to vector<2x8x8xf32>
    %72 = arith.mulf %70, %71 : vector<2x8x8xf32>
    %73 = arith.addf %72, %12 : vector<2x8x8xf32>
    %cst_28 = arith.constant dense<0xFF800000> : vector<2x8xf32>
    %74 = vector.multi_reduction <maximumf>, %73, %cst_28 [2] : vector<2x8x8xf32> to vector<2x8xf32>
    %75 = vector.shape_cast %74 : vector<2x8xf32> to vector<2x8x1xf32>
    %76 = vector.broadcast %75 : vector<2x8x1xf32> to vector<2x8x8xf32>
    %77 = arith.subf %73, %76 : vector<2x8x8xf32>
    %78 = math.exp %77 : vector<2x8x8xf32>
    %cst_29 = arith.constant dense<0.000000e+00> : vector<2x8xf32>
    %79 = vector.multi_reduction <add>, %78, %cst_29 [2] : vector<2x8x8xf32> to vector<2x8xf32>
    %80 = vector.shape_cast %79 : vector<2x8xf32> to vector<2x8x1xf32>
    %81 = tpu.reciprocal %80 : vector<2x8x1xf32> -> vector<2x8x1xf32>
    %82 = vector.broadcast %81 : vector<2x8x1xf32> to vector<2x8x8xf32>
    %83 = arith.mulf %78, %82 : vector<2x8x8xf32>
    %84 = arith.truncf %83 : vector<2x8x8xf32> to vector<2x8x8xbf16>
    "tpu.trace_start"() <{level = 10 : i32, message = "bqk,bkd->bqd"}> : () -> ()
    %cst_30 = arith.constant dense<0.000000e+00> : vector<2x8x16xf32>
    %85 = tpu.matmul %84, %69, %cst_30 {dimension_numbers = #tpu.dot_dimension_numbers<[2], [1], [1], [2], [0, 0, 0, 1, 1, 2], [0], [0]>} : vector<2x8x8xbf16>, vector<2x8x16xbf16>, vector<2x8x16xf32> -> vector<2x8x16xf32>
    "tpu.trace_stop"() : () -> ()
    %86 = vector.extract_strided_slice %47 {offsets = [0, 0, 32], sizes = [2, 8, 16], strides = [1, 1, 1]} : vector<2x8x192xbf16> to vector<2x8x16xbf16>
    %87 = vector.extract_strided_slice %47 {offsets = [0, 0, 96], sizes = [2, 8, 16], strides = [1, 1, 1]} : vector<2x8x192xbf16> to vector<2x8x16xbf16>
    %88 = vector.extract_strided_slice %47 {offsets = [0, 0, 160], sizes = [2, 8, 16], strides = [1, 1, 1]} : vector<2x8x192xbf16> to vector<2x8x16xbf16>
    "tpu.trace_start"() <{level = 10 : i32, message = "bqd,bkd->bqk"}> : () -> ()
    %cst_31 = arith.constant dense<0.000000e+00> : vector<2x8x8xf32>
    %89 = tpu.matmul %86, %87, %cst_31 {dimension_numbers = #tpu.dot_dimension_numbers<[2], [2], [1], [1], [0, 0, 0, 1, 1, 1], [0], [0]>} : vector<2x8x16xbf16>, vector<2x8x16xbf16>, vector<2x8x8xf32> -> vector<2x8x8xf32>
    "tpu.trace_stop"() : () -> ()
    %cst_32 = arith.constant 2.500000e-01 : f32
    %90 = vector.broadcast %cst_32 : f32 to vector<2x8x8xf32>
    %91 = arith.mulf %89, %90 : vector<2x8x8xf32>
    %92 = arith.addf %91, %12 : vector<2x8x8xf32>
    %cst_33 = arith.constant dense<0xFF800000> : vector<2x8xf32>
    %93 = vector.multi_reduction <maximumf>, %92, %cst_33 [2] : vector<2x8x8xf32> to vector<2x8xf32>
    %94 = vector.shape_cast %93 : vector<2x8xf32> to vector<2x8x1xf32>
    %95 = vector.broadcast %94 : vector<2x8x1xf32> to vector<2x8x8xf32>
    %96 = arith.subf %92, %95 : vector<2x8x8xf32>
    %97 = math.exp %96 : vector<2x8x8xf32>
    %cst_34 = arith.constant dense<0.000000e+00> : vector<2x8xf32>
    %98 = vector.multi_reduction <add>, %97, %cst_34 [2] : vector<2x8x8xf32> to vector<2x8xf32>
    %99 = vector.shape_cast %98 : vector<2x8xf32> to vector<2x8x1xf32>
    %100 = tpu.reciprocal %99 : vector<2x8x1xf32> -> vector<2x8x1xf32>
    %101 = vector.broadcast %100 : vector<2x8x1xf32> to vector<2x8x8xf32>
    %102 = arith.mulf %97, %101 : vector<2x8x8xf32>
    %103 = arith.truncf %102 : vector<2x8x8xf32> to vector<2x8x8xbf16>
    "tpu.trace_start"() <{level = 10 : i32, message = "bqk,bkd->bqd"}> : () -> ()
    %cst_35 = arith.constant dense<0.000000e+00> : vector<2x8x16xf32>
    %104 = tpu.matmul %103, %88, %cst_35 {dimension_numbers = #tpu.dot_dimension_numbers<[2], [1], [1], [2], [0, 0, 0, 1, 1, 2], [0], [0]>} : vector<2x8x8xbf16>, vector<2x8x16xbf16>, vector<2x8x16xf32> -> vector<2x8x16xf32>
    "tpu.trace_stop"() : () -> ()
    %105 = vector.extract_strided_slice %47 {offsets = [0, 0, 48], sizes = [2, 8, 16], strides = [1, 1, 1]} : vector<2x8x192xbf16> to vector<2x8x16xbf16>
    %106 = vector.extract_strided_slice %47 {offsets = [0, 0, 112], sizes = [2, 8, 16], strides = [1, 1, 1]} : vector<2x8x192xbf16> to vector<2x8x16xbf16>
    %107 = vector.extract_strided_slice %47 {offsets = [0, 0, 176], sizes = [2, 8, 16], strides = [1, 1, 1]} : vector<2x8x192xbf16> to vector<2x8x16xbf16>
    "tpu.trace_start"() <{level = 10 : i32, message = "bqd,bkd->bqk"}> : () -> ()
    %cst_36 = arith.constant dense<0.000000e+00> : vector<2x8x8xf32>
    %108 = tpu.matmul %105, %106, %cst_36 {dimension_numbers = #tpu.dot_dimension_numbers<[2], [2], [1], [1], [0, 0, 0, 1, 1, 1], [0], [0]>} : vector<2x8x16xbf16>, vector<2x8x16xbf16>, vector<2x8x8xf32> -> vector<2x8x8xf32>
    "tpu.trace_stop"() : () -> ()
    %cst_37 = arith.constant 2.500000e-01 : f32
    %109 = vector.broadcast %cst_37 : f32 to vector<2x8x8xf32>
    %110 = arith.mulf %108, %109 : vector<2x8x8xf32>
    %111 = arith.addf %110, %12 : vector<2x8x8xf32>
    %cst_38 = arith.constant dense<0xFF800000> : vector<2x8xf32>
    %112 = vector.multi_reduction <maximumf>, %111, %cst_38 [2] : vector<2x8x8xf32> to vector<2x8xf32>
    %113 = vector.shape_cast %112 : vector<2x8xf32> to vector<2x8x1xf32>
    %114 = vector.broadcast %113 : vector<2x8x1xf32> to vector<2x8x8xf32>
    %115 = arith.subf %111, %114 : vector<2x8x8xf32>
    %116 = math.exp %115 : vector<2x8x8xf32>
    %cst_39 = arith.constant dense<0.000000e+00> : vector<2x8xf32>
    %117 = vector.multi_reduction <add>, %116, %cst_39 [2] : vector<2x8x8xf32> to vector<2x8xf32>
    %118 = vector.shape_cast %117 : vector<2x8xf32> to vector<2x8x1xf32>
    %119 = tpu.reciprocal %118 : vector<2x8x1xf32> -> vector<2x8x1xf32>
    %120 = vector.broadcast %119 : vector<2x8x1xf32> to vector<2x8x8xf32>
    %121 = arith.mulf %116, %120 : vector<2x8x8xf32>
    %122 = arith.truncf %121 : vector<2x8x8xf32> to vector<2x8x8xbf16>
    "tpu.trace_start"() <{level = 10 : i32, message = "bqk,bkd->bqd"}> : () -> ()
    %cst_40 = arith.constant dense<0.000000e+00> : vector<2x8x16xf32>
    %123 = tpu.matmul %122, %107, %cst_40 {dimension_numbers = #tpu.dot_dimension_numbers<[2], [1], [1], [2], [0, 0, 0, 1, 1, 2], [0], [0]>} : vector<2x8x8xbf16>, vector<2x8x16xbf16>, vector<2x8x16xf32> -> vector<2x8x16xf32>
    "tpu.trace_stop"() : () -> ()
    %124 = tpu.concatenate %66, %85, %104, %123 in 2 : vector<2x8x16xf32>, vector<2x8x16xf32>, vector<2x8x16xf32>, vector<2x8x16xf32> -> vector<2x8x64xf32>
    %125 = vector.shape_cast %124 : vector<2x8x64xf32> to vector<16x64xf32>
    %126 = arith.truncf %125 : vector<16x64xf32> to vector<16x64xbf16>
    %c0_41 = arith.constant 0 : index
    %c0_42 = arith.constant 0 : index
    %127 = vector.load %arg9[%c0_41, %c0_42] : memref<64x384xbf16, #tpu.memory_space<vmem>>, vector<64x384xbf16>
    %cst_43 = arith.constant dense<0.000000e+00> : vector<16x384xf32>
    %128 = tpu.matmul %126, %127, %cst_43 {dimension_numbers = #tpu.dot_dimension_numbers<[1], [0], [0], [1], [0, 0, 1, 1], [], []>} : vector<16x64xbf16>, vector<64x384xbf16>, vector<16x384xf32> -> vector<16x384xf32>
    %c0_44 = arith.constant 0 : index
    %c0_45 = arith.constant 0 : index
    %129 = vector.load %arg10[%c0_44, %c0_45] : memref<1x384xf32, #tpu.memory_space<vmem>>, vector<1x384xf32>
    %130 = vector.broadcast %129 : vector<1x384xf32> to vector<16x384xf32>
    %131 = arith.addf %128, %130 : vector<16x384xf32>
    %132 = arith.addf %4, %131 : vector<16x384xf32>
    %c0_46 = arith.constant 0 : index
    %c0_47 = arith.constant 0 : index
    %133 = vector.load %arg5[%c0_46, %c0_47] : memref<1x384xf32, #tpu.memory_space<vmem>>, vector<1x384xf32>
    %c0_48 = arith.constant 0 : index
    %c0_49 = arith.constant 0 : index
    %134 = vector.load %arg6[%c0_48, %c0_49] : memref<1x384xf32, #tpu.memory_space<vmem>>, vector<1x384xf32>
    %cst_50 = arith.constant dense<0.000000e+00> : vector<16xf32>
    %135 = vector.multi_reduction <add>, %132, %cst_50 [1] : vector<16x384xf32> to vector<16xf32>
    %136 = vector.shape_cast %135 : vector<16xf32> to vector<16x1xf32>
    %cst_51 = arith.constant 0.00333333341 : f32
    %137 = vector.broadcast %cst_51 : f32 to vector<16x1xf32>
    %138 = arith.mulf %136, %137 : vector<16x1xf32>
    %139 = vector.broadcast %138 : vector<16x1xf32> to vector<16x384xf32>
    %140 = arith.subf %132, %139 : vector<16x384xf32>
    %cst_52 = arith.constant 0.000000e+00 : f32
    %141 = vector.shape_cast %2 : vector<1x384xi1> to vector<1x384xi1>
    %142 = vector.broadcast %141 : vector<1x384xi1> to vector<16x384xi1>
    %143 = vector.broadcast %cst_52 : f32 to vector<16x384xf32>
    %144 = arith.select %142, %140, %143 : vector<16x384xi1>, vector<16x384xf32>
    %145 = arith.mulf %144, %144 : vector<16x384xf32>
    %cst_53 = arith.constant dense<0.000000e+00> : vector<16xf32>
    %146 = vector.multi_reduction <add>, %145, %cst_53 [1] : vector<16x384xf32> to vector<16xf32>
    %147 = vector.shape_cast %146 : vector<16xf32> to vector<16x1xf32>
    %cst_54 = arith.constant 0.00334448158 : f32
    %148 = vector.broadcast %cst_54 : f32 to vector<16x1xf32>
    %149 = arith.mulf %147, %148 : vector<16x1xf32>
    %150 = math.sqrt %149 : vector<16x1xf32>
    %cst_55 = arith.constant 9.99999997E-7 : f32
    %151 = vector.broadcast %cst_55 : f32 to vector<16x1xf32>
    %152 = arith.addf %150, %151 : vector<16x1xf32>
    %153 = tpu.reciprocal %152 : vector<16x1xf32> -> vector<16x1xf32>
    %154 = vector.broadcast %133 : vector<1x384xf32> to vector<16x384xf32>
    %155 = arith.mulf %154, %140 : vector<16x384xf32>
    %156 = vector.broadcast %153 : vector<16x1xf32> to vector<16x384xf32>
    %157 = arith.mulf %155, %156 : vector<16x384xf32>
    %158 = vector.broadcast %134 : vector<1x384xf32> to vector<16x384xf32>
    %159 = arith.addf %157, %158 : vector<16x384xf32>
    %160 = arith.truncf %159 : vector<16x384xf32> to vector<16x384xbf16>
    %c0_56 = arith.constant 0 : index
    %c0_57 = arith.constant 0 : index
    %161 = vector.load %arg11[%c0_56, %c0_57] : memref<384x2048xbf16, #tpu.memory_space<vmem>>, vector<384x2048xbf16>
    %cst_58 = arith.constant dense<0.000000e+00> : vector<16x2048xf32>
    %162 = tpu.matmul %160, %161, %cst_58 {dimension_numbers = #tpu.dot_dimension_numbers<[1], [0], [0], [1], [0, 0, 1, 1], [], []>} : vector<16x384xbf16>, vector<384x2048xbf16>, vector<16x2048xf32> -> vector<16x2048xf32>
    %c0_59 = arith.constant 0 : index
    %c0_60 = arith.constant 0 : index
    %163 = vector.load %arg12[%c0_59, %c0_60] : memref<1x2048xf32, #tpu.memory_space<vmem>>, vector<1x2048xf32>
    %164 = vector.broadcast %163 : vector<1x2048xf32> to vector<16x2048xf32>
    %165 = arith.addf %162, %164 : vector<16x2048xf32>
    %cst_61 = arith.constant 0.000000e+00 : f32
    %166 = vector.broadcast %cst_61 : f32 to vector<16x2048xf32>
    %167 = arith.maximumf %165, %166 : vector<16x2048xf32>
    %168 = arith.truncf %167 : vector<16x2048xf32> to vector<16x2048xbf16>
    %c0_62 = arith.constant 0 : index
    %c0_63 = arith.constant 0 : index
    %169 = vector.load %arg13[%c0_62, %c0_63] : memref<2048x384xbf16, #tpu.memory_space<vmem>>, vector<2048x384xbf16>
    %cst_64 = arith.constant dense<0.000000e+00> : vector<16x384xf32>
    %170 = tpu.matmul %168, %169, %cst_64 {dimension_numbers = #tpu.dot_dimension_numbers<[1], [0], [0], [1], [0, 0, 1, 1], [], []>} : vector<16x2048xbf16>, vector<2048x384xbf16>, vector<16x384xf32> -> vector<16x384xf32>
    %c0_65 = arith.constant 0 : index
    %c0_66 = arith.constant 0 : index
    %171 = vector.load %arg14[%c0_65, %c0_66] : memref<1x384xf32, #tpu.memory_space<vmem>>, vector<1x384xf32>
    %172 = vector.broadcast %171 : vector<1x384xf32> to vector<16x384xf32>
    %173 = arith.addf %170, %172 : vector<16x384xf32>
    %174 = arith.addf %132, %173 : vector<16x384xf32>
    %175 = vector.shape_cast %174 : vector<16x384xf32> to vector<2x8x384xf32>
    %c0_67 = arith.constant 0 : index
    %c0_68 = arith.constant 0 : index
    %c0_69 = arith.constant 0 : index
    %176 = vector.load %arg15[%c0_67, %c0_68, %c0_69] : memref<2x8x384xf32, #tpu.memory_space<vmem>>, vector<2x8x384xf32>
    tpu.vector_store %arg15[%c0_67, %c0_68, %c0_69], %175 {strides = array<i32>} : memref<2x8x384xf32, #tpu.memory_space<vmem>>, vector<2x8x384xf32>,
    return
  }
  func.func @transform_0(%arg0: i32) -> (i32, i32, i32) {
    %c0_i32 = arith.constant 0 : i32
    %c0_i32_0 = arith.constant 0 : i32
    %c0_i32_1 = arith.constant 0 : i32
    return %arg0, %c0_i32, %c0_i32_0 : i32, i32, i32
  }
  func.func @transform_1(%arg0: i32) -> (i32, i32, i32) {
    %c0_i32 = arith.constant 0 : i32
    %c0_i32_0 = arith.constant 0 : i32
    %c0_i32_1 = arith.constant 0 : i32
    return %arg0, %c0_i32, %c0_i32_0 : i32, i32, i32
  }
  func.func @transform_2(%arg0: i32) -> (i32, i32) {
    %c0_i32 = arith.constant 0 : i32
    %c0_i32_0 = arith.constant 0 : i32
    %c0_i32_1 = arith.constant 0 : i32
    return %c0_i32, %c0_i32_0 : i32, i32
  }
  func.func @transform_3(%arg0: i32) -> (i32, i32) {
    %c0_i32 = arith.constant 0 : i32
    %c0_i32_0 = arith.constant 0 : i32
    %c0_i32_1 = arith.constant 0 : i32
    return %c0_i32, %c0_i32_0 : i32, i32
  }
  func.func @transform_4(%arg0: i32) -> (i32, i32) {
    %c0_i32 = arith.constant 0 : i32
    %c0_i32_0 = arith.constant 0 : i32
    %c0_i32_1 = arith.constant 0 : i32
    return %c0_i32, %c0_i32_0 : i32, i32
  }
  func.func @transform_5(%arg0: i32) -> (i32, i32) {
    %c0_i32 = arith.constant 0 : i32
    %c0_i32_0 = arith.constant 0 : i32
    %c0_i32_1 = arith.constant 0 : i32
    return %c0_i32, %c0_i32_0 : i32, i32
  }
  func.func @transform_6(%arg0: i32) -> (i32, i32) {
    %c0_i32 = arith.constant 0 : i32
    %c0_i32_0 = arith.constant 0 : i32
    %c0_i32_1 = arith.constant 0 : i32
    return %c0_i32, %c0_i32_0 : i32, i32
  }
  func.func @transform_7(%arg0: i32) -> (i32, i32) {
    %c0_i32 = arith.constant 0 : i32
    %c0_i32_0 = arith.constant 0 : i32
    %c0_i32_1 = arith.constant 0 : i32
    return %c0_i32, %c0_i32_0 : i32, i32
  }
  func.func @transform_8(%arg0: i32) -> (i32, i32) {
    %c0_i32 = arith.constant 0 : i32
    %c0_i32_0 = arith.constant 0 : i32
    %c0_i32_1 = arith.constant 0 : i32
    return %c0_i32, %c0_i32_0 : i32, i32
  }
  func.func @transform_9(%arg0: i32) -> (i32, i32) {
    %c0_i32 = arith.constant 0 : i32
    %c0_i32_0 = arith.constant 0 : i32
    %c0_i32_1 = arith.constant 0 : i32
    return %c0_i32, %c0_i32_0 : i32, i32
  }
  func.func @transform_10(%arg0: i32) -> (i32, i32) {
    %c0_i32 = arith.constant 0 : i32
    %c0_i32_0 = arith.constant 0 : i32
    %c0_i32_1 = arith.constant 0 : i32
    return %c0_i32, %c0_i32_0 : i32, i32
  }
  func.func @transform_11(%arg0: i32) -> (i32, i32) {
    %c0_i32 = arith.constant 0 : i32
    %c0_i32_0 = arith.constant 0 : i32
    %c0_i32_1 = arith.constant 0 : i32
    return %c0_i32, %c0_i32_0 : i32, i32
  }
  func.func @transform_12(%arg0: i32) -> (i32, i32) {
    %c0_i32 = arith.constant 0 : i32
    %c0_i32_0 = arith.constant 0 : i32
    %c0_i32_1 = arith.constant 0 : i32
    return %c0_i32, %c0_i32_0 : i32, i32
  }
  func.func @transform_13(%arg0: i32) -> (i32, i32) {
    %c0_i32 = arith.constant 0 : i32
    %c0_i32_0 = arith.constant 0 : i32
    %c0_i32_1 = arith.constant 0 : i32
    return %c0_i32, %c0_i32_0 : i32, i32
  }
  func.func @transform_14(%arg0: i32) -> (i32, i32, i32) {
    %c0_i32 = arith.constant 0 : i32
    %c0_i32_0 = arith.constant 0 : i32
    %c0_i32_1 = arith.constant 0 : i32
    return %arg0, %c0_i32, %c0_i32_0 : i32, i32, i32
  }
}

</mosaic_0001>

<bundles_post_ra>
// kernel: tpu_custom_call.1
= control target key start
LH: loop header
LB: loop body
LE: loop exit
PB: predicated region body
PF: predicated region fallthrough
CT: control target
= control target key end

     0   :  { %s12943_s0 = inlined_call_operand.hbm [shape: f32[4,8,384], index: 0, kind: input, shape index: {}]   ;;  %s12944_s1 = inlined_call_operand.hbm [shape: s32[4,1,8], index: 1, kind: input, shape index: {}]   ;;  %s12945_s2 = inlined_call_operand.hbm [shape: f32[1,384], index: 2, kind: input, shape index: {}]   ;;  %s12946_s3 = inlined_call_operand.hbm [shape: f32[1,384], index: 3, kind: input, shape index: {}]   ;;  %s12947_s4 = inlined_call_operand.hbm [shape: f32[1,384], index: 4, kind: input, shape index: {}]   ;;  %s12948_s5 = inlined_call_operand.hbm [shape: f32[1,384], index: 5, kind: input, shape index: {}]   ;;  %s12949_s6 = inlined_call_operand.vmem [shape: bf16[384,192], index: 6, kind: input, shape index: {}]   ;;  %s12950_s7 = inlined_call_operand.hbm [shape: f32[1,192], index: 7, kind: input, shape index: {}]   ;;  %s12951_s8 = inlined_call_operand.hbm [shape: bf16[64,384], index: 8, kind: input, shape index: {}]   ;;  %s12952_s9 = inlined_call_operand.hbm [shape: f32[1,384], index: 9, kind: input, shape index: {}]   ;;  %s12953_s10 = inlined_call_operand.hbm [shape: bf16[384,2048], index: 10, kind: input, shape index: {}]   ;;  %s12954_s11 = inlined_call_operand.hbm [shape: f32[1,2048], index: 11, kind: input, shape index: {}]   ;;  %s12955_s12 = inlined_call_operand.hbm [shape: bf16[2048,384], index: 12, kind: input, shape index: {}]   ;;  %s12956_s13 = inlined_call_operand.hbm [shape: f32[1,384], index: 13, kind: input, shape index: {}]   ;;  %s12957_s14 = inlined_call_operand.hbm [shape: f32[4,8,384], index: 14, kind: output, shape index: {}]  }
   0x1   :  { %12969 = sst [smem:[#allocation34_spill]] %s12943_s0 }
   0x2   :  { %12970 = sst [smem:[#allocation35_spill]] %s12944_s1 }
   0x3   :  { %12971 = sst [smem:[#allocation36_spill]] %s12945_s2 }
   0x4   :  { %12972 = sst [smem:[#allocation37_spill]] %s12946_s3 }
   0x5   :  { %12973 = sst [smem:[#allocation38_spill]] %s12947_s4 }
   0x6   :  { %12974 = sst [smem:[#allocation39_spill]] %s12948_s5 }
   0x7   :  { %12975 = sst [smem:[#allocation40_spill]] %s12949_s6 }
   0x8   :  { %12976 = sst [smem:[#allocation41_spill]] %s12950_s7 }
   0x9   :  { %12977 = sst [smem:[#allocation42_spill]] %s12951_s8 }
   0xa   :  { %12978 = sst [smem:[#allocation43_spill]] %s12952_s9 }
   0xb   :  { %12979 = sst [smem:[#allocation44_spill]] %s12953_s10 }
   0xc   :  { %12980 = sst [smem:[#allocation45_spill]] %s12957_s14 }
   0xd   :  { %19 = vsyncpa [#allocation3], 0 }
   0xe   :  { %21 = vsyncpa [#allocation3 + $0x1], 0 }
   0xf   :  { %22 = vsyncpa [#allocation6], 0 }
  0x10   :  { %24 = vsyncpa [#allocation6 + $0x1], 0 }
  0x11   :  { %25 = vsyncpa [#allocation9], 0 }
  0x12   :  { %26 = vsyncpa [#allocation12], 0 }
  0x13   :  { %27 = vsyncpa [#allocation15], 0 }
  0x14   :  { %28 = vsyncpa [#allocation18], 0 }
  0x15   :  { %29 = vsyncpa [#allocation21], 0 }
  0x16   :  { %30 = vsyncpa [#allocation4], 0 }
  0x17   :  { %32 = vsyncpa [#allocation4 + $0x1], 0  ;;  %s11801_s29 = smov 0   ;;  %s11803_s30 = smov 0  }
  0x18   :  { %s11805_s15 = smov 0   ;;  %s11807_s16 = smov 0  }
  0x19 LB: > { %s11692_s17 = smov [#allocation7]   ;;  %s11822_s19 = sadd.s32 4294967295, %s11690_s16   ;;  %s11690_s16 = sphi %s11807_s16, %s13024_s16   ;;  %s11686_s15 = sphi %s11805_s15, %s13023_s15   ;;  %s11682_s30 = sphi %s11803_s30, %s13022_s30   ;;  %s11678_s29 = sphi %s11801_s29, %s13021_s29  }
  0x1a   : > { %s386_s18 = sshll.u32 %s11692_s17, 4  ;;  %p9055_p0 = scmp.ge.s32.totalorder %s11690_s16, 1  ;;  %s11827_s18 = int_to_ptr.vmem [resolvable:$true] %s386_s18 }
  0x1b   : > { %p12963_p1 = scmp.eq.s32.totalorder %s11822_s19, 0  ;;  %p373_p2 = scmp.lt.s32.totalorder %s11690_s16, 3 }
  0x1c   : > { %s11693_s21 = smov [#allocation8]   ;;  %s11694_s23 = smov [#allocation11]  }
  0x1d   : > { %p11829_p3 = pnand %p9055_p0, %p373_p2  ;;  %s397_s22 = sshll.u32 %s11693_s21, 4  ;;  %s11836_s22 = int_to_ptr.vmem [resolvable:$true] %s397_s22 }
  0x1e   : > { %s419_s24 = sshll.u32 %s11694_s23, 4  ;;  %s11695_s26 = smov [#allocation14]   ;;  %s11844_s24 = int_to_ptr.vmem [resolvable:$true] %s419_s24 }
  0x1f   : > { %s12981_s20 = scalar_select %p11829_p3, 1, 0 }
  0x20   : > { %p10426_p5 = pneg %p11829_p3  ;;  %s11846_s27 = sshll.u32 %s11695_s26, 4  ;;  %s444_s27 = int_to_ptr.vmem [resolvable:$true] %s11846_s27 }
  0x21   : > { %12982 = sst [smem:[#allocation33_spill]] %s12981_s20  ;;  %s12984_s2 = sld [smem:[#allocation36_spill]] }
  0x22   : > { %p11840_p6 = pnand %p10426_p5, %p12963_p1 }
  0x24   : > { %p11856_p8 = pneg %p11840_p6 }
  0x27   : > { %s11228_s14 = scalar_lea.hbm %s12984_s2, 48 }
  0x28   : > { %p11229_p7 = scmp.ne.s32.totalorder %s12984_s2, %s11228_s14  ;;  %p11235_p11 = scmp.lt.u32.totalorder %s11228_s14, %s12984_s2 }
  0x2a   : > { %p11231_p9 = pnand %p11856_p8, %p11229_p7 }
  0x2c   : > { %p11232_p10 = pneg %p11231_p9 }
  0x2e   : > { %p11237_p12 = pnand %p11235_p11, %p11232_p10 }
  0x30   : > { %11240 = shalt.err (!%p11237_p12)
}
  0x31   : > { %s11241_s6 = scalar_lea.vmem %s11827_s18, 48  ;;  %s11248_s28 = scalar_lea.vmem %s11827_s18, 64 }
  0x32   : > { %p11242_p13 = scmp.ne.s32.totalorder %s11827_s18, %s11241_s6  ;;  %p11249_p5 = scmp.lt.s32.totalorder %s11827_s18, %s11827_s18 }
  0x33   : > { %p11250_p7 = scmp.lt.s32.totalorder %s11248_s28, %s11241_s6 }
  0x34   : > { %p11244_p0 = pnand %p11242_p13, %p11856_p8 }
  0x35   : > { %p11251_p9 = por %p11250_p7, %p11249_p5 }
  0x36   : > { %p11245_p2 = pneg %p11244_p0 }
  0x38   : > { %p11252_p4 = pnand %p11251_p9, %p11245_p2 }
  0x3a   : > { %11255 = shalt.err (!%p11252_p4)
}
  0x3b   : > { %10429 = dma.hbm_to_vmem [thread:$0]  (!%p11840_p6), %s12984_s2, 48, %s11827_s18, [#allocation6]  }
  0x3c   : > { %s12986_s3 = sld [smem:[#allocation37_spill]] }
  0x42   : > { %s11256_s26 = scalar_lea.hbm %s12986_s3, 48 }
  0x43   : > { %p11257_p10 = scmp.ne.s32.totalorder %s12986_s3, %s11256_s26  ;;  %p11263_p4 = scmp.lt.u32.totalorder %s11256_s26, %s12986_s3 }
  0x45   : > { %p11259_p11 = pnand %p11257_p10, %p11856_p8 }
  0x47   : > { %p11260_p12 = pneg %p11259_p11 }
  0x49   : > { %p11265_p13 = pnand %p11263_p4, %p11260_p12 }
  0x4b   : > { %11268 = shalt.err (!%p11265_p13)
}
  0x4c   : > { %s11269_s18 = scalar_lea.vmem %s11836_s22, 48  ;;  %s11276_s0 = scalar_lea.vmem %s11836_s22, 64 }
  0x4d   : > { %p11270_p0 = scmp.ne.s32.totalorder %s11836_s22, %s11269_s18  ;;  %p11277_p7 = scmp.lt.s32.totalorder %s11836_s22, %s11836_s22 }
  0x4e   : > { %p11278_p9 = scmp.lt.s32.totalorder %s11276_s0, %s11269_s18 }
  0x4f   : > { %p11272_p2 = pnand %p11270_p0, %p11856_p8 }
  0x50   : > { %p11279_p10 = por %p11278_p9, %p11277_p7 }
  0x51   : > { %p11273_p5 = pneg %p11272_p2 }
  0x53   : > { %p11280_p11 = pnand %p11279_p10, %p11273_p5 }
  0x55   : > { %11283 = shalt.err (!%p11280_p11)
}
  0x56   : > { %10432 = dma.hbm_to_vmem [thread:$0]  (!%p11840_p6), %s12986_s3, 48, %s11836_s22, [#allocation9]  }
  0x57   : > { %s12987_s5 = sld [smem:[#allocation39_spill]] }
  0x5d   : > { %s11284_s21 = scalar_lea.hbm %s12987_s5, 48 }
  0x5e   : > { %p11285_p12 = scmp.ne.s32.totalorder %s12987_s5, %s11284_s21  ;;  %p11291_p0 = scmp.lt.u32.totalorder %s11284_s21, %s12987_s5 }
  0x60   : > { %p11287_p4 = pnand %p11285_p12, %p11856_p8 }
  0x62   : > { %p11288_p13 = pneg %p11287_p4 }
  0x64   : > { %p11293_p2 = pnand %p11291_p0, %p11288_p13 }
  0x66   : > { %11296 = shalt.err (!%p11293_p2)
}
  0x67   : > { %s11297_s22 = scalar_lea.vmem %s11844_s24, 48  ;;  %s11304_s0 = scalar_lea.vmem %s11844_s24, 64 }
  0x68   : > { %p11298_p5 = scmp.ne.s32.totalorder %s11844_s24, %s11297_s22  ;;  %p11305_p10 = scmp.lt.s32.totalorder %s11844_s24, %s11844_s24 }
  0x69   : > { %p11306_p11 = scmp.lt.s32.totalorder %s11304_s0, %s11297_s22 }
  0x6a   : > { %p11300_p7 = pnand %p11298_p5, %p11856_p8 }
  0x6b   : > { %p11307_p12 = por %p11306_p11, %p11305_p10 }
  0x6c   : > { %p11301_p9 = pneg %p11300_p7 }
  0x6e   : > { %p11308_p4 = pnand %p11307_p12, %p11301_p9 }
  0x70   : > { %11311 = shalt.err (!%p11308_p4)
}
  0x71   : > { %10438 = dma.hbm_to_vmem [thread:$0]  (!%p11840_p6), %s12987_s5, 48, %s11844_s24, [#allocation12]  }
  0x72   : > { %s12988_s8 = sld [smem:[#allocation42_spill]] }
  0x78   : > { %s11312_s21 = scalar_lea.hbm %s12988_s8, 1536 }
  0x79   : > { %p11313_p13 = scmp.ne.s32.totalorder %s12988_s8, %s11312_s21  ;;  %p11319_p5 = scmp.lt.u32.totalorder %s11312_s21, %s12988_s8 }
  0x7b   : > { %p11315_p0 = pnand %p11313_p13, %p11856_p8 }
  0x7d   : > { %p11316_p2 = pneg %p11315_p0 }
  0x7f   : > { %p11321_p7 = pnand %p11319_p5, %p11316_p2 }
  0x81   : > { %11324 = shalt.err (!%p11321_p7)
}
  0x82   : > { %s11325_s22 = scalar_lea.vmem %s444_s27, 1536  ;;  %p11333_p12 = scmp.lt.s32.totalorder %s444_s27, %s444_s27 }
  0x83   : > { %p11326_p9 = scmp.ne.s32.totalorder %s444_s27, %s11325_s22  ;;  %p11334_p4 = scmp.lt.s32.totalorder %s11325_s22, %s11325_s22 }
  0x85   : > { %p11328_p10 = pnand %p11326_p9, %p11856_p8  ;;  %p11335_p1 = por %p11334_p4, %p11333_p12 }
  0x87   : > { %p11329_p11 = pneg %p11328_p10 }
  0x89   : > { %p11336_p3 = pnand %p11335_p1, %p11329_p11 }
  0x8b   : > { %11339 = shalt.err (!%p11336_p3)
}
  0x8c   : > { %s12965_s24 = smov 192   ;;  %s12966_s0 = smov 12  }
  0x8d   : > { %10444 = dma.hbm_to_vmem [thread:$0]  (!%p11840_p6), %s12988_s8, 1536, %s444_s27, [#allocation15], %s12965_s24, %s12965_s24, %s12966_s0  }
  0x8e   : > { %s11698_s20 = smov [#allocation17]   ;;  %s12989_s10 = sld [smem:[#allocation44_spill]] }
  0x8f   : > { %s467_s17 = sshll.u32 %s11698_s20, 4  ;;  %s468_s17 = int_to_ptr.vmem [resolvable:$true] %s467_s17 }
  0x94   : > { %s11340_s6 = scalar_lea.hbm %s12989_s10, 49152 }
  0x95   : > { %p11341_p1 = scmp.ne.s32.totalorder %s12989_s10, %s11340_s6  ;;  %p11347_p0 = scmp.lt.u32.totalorder %s11340_s6, %s12989_s10 }
  0x97   : > { %p11343_p3 = pnand %p11341_p1, %p11856_p8 }
  0x99   : > { %p11344_p13 = pneg %p11343_p3 }
  0x9b   : > { %p11349_p2 = pnand %p11347_p0, %p11344_p13 }
  0x9d   : > { %11352 = shalt.err (!%p11349_p2)
}
  0x9e   : > { %s11353_s27 = scalar_lea.vmem %s468_s17, 49152  ;;  %p11361_p10 = scmp.lt.s32.totalorder %s468_s17, %s468_s17 }
  0x9f   : > { %p11354_p5 = scmp.ne.s32.totalorder %s468_s17, %s11353_s27  ;;  %p11362_p11 = scmp.lt.s32.totalorder %s11353_s27, %s11353_s27 }
  0xa1   : > { %p11356_p7 = pnand %p11354_p5, %p11856_p8  ;;  %p11363_p12 = por %p11362_p11, %p11361_p10 }
  0xa3   : > { %p11357_p9 = pneg %p11356_p7 }
  0xa5   : > { %p11364_p4 = pnand %p11363_p12, %p11357_p9 }
  0xa7   : > { %11367 = shalt.err (!%p11364_p4)
}
  0xa8   : > { %s11699_s1 = smov 1024   ;;  %s11700_s14 = smov 64  }
  0xa9   : > { %10450 = dma.hbm_to_vmem [thread:$0]  (!%p11840_p6), %s12989_s10, 49152, %s468_s17, [#allocation18], %s11699_s1, %s11699_s1, %s11700_s14  }
  0xaa   : > { %s11701_s21 = smov [#allocation20]   ;;  %s11702_s6 = smov [#allocation10]  }
  0xab   : > { %s491_s26 = sshll.u32 %s11701_s21, 4  ;;  %s408_s28 = sshll.u32 %s11702_s6, 4  ;;  %s492_s26 = int_to_ptr.vmem [resolvable:$true] %s491_s26  ;;  %s409_s28 = int_to_ptr.vmem [resolvable:$true] %s408_s28 }
  0xac   : > { %s11368_s27 = scalar_lea.hbm %s12955_s12, 49152 }
  0xad   : > { %p11369_p1 = scmp.ne.s32.totalorder %s12955_s12, %s11368_s27  ;;  %p11375_p0 = scmp.lt.u32.totalorder %s11368_s27, %s12955_s12 }
  0xaf   : > { %p11371_p3 = pnand %p11369_p1, %p11856_p8 }
  0xb1   : > { %p11372_p13 = pneg %p11371_p3 }
  0xb3   : > { %p11377_p2 = pnand %p11375_p0, %p11372_p13 }
  0xb5   : > { %11380 = shalt.err (!%p11377_p2)
}
  0xb6   : > { %s11381_s17 = scalar_lea.vmem %s492_s26, 49152  ;;  %p11389_p10 = scmp.lt.s32.totalorder %s492_s26, %s492_s26 }
  0xb7   : > { %p11382_p5 = scmp.ne.s32.totalorder %s492_s26, %s11381_s17  ;;  %p11390_p11 = scmp.lt.s32.totalorder %s11381_s17, %s11381_s17 }
  0xb9   : > { %p11384_p7 = pnand %p11382_p5, %p11856_p8  ;;  %p11391_p12 = por %p11390_p11, %p11389_p10 }
  0xbb   : > { %p11385_p9 = pneg %p11384_p7 }
  0xbd   : > { %p11392_p4 = pnand %p11391_p12, %p11385_p9 }
  0xbf   : > { %11395 = shalt.err (!%p11392_p4)
}
  0xc0   : > { %s12990_s24 = smov 12   ;;  %s12991_s0 = smov 192  }
  0xc1   : > { %10456 = dma.hbm_to_vmem [thread:$0]  (!%p11840_p6), %s12955_s12, 49152, %s492_s26, [#allocation21], %s12991_s0, %s12991_s0, %s12990_s24  }
  0xc2   : > { %s12992_s4 = sld [smem:[#allocation38_spill]] }
  0xc8   : > { %s11396_s2 = scalar_lea.hbm %s12992_s4, 48 }
  0xc9   : > { %p11397_p1 = scmp.ne.s32.totalorder %s12992_s4, %s11396_s2  ;;  %p11403_p0 = scmp.lt.u32.totalorder %s11396_s2, %s12992_s4 }
  0xcb   : > { %p11399_p3 = pnand %p11397_p1, %p11856_p8 }
  0xcd   : > { %p11400_p13 = pneg %p11399_p3 }
  0xcf   : > { %p11405_p2 = pnand %p11403_p0, %p11400_p13 }
  0xd1   : > { %11408 = shalt.err (!%p11405_p2)
}
  0xd2   : > { %s11409_s22 = scalar_lea.vmem %s409_s28, 48  ;;  %s11416_s26 = scalar_lea.vmem %s409_s28, 64 }
  0xd3   : > { %p11410_p5 = scmp.ne.s32.totalorder %s409_s28, %s11409_s22  ;;  %p11417_p10 = scmp.lt.s32.totalorder %s409_s28, %s409_s28 }
  0xd4   : > { %p11418_p11 = scmp.lt.s32.totalorder %s11416_s26, %s11409_s22 }
  0xd5   : > { %p11412_p7 = pnand %p11410_p5, %p11856_p8 }
  0xd6   : > { %p11419_p12 = por %p11418_p11, %p11417_p10 }
  0xd7   : > { %p11413_p9 = pneg %p11412_p7 }
  0xd9   : > { %p11420_p4 = pnand %p11419_p12, %p11413_p9 }
  0xdb   : > { %11423 = shalt.err (!%p11420_p4)
}
  0xdc   : > { %10435 = dma.hbm_to_vmem [thread:$0]  (!%p11840_p6), %s12992_s4, 48, %s409_s28, [#allocation9]  }
  0xdd   : > { %s11703_s24 = smov [#allocation13]   ;;  %s11704_s3 = smov [#allocation16]  }
  0xde   : > { %s433_s0 = sshll.u32 %s11703_s24, 4  ;;  %s457_s5 = sshll.u32 %s11704_s3, 4  ;;  %s434_s0 = int_to_ptr.vmem [resolvable:$true] %s433_s0  ;;  %s458_s5 = int_to_ptr.vmem [resolvable:$true] %s457_s5 }
  0xdf   : > { %s12993_s7 = sld [smem:[#allocation41_spill]] }
  0xe5   : > { %s11424_s2 = scalar_lea.hbm %s12993_s7, 32 }
  0xe6   : > { %p11425_p1 = scmp.ne.s32.totalorder %s12993_s7, %s11424_s2  ;;  %p11431_p0 = scmp.lt.u32.totalorder %s11424_s2, %s12993_s7 }
  0xe8   : > { %p11427_p3 = pnand %p11425_p1, %p11856_p8 }
  0xea   : > { %p11428_p13 = pneg %p11427_p3 }
  0xec   : > { %p11433_p2 = pnand %p11431_p0, %p11428_p13 }
  0xee   : > { %11436 = shalt.err (!%p11433_p2)
}
  0xef   : > { %s11437_s28 = scalar_lea.vmem %s434_s0, 32  ;;  %p11445_p10 = scmp.lt.s32.totalorder %s434_s0, %s434_s0 }
  0xf0   : > { %p11438_p5 = scmp.ne.s32.totalorder %s434_s0, %s11437_s28  ;;  %p11446_p11 = scmp.lt.s32.totalorder %s11437_s28, %s11437_s28 }
  0xf2   : > { %p11440_p7 = pnand %p11438_p5, %p11856_p8  ;;  %p11447_p12 = por %p11446_p11, %p11445_p10 }
  0xf4   : > { %p11441_p9 = pneg %p11440_p7 }
  0xf6   : > { %p11448_p4 = pnand %p11447_p12, %p11441_p9 }
  0xf8   : > { %11451 = shalt.err (!%p11448_p4)
}
  0xf9   : > { %10441 = dma.hbm_to_vmem [thread:$0]  (!%p11840_p6), %s12993_s7, 32, %s434_s0, [#allocation12]  }
  0xfa   : > { %s12994_s9 = sld [smem:[#allocation43_spill]] }
 0x100   : > { %s11452_s24 = scalar_lea.hbm %s12994_s9, 48 }
 0x101   : > { %p11453_p1 = scmp.ne.s32.totalorder %s12994_s9, %s11452_s24  ;;  %p11459_p0 = scmp.lt.u32.totalorder %s11452_s24, %s12994_s9 }
 0x103   : > { %p11455_p3 = pnand %p11453_p1, %p11856_p8 }
 0x105   : > { %p11456_p13 = pneg %p11455_p3 }
 0x107   : > { %p11461_p2 = pnand %p11459_p0, %p11456_p13 }
 0x109   : > { %11464 = shalt.err (!%p11461_p2)
}
 0x10a   : > { %s11465_s20 = scalar_lea.vmem %s458_s5, 48  ;;  %s11472_s0 = scalar_lea.vmem %s458_s5, 64 }
 0x10b   : > { %p11466_p5 = scmp.ne.s32.totalorder %s458_s5, %s11465_s20  ;;  %p11473_p10 = scmp.lt.s32.totalorder %s458_s5, %s458_s5 }
 0x10c   : > { %p11474_p11 = scmp.lt.s32.totalorder %s11472_s0, %s11465_s20 }
 0x10d   : > { %p11468_p7 = pnand %p11466_p5, %p11856_p8 }
 0x10e   : > { %p11475_p12 = por %p11474_p11, %p11473_p10 }
 0x10f   : > { %p11469_p9 = pneg %p11468_p7 }
 0x111   : > { %p11476_p4 = pnand %p11475_p12, %p11469_p9 }
 0x113   : > { %11479 = shalt.err (!%p11476_p4)
}
 0x114   : > { %10447 = dma.hbm_to_vmem [thread:$0]  (!%p11840_p6), %s12994_s9, 48, %s458_s5, [#allocation15]  }
 0x115   : > { %s11705_s18 = smov [#allocation19]   ;;  %s11706_s22 = smov [#allocation22]  }
 0x116   : > { %s481_s28 = sshll.u32 %s11705_s18, 4  ;;  %s505_s26 = sshll.u32 %s11706_s22, 4  ;;  %s482_s28 = int_to_ptr.vmem [resolvable:$true] %s481_s28  ;;  %s506_s26 = int_to_ptr.vmem [resolvable:$true] %s505_s26 }
 0x117   : > { %s11480_s24 = scalar_lea.hbm %s12954_s11, 256 }
 0x118   : > { %p11481_p1 = scmp.ne.s32.totalorder %s12954_s11, %s11480_s24  ;;  %p11487_p0 = scmp.lt.u32.totalorder %s11480_s24, %s12954_s11 }
 0x11a   : > { %p11483_p3 = pnand %p11481_p1, %p11856_p8 }
 0x11c   : > { %p11484_p13 = pneg %p11483_p3 }
 0x11e   : > { %p11489_p2 = pnand %p11487_p0, %p11484_p13 }
 0x120   : > { %11492 = shalt.err (!%p11489_p2)
}
 0x121   : > { %s11493_s5 = scalar_lea.vmem %s482_s28, 256  ;;  %p11501_p10 = scmp.lt.s32.totalorder %s482_s28, %s482_s28 }
 0x122   : > { %p11494_p5 = scmp.ne.s32.totalorder %s482_s28, %s11493_s5  ;;  %p11502_p11 = scmp.lt.s32.totalorder %s11493_s5, %s11493_s5 }
 0x124   : > { %p11496_p7 = pnand %p11494_p5, %p11856_p8  ;;  %p11503_p12 = por %p11502_p11, %p11501_p10 }
 0x126   : > { %p11497_p9 = pneg %p11496_p7 }
 0x128   : > { %p11504_p4 = pnand %p11503_p12, %p11497_p9 }
 0x12a   : > { %11507 = shalt.err (!%p11504_p4)
}
 0x12b   : > { %10453 = dma.hbm_to_vmem [thread:$0]  (!%p11840_p6), %s12954_s11, 256, %s482_s28, [#allocation18]  }
 0x12c   : > { %s11508_s18 = scalar_lea.hbm %s12956_s13, 48 }
 0x12d   : > { %p11509_p1 = scmp.ne.s32.totalorder %s12956_s13, %s11508_s18  ;;  %p11515_p0 = scmp.lt.u32.totalorder %s11508_s18, %s12956_s13 }
 0x12f   : > { %p11511_p3 = pnand %p11509_p1, %p11856_p8 }
 0x131   : > { %p11512_p13 = pneg %p11511_p3 }
 0x133   : > { %p11517_p2 = pnand %p11515_p0, %p11512_p13 }
 0x135   : > { %11520 = shalt.err (!%p11517_p2)
}
 0x136   : > { %s11521_s3 = scalar_lea.vmem %s506_s26, 48  ;;  %s11528_s28 = scalar_lea.vmem %s506_s26, 64 }
 0x137   : > { %p11522_p5 = scmp.ne.s32.totalorder %s506_s26, %s11521_s3  ;;  %p11529_p10 = scmp.lt.s32.totalorder %s506_s26, %s506_s26 }
 0x138   : > { %p11530_p11 = scmp.lt.s32.totalorder %s11528_s28, %s11521_s3 }
 0x139   : > { %p11524_p7 = pnand %p11522_p5, %p11856_p8 }
 0x13a   : > { %p11531_p12 = por %p11530_p11, %p11529_p10 }
 0x13b   : > { %p11525_p9 = pneg %p11524_p7 }
 0x13d   : > { %p11532_p4 = pnand %p11531_p12, %p11525_p9 }
 0x13f   : > { %11535 = shalt.err (!%p11532_p4)
}
 0x140   : > { %10459 = dma.hbm_to_vmem [thread:$0]  (!%p11840_p6), %s12956_s13, 48, %s506_s26, [#allocation21]  }
 0x141   : > { %s9054_s23 = sadd.s32 4294967294, %s11690_s16   ;;  %s12079_s25 = sadd.s32 1, %s11690_s16  }
 0x142   : > { %s45_s2 = sadd.s32 1, %s11686_s15  ;;  %s42_s5 = ssub.s32 %s11690_s16, %s12079_s25 }
 0x143   : > { %p52_p8 = scmp.ne.s32.totalorder %s11686_s15, %s11682_s30  ;;  %p43_p1 = scmp.eq.s32.totalorder %s42_s5, 0 }
 0x144   : > { %p53_p3 = scmp.eq.s32.totalorder %s11690_s16, 0  ;;  %p58_p13 = scmp.ne.s32.totalorder %s11682_s30, %s11678_s29 }
 0x145   : > { %p360_p0 = scmp.eq.s32.totalorder %s11822_s19, 1  ;;  %p12995_p5 = scmp.eq.s32.totalorder %s11822_s19, 0 }
 0x146   : > { %s12091_s20 = scalar_select %p43_p1, %s11686_s15, %s45_s2  }
 0x147   : > { %p54_p2 = por %p53_p3, %p52_p8  ;;  %p12095_p7 = por %p12995_p5, %p58_p13 }
 0x148   : > { %p12099_p6 = por %p360_p0, %p52_p8  ;;  %p366_p9 = scmp.eq.s32.totalorder %s9054_s23, 1 }
 0x149   : > { %p10482_p10 = scmp.lt.s32.totalorder %s11690_s16, 2  ;;  %s12105_s21 = sand.u32 1, %s11686_s15  }
 0x14a   : > { %s12997_s26 = scalar_select %p12099_p6, 1, 0 }
 0x14b   : > { %p12107_p11 = por %p366_p9, %p58_p13  ;;  %s10372_s18 = smul.u32 48, %s12105_s21 }
 0x14c   : > { %p12112_p12 = pnand %p10482_p10, %p54_p2  ;;  %s10373_s27 = smul.u32 768, %s11690_s16 }
 0x14d   : > { %s12998_s6 = scalar_select %p12107_p11, 1, 0 }
 0x14e   : > { %s13000_s3 = sld [smem:[#allocation34_spill]]  ;;  %s520_s1 = scalar_lea.vmem [#allocation2], %s10372_s18 }
 0x14f   : > { %s528_s14 = sshll.u32 %s520_s1, 4  ;;  %s517_s23 = scalar_lea.sflag [#allocation3], %s12105_s21  ;;  %s12122_s14 = int_to_ptr.vmem [resolvable:$true] %s528_s14 }
 0x150   : > { %p11538_p8 = pneg %p12112_p12 }
 0x154   : > { %s12120_s28 = scalar_lea.hbm %s13000_s3, %s10373_s27  ;;  %s11541_s17 = scalar_lea.hbm %s13000_s3, 1536 }
 0x155   : > { %s11536_s2 = scalar_lea.hbm %s12120_s28, 768  ;;  %p11542_p13 = scmp.lt.u32.totalorder %s12120_s28, %s13000_s3 }
 0x156   : > { %p11537_p4 = scmp.ne.s32.totalorder %s12120_s28, %s11536_s2  ;;  %p11543_p0 = scmp.lt.u32.totalorder %s11541_s17, %s11536_s2 }
 0x157   : > { %p11545_p5 = scmp.lt.u32.totalorder %s11536_s2, %s12120_s28 }
 0x158   : > { %p11539_p1 = pnand %p11538_p8, %p11537_p4  ;;  %p11544_p2 = por %p11543_p0, %p11542_p13 }
 0x15a   : > { %p11540_p3 = pneg %p11539_p1  ;;  %p11546_p9 = por %p11545_p5, %p11544_p2 }
 0x15c   : > { %p11547_p10 = pnand %p11546_p9, %p11540_p3 }
 0x15e   : > { %11550 = shalt.err (!%p11547_p10)
}
 0x15f   : > { %s11551_s18 = scalar_lea.vmem %s12122_s14, 768  ;;  %s11707_s1 = smov [#allocation2]  }
 0x160   : > { %p11552_p4 = scmp.ne.s32.totalorder %s12122_s14, %s11551_s18  ;;  %s11556_s5 = sshll.u32 %s11707_s1, 4  ;;  %s11557_s5 = int_to_ptr.vmem [resolvable:$false] %s11556_s5 }
 0x161   : > { %s11558_s4 = scalar_lea.vmem %s11557_s5, 1536  ;;  %p11559_p6 = scmp.lt.s32.totalorder %s12122_s14, %s11557_s5 }
 0x162   : > { %p11554_p1 = pnand %p11552_p4, %p11538_p8  ;;  %p11560_p13 = scmp.lt.s32.totalorder %s11558_s4, %s11551_s18 }
 0x164   : > { %p11555_p11 = pneg %p11554_p1  ;;  %p11561_p0 = por %p11560_p13, %p11559_p6 }
 0x166   : > { %p11562_p2 = pnand %p11561_p0, %p11555_p11 }
 0x168   : > { %11565 = shalt.err (!%p11562_p2)
}
 0x169   : > { %s11708_s2 = smov 384   ;;  %s11709_s27 = smov 24  }
 0x16a   : > { %10463 = dma.hbm_to_vmem [thread:$0]  (!%p12112_p12), %s12120_s28, 768, %s12122_s14, %s517_s23, %s11708_s2, %s11708_s2, %s11709_s27  }
 0x16b   : > { %s538_s17 = sand.u32 1, %s11690_s16   ;;  %s9071_s24 = sshll.u32 %s12105_s21, 1 }
 0x16c   : > { %s9942_s1 = sshll.u32 %s11690_s16, 5  ;;  %s542_s18 = scalar_lea.vmem [#allocation5], %s9071_s24 }
 0x16d   : > { %s549_s5 = sshll.u32 %s542_s18, 4  ;;  %s13001_s7 = sld [smem:[#allocation35_spill]]  ;;  %s12160_s5 = int_to_ptr.vmem [resolvable:$true] %s549_s5 }
 0x16e   : > { %s12162_s9 = scalar_lea.sflag [#allocation6], %s538_s17 }
 0x173   : > { %s12158_s8 = scalar_lea.hbm %s13001_s7, %s9942_s1  ;;  %s11571_s3 = scalar_lea.hbm %s13001_s7, 64 }
 0x174   : > { %s11566_s10 = scalar_lea.hbm %s12158_s8, 32  ;;  %p11572_p5 = scmp.lt.u32.totalorder %s12158_s8, %s13001_s7 }
 0x175   : > { %p11567_p6 = scmp.ne.s32.totalorder %s12158_s8, %s11566_s10  ;;  %p11573_p9 = scmp.lt.u32.totalorder %s11571_s3, %s11566_s10 }
 0x176   : > { %p11575_p4 = scmp.lt.u32.totalorder %s11566_s10, %s12158_s8 }
 0x177   : > { %p11569_p11 = pnand %p11567_p6, %p11538_p8  ;;  %p11574_p10 = por %p11573_p9, %p11572_p5 }
 0x179   : > { %p11570_p3 = pneg %p11569_p11  ;;  %p11576_p1 = por %p11575_p4, %p11574_p10 }
 0x17b   : > { %p11577_p13 = pnand %p11576_p1, %p11570_p3 }
 0x17d   : > { %11580 = shalt.err (!%p11577_p13)
}
 0x17e   : > { %s11581_s2 = scalar_lea.vmem %s12160_s5, 32  ;;  %s11710_s27 = smov [#allocation5]  }
 0x17f   : > { %p11582_p0 = scmp.ne.s32.totalorder %s12160_s5, %s11581_s2  ;;  %s11586_s17 = sshll.u32 %s11710_s27, 4  ;;  %s11587_s17 = int_to_ptr.vmem [resolvable:$false] %s11586_s17 }
 0x180   : > { %s11588_s24 = scalar_lea.vmem %s11587_s17, 64  ;;  %p11589_p11 = scmp.lt.s32.totalorder %s12160_s5, %s11587_s17 }
 0x181   : > { %p11584_p2 = pnand %p11582_p0, %p11538_p8  ;;  %p11590_p5 = scmp.lt.s32.totalorder %s11588_s24, %s11581_s2 }
 0x183   : > { %p11585_p6 = pneg %p11584_p2  ;;  %p11591_p9 = por %p11590_p5, %p11589_p11 }
 0x185   : > { %p11592_p10 = pnand %p11591_p9, %p11585_p6 }
 0x187   : > { %11595 = shalt.err (!%p11592_p10)
}
 0x188   : > { %s11711_s10 = smov 16   ;;  %s11712_s1 = smov 1  }
 0x189   : > { %10466 = dma.hbm_to_vmem [thread:$0]  (!%p12112_p12), %s12158_s8, 32, %s12160_s5, %s12162_s9, %s11711_s10, %s11711_s10, %s11712_s1  }
 0x18a   : > { %s13002_s18 = sld [smem:[#allocation33_spill]] }
 0x190   : > { %p13003_p8 = scmp.ne.s32.totalorder %s13002_s18, 0 }
 0x191   : > { %s12191_s4 = sand.u32 (!%p13003_p8), 1, %s11682_s30  }
 0x192   : > { %561 = sbr.rel (%p13003_p8) target bundleno = 5222 (0x1466), region = 76  ;;  %s564_s28 = scalar_lea.sflag (!%p13003_p8), [#allocation3], %s12191_s4 }
 0x193   : > { %s10374_s21 = smul.u32 (!%p13003_p8), 48, %s12191_s4 }
 0x195   : > { %s12197_s3 = scalar_lea.vmem (!%p13003_p8), [#allocation2], %s10374_s21 }
 0x199   : > { %11641 = dma.done.wait (%p12095_p7), %s564_s28, 768  }
 0x19a   : > { %11643 = vsyncadd (%p12095_p7), %s564_s28, 4294966528  ;;  %s572_s8 = sand.u32 1, %s11822_s19   ;;  %s9075_s9 = sshll.u32 %s12191_s4, 1 }
 0x19b   : > { %s573_s22 = scalar_lea.sflag [#allocation6], %s572_s8  ;;  %s12205_s5 = scalar_lea.vmem [#allocation5], %s9075_s9 }
 0x19c   : > { %11645 = dma.done.wait (%p12095_p7), %s573_s22, 32  }
 0x19d   : > { %11647 = vsyncadd (%p12095_p7), %s573_s22, 4294967264  ;;  %p13004_p12 = scmp.eq.s32.totalorder %s11822_s19, 0 }
 0x19f   : > { %11649 = dma.done.wait (%p13004_p12), [#allocation6], 48   ;;  %p13005_p3 = pmov %p13004_p12 }
 0x1a1   : > { %11651 = vsyncadd (%p13005_p3), [#allocation6], 4294967248  ;;  %p13006_p4 = pmov %p13005_p3 }
 0x1a2   : > { %p13007_p1 = pmov %p13005_p3 }
 0x1a3   : > { %11653 = dma.done.wait (%p13006_p4), [#allocation9], 96  }
 0x1a4   : > { %11655 = vsyncadd (%p13007_p1), [#allocation9], 4294967200  ;;  %p13008_p13 = pmov %p13007_p1 }
 0x1a5   : > { %p13009_p0 = pmov %p13007_p1 }
 0x1a6   : > { %11657 = dma.done.wait (%p13008_p13), [#allocation12], 80  }
 0x1a7   : > { %11659 = vsyncadd (%p13009_p0), [#allocation12], 4294967216  ;;  %p13010_p7 = pmov %p13009_p0 }
 0x1a8   : > { %p13011_p2 = pmov %p13009_p0 }
 0x1a9   : > { %11661 = dma.done.wait (%p13010_p7), [#allocation15], 1584  }
 0x1aa   : > { %11663 = vsyncadd (%p13011_p2), [#allocation15], 4294965712  ;;  %p13012_p6 = pmov %p13009_p0 }
 0x1ab   : > { %p13013_p11 = pmov %p13009_p0 }
 0x1ac   : > { %11665 = dma.done.wait (%p13012_p6), [#allocation18], 49408  }
 0x1ad   : > { %11667 = vsyncadd (%p13013_p11), [#allocation18], 4294917888  ;;  %p13014_p5 = pmov %p13009_p0 }
 0x1ae   : > { %p13015_p9 = pmov %p13009_p0 }
 0x1af   : > { %11669 = dma.done.wait (%p13014_p5), [#allocation21], 49200  }
 0x1b0   : > { %11671 = vsyncadd (%p13015_p9), [#allocation21], 4294918096  ;;  %v681_v0 = vld [vmem:[%s12197_s3] sm:$0xff]  ;;  %v682_v1 = vld [vmem:[%s12197_s3 + $0x8] sm:$0xff]  ;;  %s13016_s23 = sld [smem:[#allocation40_spill]]  ;;  %v674_v22 = vlaneseq  ;;  %vm11715_vm5 = vmmov 0  }
 0x1b1   : > { %v683_v2 = vld [vmem:[%s12197_s3 + $0x10] sm:$0xff]  ;;  %v707_v3 = vadd.f32 %v682_v1, %v681_v0  ;;  %v684_v4 = vld [vmem:[%s12197_s3 + $0x18] sm:$0xff]  ;;  %v685_v5 = vld [vmem:[%s12197_s3 + $0x20] sm:$0xff]  ;;  %s11716_s24 = smov 64   ;;  %vm1221_vm6 = vcmask 130048   ;;  %vm1350_vm7 = vcmask 1043456  }
 0x1b2   : > { %v686_v6 = vld [vmem:[%s12197_s3 + $0x28] sm:$0xff]  ;;  %v711_v7 = vadd.f32 %v685_v5, %v684_v4  ;;  %v675_v23 = vand.u32 127, %v674_v22  ;;  %vm1321_vm10 = vcmask 64512   ;;  %s11718_s10 = smov 112   ;;  %s11719_s1 = smov 32   ;;  %vm2145_vm11 = vcmask 261120  }
 0x1b3   : > { %v708_v8 = vadd.f32 %v707_v3, %v683_v2  ;;  %s11720_s18 = smov 96   ;;  %s11721_s28 = smov 16   ;;  %vm2148_vm12 = vcmask 392192   ;;  %vm2249_vm13 = vcmask 523264  }
 0x1b4   : > { %v712_v9 = vadd.f32 %v711_v7, %v686_v6  ;;  %v12278_v24 = vadd.s32 256, %v675_v23  ;;  %s11722_s8 = smov 80   ;;  %s10375_s22 = smul.u32 768, %s11822_s19 }
 0x1b5   : > { %709 = vadd.xlane.f32.xlu0 %v708_v8  ;;  %s13017_s0 = sld [smem:[#allocation45_spill]]  ;;  %s8840_s2 = scalar_lea.sflag [#allocation4], %s12191_s4 }
 0x1b6   : > { %v10573_v10 = vld [vmem:[%s13016_s23 + $0x4] ss:$8 sps:$4 sm:$0xff]   ;;  %v10575_v11 = vld [vmem:[%s13016_s23] ss:$8 sps:$4 sm:$0xff]   ;;  %v10576_v12 = vld [vmem:[%s13016_s23 + $0x14] ss:$8 sps:$4 sm:$0xff]  }
 0x1b7   : > { %1122 = vmatprep.subr.bf16.mxu1 %v10573_v10  ;;  %v10578_v13 = vld [vmem:[%s13016_s23 + $0x10] ss:$8 sps:$4 sm:$0xff]   ;;  %v10579_v14 = vld [vmem:[%s13016_s23 + $0x24] ss:$8 sps:$4 sm:$0xff]   ;;  %v10581_v15 = vld [vmem:[%s13016_s23 + $0x20] ss:$8 sps:$4 sm:$0xff]  }
 0x1b8   : > { %1123 = vmatpush1.bf16.msra.mxu1 %v10575_v11  ;;  %v10582_v16 = vld [vmem:[%s13016_s23 + $0x34] ss:$8 sps:$4 sm:$0xff]   ;;  %v10584_v17 = vld [vmem:[%s13016_s23 + $0x30] ss:$8 sps:$4 sm:$0xff]   ;;  %v10585_v18 = vld [vmem:[%s13016_s23 + $0x44] ss:$8 sps:$4 sm:$0xff]  }
 0x1b9   : > { %713 = vadd.xlane.f32.xlu0 %v712_v9  ;;  %1124 = vmatprep.subr.bf16.mxu1 %v10576_v12  ;;  %v10587_v19 = vld [vmem:[%s13016_s23 + $0x40] ss:$8 sps:$4 sm:$0xff]   ;;  %v10588_v20 = vld [vmem:[%s13016_s23 + $0x54] ss:$8 sps:$4 sm:$0xff]   ;;  %v10590_v21 = vld [vmem:[%s13016_s23 + $0x50] ss:$8 sps:$4 sm:$0xff]  }
 0x1ba   : > { %vm680_vm0 = vcmp.lt.s32.totalorder %v12278_v24, 300  ;;  %v10591_v47 = vld [vmem:[%s13016_s23 + $0x64] ss:$8 sps:$4 sm:$0xff]   ;;  %v10593_v48 = vld [vmem:[%s13016_s23 + $0x60] ss:$8 sps:$4 sm:$0xff]   ;;  %p13018_p8 = scmp.ne.s32.totalorder %s12997_s26, 0 }
 0x1bb   : > { %v10594_v49 = vld [vmem:[%s13016_s23 + $0x74] ss:$8 sps:$4 sm:$0xff]   ;;  %v10596_v50 = vld [vmem:[%s13016_s23 + $0x70] ss:$8 sps:$4 sm:$0xff]   ;;  %v10597_v51 = vld [vmem:[%s13016_s23 + $0x104] ss:$8 sps:$4 sm:$0xff]   ;;  %s12899_s14 = scalar_lea.hbm %s13017_s0, %s10375_s22 }
 0x1bc   : > { %1125 = vmatpush1.bf16.msra.mxu1 %v10578_v13  ;;  %v10599_v52 = vld [vmem:[%s13016_s23 + $0x84] ss:$8 sps:$4 sm:$0xff]   ;;  %v10601_v53 = vld [vmem:[%s13016_s23 + $0x100] ss:$8 sps:$4 sm:$0xff]   ;;  %1165 = vmatprep.subr.bf16.mxu0 %v10597_v51  ;;  %v10603_v55 = vld [vmem:[%s13016_s23 + $0x114] ss:$8 sps:$4 sm:$0xff]  }
 0x1bd   : > { %1126 = vmatprep.subr.bf16.mxu1 %v10579_v14  ;;  %v10602_v54 = vld [vmem:[%s13016_s23 + $0x80] ss:$8 sps:$4 sm:$0xff]   ;;  %1166 = vmatpush1.bf16.msra.mxu0 %v10601_v53  ;;  %v10605_v56 = vld [vmem:[%s13016_s23 + $0x94] ss:$8 sps:$4 sm:$0xff]   ;;  %v10607_v57 = vld [vmem:[%s13016_s23 + $0x110] ss:$8 sps:$4 sm:$0xff]  }
 0x1be   : > { %1167 = vmatprep.subr.bf16.mxu0 %v10603_v55  ;;  %v10608_v58 = vld [vmem:[%s13016_s23 + $0x90] ss:$8 sps:$4 sm:$0xff]   ;;  %v10609_v59 = vld [vmem:[%s13016_s23 + $0x124] ss:$8 sps:$4 sm:$0xff]   ;;  %v10613_v61 = vld [vmem:[%s13016_s23 + $0x120] ss:$8 sps:$4 sm:$0xff]  }
 0x1bf   : > { %v10611_v60 = vld [vmem:[%s13016_s23 + $0xa4] ss:$8 sps:$4 sm:$0xff]   ;;  %v10614_v62 = vld [vmem:[%s13016_s23 + $0xa0] ss:$8 sps:$4 sm:$0xff]   ;;  %v10615_v63 = vld [vmem:[%s13016_s23 + $0x134] ss:$8 sps:$4 sm:$0xff]  }
 0x1c0   : > { %1127 = vmatpush1.bf16.msra.mxu1 %v10581_v15  ;;  %v10621_v3 = vld [vmem:[%s13016_s23 + $0x144] ss:$8 sps:$4 sm:$0xff]   ;;  %v10627_v7 = vld [vmem:[%s13016_s23 + $0x154] ss:$8 sps:$4 sm:$0xff]   ;;  %v10631_v9 = vld [vmem:[%s13016_s23 + $0x150] ss:$8 sps:$4 sm:$0xff]  }
 0x1c1   : > { %1128 = vmatprep.subr.bf16.mxu1 %v10582_v16  ;;  %1168 = vmatpush1.bf16.msra.mxu0 %v10607_v57  ;;  %v10629_v8 = vld [vmem:[%s13016_s23 + $0xd4] ss:$8 sps:$4 sm:$0xff]   ;;  %v10632_v10 = vld [vmem:[%s13016_s23 + $0xd0] ss:$8 sps:$4 sm:$0xff]   ;;  %v10633_v11 = vld [vmem:[%s13016_s23 + $0x164] ss:$8 sps:$4 sm:$0xff]  }
 0x1c2   : > { %1169 = vmatprep.subr.bf16.mxu0 %v10609_v59  ;;  %v10635_v12 = vld [vmem:[%s13016_s23 + $0xe4] ss:$8 sps:$4 sm:$0xff]   ;;  %v10637_v13 = vld [vmem:[%s13016_s23 + $0x160] ss:$8 sps:$4 sm:$0xff]   ;;  %v10639_v15 = vld [vmem:[%s13016_s23 + $0x174] ss:$8 sps:$4 sm:$0xff]  }
 0x1c3   : > { %v10638_v14 = vld [vmem:[%s13016_s23 + $0xe0] ss:$8 sps:$4 sm:$0xff]   ;;  %v10641_v16 = vld [vmem:[%s13016_s23 + $0xf4] ss:$8 sps:$4 sm:$0xff]   ;;  %s11723_s17 = smov [#allocation23]  }
 0x1c4   : > { %1129 = vmatpush1.bf16.msra.mxu1 %v10584_v17  ;;  %v11713_v17 = vmov 0   ;;  %v706_v51 = vld [vmem:[#allocation8] sm:$0x7] }
 0x1c5   : > { %1130 = vmatprep.subr.bf16.mxu1 %v10585_v18  ;;  %1170 = vmatpush1.bf16.msra.mxu0 %v10613_v61  ;;  %v10643_v18 = vld [vmem:[%s13016_s23 + $0x170] ss:$8 sps:$4 sm:$0xff]  }
 0x1c6   : > { %1171 = vmatprep.subr.bf16.mxu0 %v10615_v63  ;;  %1197 = vmatprep.mubr.bf16.mxu0 %v11713_v17 }
 0x1c8   : > { %1131 = vmatpush1.bf16.msra.mxu1 %v10587_v19  ;;  %v10644_v19 = vld [vmem:[%s13016_s23 + $0xf0] ss:$8 sps:$4 sm:$0xff]  }
 0x1c9   : > { %1132 = vmatprep.subr.bf16.mxu1 %v10588_v20 }
 0x1cc   : > { %1133 = vmatpush1.bf16.msra.mxu1 %v10590_v21 }
 0x1cd   : > { %1134 = vmatprep.subr.bf16.mxu1 %v10591_v47 }
 0x1d0   : > { %1135 = vmatpush1.bf16.msra.mxu1 %v10593_v48 }
 0x1d1   : > { %1136 = vmatprep.subr.bf16.mxu1 %v10594_v49 }
 0x1d4   : > { %1137 = vmatpush1.bf16.msra.mxu1 %v10596_v50 }
 0x1d5   : > { %1138 = vmatprep.subr.bf16.mxu1 %v10599_v52 }
 0x1d8   : > { %1139 = vmatpush1.bf16.msra.mxu1 %v10602_v54 }
 0x1d9   : > { %1140 = vmatprep.subr.bf16.mxu1 %v10605_v56 }
 0x1dc   : > { %1141 = vmatpush1.bf16.msra.mxu1 %v10608_v58 }
 0x1dd   : > { %1142 = vmatprep.subr.bf16.mxu1 %v10611_v60 }
 0x1e0   : > { %1143 = vmatpush1.bf16.msra.mxu1 %v10614_v62 }
 0x242   : > { %v710_v25 = vpop.xlane.xlu0 %709 }
 0x243   : > { %v715_v26 = vmul.f32 0.0033333334, %v710_v25 }
 0x245   : > { %v12281_v27 = vsub.f32 %v681_v0, %v715_v26  ;;  %v12283_v28 = vsub.f32 %v682_v1, %v715_v26  ;;  %v12285_v29 = vsub.f32 %v683_v2, %v715_v26  ;;  %v10617_v0 = vld [vmem:[%s13016_s23 + $0xb4] ss:$8 sps:$4 sm:$0xff]   ;;  %v10619_v1 = vld [vmem:[%s13016_s23 + $0x130] ss:$8 sps:$4 sm:$0xff]  }
 0x246   : > { %v714_v30 = vpop.xlane.xlu0 %713  ;;  %v10620_v2 = vld [vmem:[%s13016_s23 + $0xb0] ss:$8 sps:$4 sm:$0xff]   ;;  %1144 = vmatprep.subr.bf16.mxu1 %v10617_v0  ;;  %1172 = vmatpush1.bf16.msra.mxu0 %v10619_v1 }
 0x247   : > { %v716_v31 = vmul.f32 0.0033333334, %v714_v30  ;;  %v731_v32 = vsel %vm680_vm0, %v12285_v29, 0.0  ;;  %v735_v33 = vmul.f32 %v12281_v27, %v12281_v27  ;;  %v736_v34 = vmul.f32 %v12283_v28, %v12283_v28  ;;  %1145 = vmatpush1.bf16.msra.mxu1 %v10620_v2  ;;  %1173 = vmatprep.subr.bf16.mxu0 %v10621_v3 }
 0x248   : > { %v737_v35 = vmul.f32 %v731_v32, %v731_v32 }
 0x249   : > { %v12294_v36 = vsub.f32 %v684_v4, %v716_v31  ;;  %v12296_v37 = vsub.f32 %v685_v5, %v716_v31  ;;  %v12298_v38 = vsub.f32 %v686_v6, %v716_v31  ;;  %v741_v39 = vadd.f32 %v736_v34, %v735_v33  ;;  %v10623_v4 = vld [vmem:[%s13016_s23 + $0xc4] ss:$8 sps:$4 sm:$0xff]   ;;  %v10625_v5 = vld [vmem:[%s13016_s23 + $0x140] ss:$8 sps:$4 sm:$0xff]  }
 0x24a   : > { %v10626_v6 = vld [vmem:[%s13016_s23 + $0xc0] ss:$8 sps:$4 sm:$0xff]   ;;  %1146 = vmatprep.subr.bf16.mxu1 %v10623_v4  ;;  %1174 = vmatpush1.bf16.msra.mxu0 %v10625_v5 }
 0x24b   : > { %v734_v40 = vsel %vm680_vm0, %v12298_v38, 0.0  ;;  %v738_v41 = vmul.f32 %v12294_v36, %v12294_v36  ;;  %v742_v42 = vadd.f32 %v741_v39, %v737_v35  ;;  %v739_v43 = vmul.f32 %v12296_v37, %v12296_v37  ;;  %1147 = vmatpush1.bf16.msra.mxu1 %v10626_v6  ;;  %1175 = vmatprep.subr.bf16.mxu0 %v10627_v7 }
 0x24c   : > { %v740_v44 = vmul.f32 %v734_v40, %v734_v40  ;;  %1148 = vmatprep.subr.bf16.mxu1 %v10629_v8  ;;  %v12417_v35 = vshrl.u32 %v674_v22, 7  ;;  %v705_v22 = vld [vmem:[#allocation7] sm:$0x7] }
 0x24d   : > { %743 = vadd.xlane.f32.xlu1 %v742_v42  ;;  %v745_v45 = vadd.f32 %v739_v43, %v738_v41 }
 0x24e   : > { %1176 = vmatpush1.bf16.msra.mxu0 %v10631_v9  ;;  %v12426_v47 = vsub.s32 0, %v12417_v35 }
 0x24f   : > { %v746_v46 = vadd.f32 %v745_v45, %v740_v44  ;;  %1149 = vmatpush1.bf16.msra.mxu1 %v10632_v10  ;;  %1177 = vmatprep.subr.bf16.mxu0 %v10633_v11  ;;  %v12420_v44 = vsub.s32 2, %v12417_v35 }
 0x250   : > { %1150 = vmatprep.subr.bf16.mxu1 %v10635_v12  ;;  %v773_v50 = vrot.slane %v705_v22, %v12426_v47  ;;  %v801_v0 = vrot.slane %v706_v51, %v12426_v47 }
 0x251   : > { %747 = vadd.xlane.f32.xlu1 %v746_v46  ;;  %v12423_v46 = vsub.s32 1, %v12417_v35  ;;  %v781_v48 = vrot.slane %v705_v22, %v12420_v44  ;;  %v809_v60 = vrot.slane %v706_v51, %v12420_v44 }
 0x252   : > { %1178 = vmatpush1.bf16.msra.mxu0 %v10637_v13  ;;  %v785_v55 = vmul.f32 %v773_v50, %v12281_v27  ;;  %v788_v56 = vmul.f32 %v773_v50, %v12294_v36  ;;  %v687_v50 = vld [vmem:[%s12205_s5] sm:$0x1] }
 0x253   : > { %1151 = vmatpush1.bf16.msra.mxu1 %v10638_v14  ;;  %1179 = vmatprep.subr.bf16.mxu0 %v10639_v15  ;;  %v777_v49 = vrot.slane %v705_v22, %v12423_v46  ;;  %v787_v53 = vmul.f32 %v781_v48, %v12285_v29  ;;  %v805_v58 = vrot.slane %v706_v51, %v12423_v46  ;;  %vm689_vm8 = vcmp.eq.s32.totalorder %v687_v50, 0 }
 0x254   : > { %1152 = vmatprep.subr.bf16.mxu1 %v10641_v16  ;;  %v790_v61 = vmul.f32 %v781_v48, %v12298_v38  ;;  %v11714_v38 = vmov 0.0  }
 0x255   : > { %v786_v54 = vmul.f32 %v777_v49, %v12283_v28  ;;  %v789_v62 = vmul.f32 %v777_v49, %v12296_v37  ;;  %v870_v37 = vld [vmem:[#allocation13] sm:$0x3]  ;;  %v691_v51 = vsel %vm689_vm8, -1e+09, %v11714_v38 }
 0x256   : > { %1180 = vmatpush1.bf16.msra.mxu0 %v10643_v18  ;;  %v875_v10 = vrot.slane %v870_v37, %v12426_v47  ;;  %v879_v11 = vrot.slane %v870_v37, %v12423_v46 }
 0x257   : > { %1153 = vmatpush1.bf16.msra.mxu1 %v10644_v19  ;;  %10232 = vmatprep.subr.bf16.mxu0 %v11714_v38 }
 0x258   : > { %10160 = vmatprep.subr.bf16.mxu1 %v11714_v38 }
 0x2da   : > { %v744_v20 = vpop.xlane.xlu1 %743 }
 0x2db   : > { %v749_v21 = vmul.f32 0.0033444816, %v744_v20 }
 0x2dd   : > { %11173 = vrsqrt.f32 %v749_v21  ;;  %vm753_vm1 = vcmp.eq.f32.partialorder %v749_v21, inf  ;;  %v756_v31 = vand.u32 2147483648, %v749_v21  ;;  %vm755_vm2 = vcmp.eq.f32.partialorder %v749_v21, 0.0 }
 0x2de   : > { %v748_v23 = vpop.xlane.xlu1 %747 }
 0x2df   : > { %v750_v25 = vmul.f32 0.0033444816, %v748_v23 }
 0x2e1   : > { %11175 = vrsqrt.f32 %v750_v25  ;;  %vm760_vm3 = vcmp.eq.f32.partialorder %v750_v25, inf  ;;  %v763_v41 = vand.u32 2147483648, %v750_v25  ;;  %vm762_vm4 = vcmp.eq.f32.partialorder %v750_v25, 0.0 }
 0x2e7   : > { %v11174_v26 = vpop.eup %11173 }
 0x2e8   : > { %v752_v30 = vmul.f32 %v11174_v26, %v749_v21 }
 0x2ea   : > { %v754_v32 = vsel %vm753_vm1, %v749_v21, %v752_v30 }
 0x2eb   : > { %v11176_v33 = vpop.eup %11175  ;;  %v757_v34 = vsel %vm755_vm2, %v756_v31, %v754_v32 }
 0x2ec   : > { %v765_v39 = vadd.f32 1e-06, %v757_v34  ;;  %v759_v40 = vmul.f32 %v11176_v33, %v750_v25 }
 0x2ee   : > { %11177 = vrcp.f32 %v765_v39  ;;  %v761_v42 = vsel %vm760_vm3, %v750_v25, %v759_v40 }
 0x2ef   : > { %v764_v43 = vsel %vm762_vm4, %v763_v41, %v761_v42 }
 0x2f0   : > { %v766_v45 = vadd.f32 1e-06, %v764_v43 }
 0x2f2   : > { %11179 = vrcp.f32 %v766_v45 }
 0x2f8   : > { %v11178_v52 = vpop.eup %11177 }
 0x2f9   : > { %v792_v57 = vmul.f32 %v11178_v52, %v786_v54  ;;  %v793_v59 = vmul.f32 %v11178_v52, %v787_v53  ;;  %v791_v63 = vmul.f32 %v11178_v52, %v785_v55  ;;  %v688_v52 = vld [vmem:[%s12205_s5 + $0x1] sm:$0x1]  ;;  %v12477_v53 = vrot.slane %v691_v51, %v12426_v47  ;;  %s11717_s5 = smov 48  }
 0x2fa   : > { %vm690_vm9 = vcmp.eq.s32.totalorder %v688_v52, 0 }
 0x2fb   : > { %v814_v27 = vadd.f32 %v805_v58, %v792_v57  ;;  %v815_v3 = vadd.f32 %v809_v60, %v793_v59  ;;  %v813_v5 = vadd.f32 %v801_v0, %v791_v63 }
 0x2fc   : > { %v11180_v29 = vpop.eup %11179 }
 0x2fd   : > { %v795_v1 = vmul.f32 %v11180_v29, %v789_v62  ;;  %v796_v28 = vmul.f32 %v11180_v29, %v790_v61  ;;  %v794_v2 = vmul.f32 %v11180_v29, %v788_v56 }
 0x2ff   : > { %v817_v36 = vadd.f32 %v805_v58, %v795_v1  ;;  %v818_v4 = vadd.f32 %v809_v60, %v796_v28  ;;  %v816_v6 = vadd.f32 %v801_v0, %v794_v2  ;;  %v692_v60 = vsel %vm690_vm9, -1e+09, %v11714_v38 }
 0x300   : > { %v12483_v62 = vrot.slane %v692_v60, %v12426_v47 }
 0x301   : > { %v820_v7 = vpack.c.bf16 %v817_v36, %v814_v27  ;;  %v821_v8 = vpack.c.bf16 %v818_v4, %v815_v3  ;;  %v819_v9 = vpack.c.bf16 %v816_v6, %v813_v5 }
 0x303   : > { %1154 = vmatprep.mubr.bf16.mxu1 %v820_v7  ;;  %1198 = vmatmul.mubr.bf16.vlgmr.msra.gmra.mrb[0].mxu0 %v821_v8 }
 0x304   : > { %1155 = vmatmul.mubr.bf16.vlgmr.msra.gmra.mrb[0].mxu1 %v819_v9  ;;  %10234 = vmatprep.mubr.msk.bf16.mxu0 %vm11715_vm5, %v11714_v38 }
 0x305   : > { %10162 = vmatprep.mubr.msk.bf16.mxu1 %vm11715_vm5, %v11714_v38 }
 0x3d6   : > { %v1199_v12 = vpop.f32.mrb[0].mxu0 }
 0x3d7   : > { %v1156_v13 = vpop.f32.mrb[0].mxu1  ;;  %v1201_v14 = vpop.f32.mrb[1].mxu0 }
 0x3d8   : > { %v1157_v15 = vadd.f32 %v1156_v13, %v875_v10  ;;  %v1158_v16 = vpop.f32.mrb[1].mxu1  ;;  %v1203_v18 = vpop.f32.mrb[2].mxu0 }
 0x3d9   : > { %v1159_v19 = vadd.f32 %v1158_v16, %v879_v11  ;;  %v1160_v20 = vpop.f32.mrb[2].mxu1  ;;  %v1205_v21 = vpop.f32.mrb[3].mxu0 }
 0x3da   : > { %v1200_v23 = vadd.f32 %v1199_v12, %v1157_v15  ;;  %v1161_v25 = vadd.f32 %v1160_v20, %v875_v10  ;;  %v1162_v26 = vpop.f32.mrb[3].mxu1 }
 0x3db   : > { %v1202_v30 = vadd.f32 %v1201_v14, %v1159_v19  ;;  %v1163_v31 = vadd.f32 %v1162_v26, %v879_v11 }
 0x3dc   : > { %v12448_v32 = vpack.c.bf16 %v1200_v23, %v1200_v23  ;;  %v1204_v33 = vadd.f32 %v1203_v18, %v1161_v25 }
 0x3dd   : > { %v12450_v34 = vpack.c.bf16 %v1202_v30, %v1200_v23  ;;  %v1206_v39 = vadd.f32 %v1205_v21, %v1163_v31 }
 0x3de   : > { %v12452_v40 = vpack.c.bf16 %v1204_v33, %v1204_v33  ;;  %1219 = vrot.lane.b32.xlu0 %v12448_v32, %s11716_s24 }
 0x3df   : > { %v12455_v41 = vpack.c.bf16 %v1206_v39, %v1204_v33  ;;  %v1346_v48 = vrot.slane %v12450_v34, 4 }
 0x3e0   : > { %1269 = vrot.lane.b32.xlu1 %v12452_v40, %s11716_s24  ;;  %s11600_s24 = sshll.u32 %s11723_s17, 4  ;;  %s11601_s24 = int_to_ptr.vmem [resolvable:$false] %s11600_s24 }
 0x3e1   : > { %v1352_v49 = vsel %vm1350_vm7, %v1346_v48, 0  ;;  %v1394_v15 = vrot.slane %v12455_v41, 4 }
 0x3e3   : > { %v1399_v18 = vsel %vm1350_vm7, %v1394_v15, 0 }
 0x450   : > { %v1220_v42 = vpop.permute.xlu0 %1219 }
 0x451   : > { %v1226_v43 = vsel %vm1221_vm6, %v1220_v42, 0 }
 0x452   : > { %10161 = vmatpush3.bf16.xpose.msra.mxu1 %v1226_v43  ;;  %v1270_v45 = vpop.permute.xlu1 %1269 }
 0x453   : > { %10166 = vmatprep.subr.bf16.mxu1 %v11714_v38  ;;  %v1275_v22 = vsel %vm1221_vm6, %v1270_v45, 0 }
 0x459   : > { %10163 = vmatmul.mubr.msk.bf16.vlgmr.msra.gmra.mrb[4].mxu1 %vm1221_vm6, %v12450_v34 }
 0x45a   : > { %10167 = vmatpush3.bf16.xpose.msra.mxu1 %v1275_v22  ;;  %10168 = vmatprep.mubr.msk.bf16.mxu1 %vm11715_vm5, %v11714_v38 }
 0x45b   : > { %10172 = vmatprep.subr.bf16.mxu1 %v11714_v38 }
 0x461   : > { %10169 = vmatmul.mubr.msk.bf16.vlgmr.msra.gmra.mrb[8].mxu1 %vm1221_vm6, %v12455_v41 }
 0x462   : > { %10173 = vmatpush3.bf16.msra.mxu1 %v1352_v49  ;;  %10174 = vmatprep.mubr.msk.bf16.mxu1 %vm11715_vm5, %v11714_v38 }
 0x463   : > { %10178 = vmatprep.subr.bf16.mxu1 %v11714_v38 }
 0x52c   : > { %v1262_v54 = vpop.f32.mrb[4].mxu1 }
 0x52d   : > { %v1317_v55 = vmul.f32 0.25, %v1262_v54  ;;  %v10164_v56 = vpop.f32.mrb[5].mxu1 }
 0x52e   : > { %v1265_v57 = vpop.f32.mrb[6].mxu1 }
 0x52f   : > { %v10165_v58 = vpop.f32.mrb[7].mxu1  ;;  %v1319_v59 = vadd.f32 %v1317_v55, %v12477_v53 }
 0x531   : > { %v1322_v61 = vsel %vm1321_vm10, %v1319_v59, -inf }
 0x532   : > { %1323 = vmax.xlane.f32.xlu1 %v1322_v61 }
 0x534   : > { %v1311_v63 = vpop.f32.mrb[8].mxu1 }
 0x535   : > { %v1318_v0 = vmul.f32 0.25, %v1311_v63  ;;  %v10170_v29 = vpop.f32.mrb[9].mxu1 }
 0x536   : > { %v1314_v1 = vpop.f32.mrb[10].mxu1 }
 0x537   : > { %v10171_v28 = vpop.f32.mrb[11].mxu1  ;;  %v1320_v2 = vadd.f32 %v1318_v0, %v12483_v62 }
 0x539   : > { %v1325_v27 = vsel %vm1321_vm10, %v1320_v2, -inf }
 0x53a   : > { %1326 = vmax.xlane.f32.xlu0 %v1325_v27 }
 0x5bf   : > { %v1324_v3 = vpop.xlane.xlu1 %1323 }
 0x5c0   : > { %v1328_v36 = vsub.f32 %v1319_v59, %v1324_v3 }
 0x5c2   : > { %v1330_v4 = vmul.f32 1.442695, %v1328_v36 }
 0x5c4   : > { %11181 = vpow2.f32 %v1330_v4 }
 0x5c7   : > { %v1327_v5 = vpop.xlane.xlu0 %1326 }
 0x5c8   : > { %v1329_v6 = vsub.f32 %v1320_v2, %v1327_v5 }
 0x5ca   : > { %v1332_v7 = vmul.f32 1.442695, %v1329_v6 }
 0x5cc   : > { %11183 = vpow2.f32 %v1332_v7 }
 0x5ce   : > { %v11182_v8 = vpop.eup %11181 }
 0x5cf   : > { %v1334_v9 = vsel %vm1321_vm10, %v11182_v8, 0.0 }
 0x5d0   : > { %1335 = vadd.xlane.f32.xlu0 %v1334_v9 }
 0x5d6   : > { %v11184_v37 = vpop.eup %11183 }
 0x5d7   : > { %v1337_v10 = vsel %vm1321_vm10, %v11184_v37, 0.0 }
 0x5d8   : > { %1338 = vadd.xlane.f32.xlu1 %v1337_v10 }
 0x5e6   : > { %1443 = vrot.lane.b32.xlu0 %v12448_v32, %s11717_s5 }
 0x5e9   : > { %1441 = vrot.lane.b32.xlu1 %v12448_v32, %s11718_s10 }
 0x5ed   : > { %1493 = vrot.lane.b32.xlu1 %v12452_v40, %s11717_s5 }
 0x5f1   : > { %1491 = vrot.lane.b32.xlu1 %v12452_v40, %s11718_s10 }
 0x65d   : > { %v1336_v11 = vpop.xlane.xlu0 %1335 }
 0x65e   : > { %11185 = vrcp.f32 %v1336_v11 }
 0x661   : > { %v1444_v21 = vpop.permute.xlu0 %1443 }
 0x662   : > { %v1449_v26 = vsel %vm1221_vm6, %v1444_v21, 0 }
 0x665   : > { %v1339_v12 = vpop.xlane.xlu1 %1338 }
 0x666   : > { %11187 = vrcp.f32 %v1339_v12 }
 0x668   : > { %v11186_v13 = vpop.eup %11185 }
 0x669   : > { %v1342_v14 = vmul.f32 %v11186_v13, %v11182_v8  ;;  %v1442_v25 = vpop.permute.xlu1 %1441 }
 0x66b   : > { %v1344_v16 = vpack.c.bf16 %v1342_v14, %v1342_v14 }
 0x66d   : > { %10175 = vmatmul.mubr.msk.bf16.vlgmr.msra.gmra.mrb[12].mxu1 %vm1321_vm10, %v1344_v16  ;;  %v1494_v30 = vpop.permute.xlu1 %1493 }
 0x66e   : > { %10179 = vmatpush3.bf16.msra.mxu1 %v1399_v18  ;;  %10180 = vmatprep.mubr.msk.bf16.mxu1 %vm11715_vm5, %v11714_v38  ;;  %v1499_v31 = vsel %vm1221_vm6, %v1494_v30, 0 }
 0x66f   : > { %10184 = vmatprep.subr.bf16.mxu1 %v11714_v38 }
 0x670   : > { %v11188_v19 = vpop.eup %11187 }
 0x671   : > { %v1343_v20 = vmul.f32 %v11188_v19, %v11184_v37  ;;  %v1492_v33 = vpop.permute.xlu1 %1491 }
 0x673   : > { %v1345_v23 = vpack.c.bf16 %v1343_v20, %v1343_v20 }
 0x675   : > { %10181 = vmatmul.mubr.msk.bf16.vlgmr.msra.gmra.mrb[16].mxu1 %vm1321_vm10, %v1345_v23 }
 0x676   : > { %10186 = vmatprep.mubr.msk.bf16.mxu1 %vm11715_vm5, %v11714_v38 }
 0x677   : > { %10185 = vmatpush3.bf16.xpose.msra.mxu1 %v1449_v26 }
 0x678   : > { %10190 = vmatprep.subr.bf16.mxu1 %v11714_v38 }
 0x67e   : > { %10187 = vmatmul.mubr.msk.bf16.vlgmr.msra.gmra.mrb[20].mxu1 %vm1221_vm6, %v1442_v25 }
 0x67f   : > { %10191 = vmatpush3.bf16.xpose.msra.mxu1 %v1499_v31  ;;  %10192 = vmatprep.mubr.msk.bf16.mxu1 %vm11715_vm5, %v11714_v38 }
 0x680   : > { %10196 = vmatprep.subr.bf16.mxu1 %v11714_v38 }
 0x686   : > { %10193 = vmatmul.mubr.msk.bf16.vlgmr.msra.gmra.mrb[24].mxu1 %vm1221_vm6, %v1492_v33 }
 0x687   : > { %10198 = vmatprep.mubr.msk.bf16.mxu1 %vm11715_vm5, %v11714_v38 }
 0x740   : > { %v12516_v39 = vpop.f32.mrb[12].mxu1 }
 0x741   : > { %v10176_v42 = vpop.f32.mrb[13].mxu1 }
 0x742   : > { %v1391_v43 = vpop.f32.mrb[14].mxu1 }
 0x743   : > { %v10177_v45 = vpop.f32.mrb[15].mxu1 }
 0x748   : > { %v12518_v22 = vpop.f32.mrb[16].mxu1 }
 0x749   : > { %v10182_v48 = vpop.f32.mrb[17].mxu1 }
 0x74a   : > { %v1438_v49 = vpop.f32.mrb[18].mxu1 }
 0x74b   : > { %v10183_v50 = vpop.f32.mrb[19].mxu1 }
 0x751   : > { %v1485_v51 = vpop.f32.mrb[20].mxu1 }
 0x752   : > { %v1541_v52 = vmul.f32 0.25, %v1485_v51  ;;  %v10188_v54 = vpop.f32.mrb[21].mxu1 }
 0x753   : > { %v1488_v55 = vpop.f32.mrb[22].mxu1 }
 0x754   : > { %v10189_v56 = vpop.f32.mrb[23].mxu1  ;;  %v1543_v57 = vadd.f32 %v1541_v52, %v12477_v53 }
 0x756   : > { %v1545_v58 = vsel %vm1321_vm10, %v1543_v57, -inf }
 0x757   : > { %1546 = vmax.xlane.f32.xlu0 %v1545_v58 }
 0x759   : > { %v1535_v59 = vpop.f32.mrb[24].mxu1 }
 0x75a   : > { %v1542_v60 = vmul.f32 0.25, %v1535_v59  ;;  %v10194_v61 = vpop.f32.mrb[25].mxu1 }
 0x75b   : > { %v1538_v63 = vpop.f32.mrb[26].mxu1 }
 0x75c   : > { %v10195_v0 = vpop.f32.mrb[27].mxu1  ;;  %v1544_v29 = vadd.f32 %v1542_v60, %v12483_v62 }
 0x75e   : > { %v1548_v1 = vsel %vm1321_vm10, %v1544_v29, -inf }
 0x75f   : > { %1549 = vmax.xlane.f32.xlu1 %v1548_v1 }
 0x770   : > { %1618 = vrot.lane.b32.xlu1 %v12455_v41, %s11718_s10 }
 0x774   : > { %1669 = vrot.lane.b32.xlu1 %v12448_v32, %s11719_s1 }
 0x778   : > { %1667 = vrot.lane.b32.xlu1 %v12448_v32, %s11720_s18 }
 0x77c   : > { %1717 = vrot.lane.b32.xlu1 %v12452_v40, %s11720_s18 }
 0x7e4   : > { %v1547_v28 = vpop.xlane.xlu0 %1546 }
 0x7e5   : > { %v1551_v2 = vsub.f32 %v1543_v57, %v1547_v28 }
 0x7e7   : > { %v1553_v27 = vmul.f32 1.442695, %v1551_v2 }
 0x7e9   : > { %11189 = vpow2.f32 %v1553_v27 }
 0x7ec   : > { %v1550_v3 = vpop.xlane.xlu1 %1549 }
 0x7ed   : > { %v1552_v36 = vsub.f32 %v1544_v29, %v1550_v3 }
 0x7ef   : > { %v1555_v4 = vmul.f32 1.442695, %v1552_v36 }
 0x7f0   : > { %v1619_v11 = vpop.permute.xlu1 %1618 }
 0x7f1   : > { %11191 = vpow2.f32 %v1555_v4  ;;  %v1620_v15 = vrot.slane %v1619_v11, 4 }
 0x7f3   : > { %v11190_v5 = vpop.eup %11189  ;;  %v1625_v20 = vsel %vm1350_vm7, %v1620_v15, 0 }
 0x7f4   : > { %v1557_v6 = vsel %vm1321_vm10, %v11190_v5, 0.0  ;;  %v1670_v23 = vpop.permute.xlu1 %1669 }
 0x7f5   : > { %1558 = vadd.xlane.f32.xlu0 %v1557_v6  ;;  %v1675_v26 = vsel %vm1221_vm6, %v1670_v23, 0 }
 0x7f8   : > { %v1668_v31 = vpop.permute.xlu1 %1667 }
 0x7fb   : > { %v11192_v7 = vpop.eup %11191 }
 0x7fc   : > { %v1560_v8 = vsel %vm1321_vm10, %v11192_v7, 0.0  ;;  %v1718_v42 = vpop.permute.xlu1 %1717 }
 0x7fd   : > { %1561 = vadd.xlane.f32.xlu0 %v1560_v8 }
 0x813   : > { %1569 = vrot.lane.b32.xlu0 %v12450_v34, %s11718_s10 }
 0x817   : > { %1719 = vrot.lane.b32.xlu0 %v12452_v40, %s11719_s1 }
 0x882   : > { %v1559_v9 = vpop.xlane.xlu0 %1558 }
 0x883   : > { %11193 = vrcp.f32 %v1559_v9 }
 0x88a   : > { %v1562_v37 = vpop.xlane.xlu0 %1561 }
 0x88b   : > { %11195 = vrcp.f32 %v1562_v37 }
 0x88d   : > { %v11194_v10 = vpop.eup %11193 }
 0x88e   : > { %v1570_v12 = vpop.permute.xlu0 %1569  ;;  %v1565_v13 = vmul.f32 %v11194_v10, %v11190_v5 }
 0x88f   : > { %v1571_v14 = vrot.slane %v1570_v12, 4 }
 0x890   : > { %v1567_v18 = vpack.c.bf16 %v1565_v13, %v1565_v13 }
 0x891   : > { %v1576_v16 = vsel %vm1350_vm7, %v1571_v14, 0 }
 0x892   : > { %10197 = vmatpush3.bf16.msra.mxu1 %v1576_v16  ;;  %v1720_v30 = vpop.permute.xlu0 %1719 }
 0x893   : > { %10202 = vmatprep.subr.bf16.mxu1 %v11714_v38  ;;  %v1725_v33 = vsel %vm1221_vm6, %v1720_v30, 0 }
 0x895   : > { %v11196_v19 = vpop.eup %11195  ;;  %10199 = vmatmul.mubr.msk.bf16.vlgmr.msra.gmra.mrb[28].mxu1 %vm1321_vm10, %v1567_v18 }
 0x896   : > { %10203 = vmatpush3.bf16.msra.mxu1 %v1625_v20  ;;  %10204 = vmatprep.mubr.msk.bf16.mxu1 %vm11715_vm5, %v11714_v38  ;;  %v1566_v21 = vmul.f32 %v11196_v19, %v11192_v7 }
 0x897   : > { %10208 = vmatprep.subr.bf16.mxu1 %v11714_v38 }
 0x898   : > { %v1568_v25 = vpack.c.bf16 %v1566_v21, %v1566_v21 }
 0x89d   : > { %10205 = vmatmul.mubr.msk.bf16.vlgmr.msra.gmra.mrb[32].mxu1 %vm1321_vm10, %v1568_v25 }
 0x89e   : > { %10210 = vmatprep.mubr.msk.bf16.mxu1 %vm11715_vm5, %v11714_v38 }
 0x89f   : > { %10209 = vmatpush3.bf16.xpose.msra.mxu1 %v1675_v26 }
 0x8a0   : > { %10214 = vmatprep.subr.bf16.mxu1 %v11714_v38 }
 0x8a6   : > { %10211 = vmatmul.mubr.msk.bf16.vlgmr.msra.gmra.mrb[36].mxu1 %vm1221_vm6, %v1668_v31 }
 0x8a7   : > { %10215 = vmatpush3.bf16.xpose.msra.mxu1 %v1725_v33  ;;  %10216 = vmatprep.mubr.msk.bf16.mxu1 %vm11715_vm5, %v11714_v38 }
 0x8a8   : > { %10220 = vmatprep.subr.bf16.mxu1 %v11714_v38 }
 0x8ae   : > { %10217 = vmatmul.mubr.msk.bf16.vlgmr.msra.gmra.mrb[40].mxu1 %vm1221_vm6, %v1718_v42 }
 0x8af   : > { %10222 = vmatprep.mubr.msk.bf16.mxu1 %vm11715_vm5, %v11714_v38 }
 0x968   : > { %v12558_v43 = vpop.f32.mrb[28].mxu1 }
 0x969   : > { %v10200_v45 = vpop.f32.mrb[29].mxu1 }
 0x96a   : > { %v1615_v48 = vpop.f32.mrb[30].mxu1 }
 0x96b   : > { %v10201_v49 = vpop.f32.mrb[31].mxu1 }
 0x970   : > { %v12560_v50 = vpop.f32.mrb[32].mxu1 }
 0x971   : > { %v10558_v51 = vpack.i.bf16 %v12560_v50, %v12558_v43  ;;  %v10206_v52 = vpop.f32.mrb[33].mxu1 }
 0x972   : > { %v1664_v54 = vpop.f32.mrb[34].mxu1 }
 0x973   : > { %v10207_v55 = vpop.f32.mrb[35].mxu1 }
 0x979   : > { %v1711_v56 = vpop.f32.mrb[36].mxu1 }
 0x97a   : > { %v1767_v57 = vmul.f32 0.25, %v1711_v56  ;;  %v10212_v58 = vpop.f32.mrb[37].mxu1 }
 0x97b   : > { %v1714_v59 = vpop.f32.mrb[38].mxu1 }
 0x97c   : > { %v10213_v60 = vpop.f32.mrb[39].mxu1  ;;  %v1769_v61 = vadd.f32 %v1767_v57, %v12477_v53 }
 0x97e   : > { %v1771_v63 = vsel %vm1321_vm10, %v1769_v61, -inf }
 0x97f   : > { %1772 = vmax.xlane.f32.xlu0 %v1771_v63 }
 0x981   : > { %v1761_v0 = vpop.f32.mrb[40].mxu1 }
 0x982   : > { %v1768_v29 = vmul.f32 0.25, %v1761_v0  ;;  %v10218_v1 = vpop.f32.mrb[41].mxu1 }
 0x983   : > { %v1764_v28 = vpop.f32.mrb[42].mxu1 }
 0x984   : > { %v10219_v2 = vpop.f32.mrb[43].mxu1  ;;  %v1770_v27 = vadd.f32 %v1768_v29, %v12483_v62 }
 0x986   : > { %v1774_v3 = vsel %vm1321_vm10, %v1770_v27, -inf }
 0x987   : > { %1775 = vmax.xlane.f32.xlu1 %v1774_v3 }
 0x998   : > { %1844 = vrot.lane.b32.xlu1 %v12455_v41, %s11720_s18 }
 0x99c   : > { %1895 = vrot.lane.b32.xlu1 %v12448_v32, %s11721_s28 }
 0x9a0   : > { %1945 = vrot.lane.b32.xlu1 %v12452_v40, %s11721_s28 }
 0x9a4   : > { %1943 = vrot.lane.b32.xlu1 %v12452_v40, %s11722_s8 }
 0xa0c   : > { %v1773_v36 = vpop.xlane.xlu0 %1772 }
 0xa0d   : > { %v1777_v4 = vsub.f32 %v1769_v61, %v1773_v36 }
 0xa0f   : > { %v1779_v5 = vmul.f32 1.442695, %v1777_v4 }
 0xa11   : > { %11197 = vpow2.f32 %v1779_v5 }
 0xa14   : > { %v1776_v6 = vpop.xlane.xlu1 %1775 }
 0xa15   : > { %v1778_v7 = vsub.f32 %v1770_v27, %v1776_v6 }
 0xa17   : > { %v1781_v8 = vmul.f32 1.442695, %v1778_v7 }
 0xa18   : > { %v1845_v9 = vpop.permute.xlu1 %1844 }
 0xa19   : > { %11199 = vpow2.f32 %v1781_v8  ;;  %v1846_v21 = vrot.slane %v1845_v9, 4 }
 0xa1b   : > { %v11198_v37 = vpop.eup %11197  ;;  %v1851_v30 = vsel %vm1350_vm7, %v1846_v21, 0 }
 0xa1c   : > { %v1896_v10 = vpop.permute.xlu1 %1895  ;;  %v1783_v11 = vsel %vm1321_vm10, %v11198_v37, 0.0 }
 0xa1d   : > { %v1901_v12 = vsel %vm1221_vm6, %v1896_v10, 0  ;;  %1784 = vadd.xlane.f32.xlu0 %v1783_v11 }
 0xa1e   : > { %10233 = vmatpush3.bf16.xpose.msra.mxu0 %v1901_v12 }
 0xa1f   : > { %10244 = vmatprep.subr.bf16.mxu0 %v11714_v38 }
 0xa20   : > { %v1946_v33 = vpop.permute.xlu1 %1945 }
 0xa21   : > { %v1951_v45 = vsel %vm1221_vm6, %v1946_v33, 0  ;;  %v10652_v33 = vld [vmem:[#allocation14 + $0x20] ss:$12 sps:$4 sm:$0xff]  }
 0xa23   : > { %v11200_v40 = vpop.eup %11199 }
 0xa24   : > { %v1786_v13 = vsel %vm1321_vm10, %v11200_v40, 0.0  ;;  %v1944_v48 = vpop.permute.xlu1 %1943 }
 0xa25   : > { %1787 = vadd.xlane.f32.xlu0 %v1786_v13 }
 0xa3b   : > { %1795 = vrot.lane.b32.xlu0 %v12450_v34, %s11720_s18 }
 0xa3f   : > { %1893 = vrot.lane.b32.xlu0 %v12448_v32, %s11722_s8 }
 0xaaa   : > { %v1785_v14 = vpop.xlane.xlu0 %1784 }
 0xaab   : > { %11201 = vrcp.f32 %v1785_v14 }
 0xab2   : > { %v1788_v15 = vpop.xlane.xlu0 %1787 }
 0xab3   : > { %11203 = vrcp.f32 %v1788_v15 }
 0xab5   : > { %v11202_v16 = vpop.eup %11201 }
 0xab6   : > { %v1796_v18 = vpop.permute.xlu0 %1795  ;;  %v1791_v19 = vmul.f32 %v11202_v16, %v11198_v37 }
 0xab7   : > { %v1797_v20 = vrot.slane %v1796_v18, 4 }
 0xab8   : > { %v1793_v26 = vpack.c.bf16 %v1791_v19, %v1791_v19 }
 0xab9   : > { %v1802_v23 = vsel %vm1350_vm7, %v1797_v20, 0 }
 0xaba   : > { %10221 = vmatpush3.bf16.msra.mxu1 %v1802_v23  ;;  %v1894_v25 = vpop.permute.xlu0 %1893 }
 0xabb   : > { %10235 = vmatmul.mubr.msk.bf16.vlgmr.msra.gmra.mrb[4].mxu0 %vm1221_vm6, %v1894_v25  ;;  %10226 = vmatprep.subr.bf16.mxu1 %v11714_v38 }
 0xabc   : > { %10246 = vmatprep.mubr.msk.bf16.mxu0 %vm11715_vm5, %v11714_v38 }
 0xabd   : > { %v11204_v32 = vpop.eup %11203  ;;  %10223 = vmatmul.mubr.msk.bf16.vlgmr.msra.gmra.mrb[44].mxu1 %vm1321_vm10, %v1793_v26 }
 0xabe   : > { %10227 = vmatpush3.bf16.msra.mxu1 %v1851_v30  ;;  %10228 = vmatprep.mubr.msk.bf16.mxu1 %vm11715_vm5, %v11714_v38  ;;  %v1792_v31 = vmul.f32 %v11204_v32, %v11200_v40  ;;  %v10647_v32 = vld [vmem:[#allocation14 + $0x4] ss:$12 sps:$4 sm:$0xff]   ;;  %v10648_v30 = vld [vmem:[#allocation14 + $0x8] ss:$12 sps:$4 sm:$0xff]  }
 0xabf   : > { %10238 = vmatprep.subr.bf16.mxu1 %v11714_v38 }
 0xac0   : > { %v1794_v42 = vpack.c.bf16 %v1792_v31, %v1792_v31  ;;  %v10651_v31 = vld [vmem:[#allocation14 + $0x1c] ss:$12 sps:$4 sm:$0xff]  }
 0xac5   : > { %10229 = vmatmul.mubr.msk.bf16.vlgmr.msra.gmra.mrb[48].mxu1 %vm1321_vm10, %v1794_v42  ;;  %v10649_v42 = vld [vmem:[#allocation14 + $0x18] ss:$12 sps:$4 sm:$0xff]  }
 0xac6   : > { %10240 = vmatprep.mubr.msk.bf16.mxu1 %vm11715_vm5, %v11714_v38 }
 0xac7   : > { %10239 = vmatpush3.bf16.xpose.msra.mxu1 %v1951_v45  ;;  %v10655_v45 = vld [vmem:[#allocation14 + $0x34] ss:$12 sps:$4 sm:$0xff]  }
 0xac8   : > { %10250 = vmatprep.subr.bf16.mxu1 %v11714_v38 }
 0xace   : > { %10241 = vmatmul.mubr.msk.bf16.vlgmr.msra.gmra.mrb[52].mxu1 %vm1221_vm6, %v1944_v48  ;;  %v10656_v48 = vld [vmem:[#allocation14 + $0x38] ss:$12 sps:$4 sm:$0xff]  }
 0xacf   : > { %10252 = vmatprep.mubr.msk.bf16.mxu1 %vm11715_vm5, %v11714_v38 }
 0xb8e   : > { %v1937_v49 = vpop.f32.mrb[4].mxu0 }
 0xb8f   : > { %v1993_v52 = vmul.f32 0.25, %v1937_v49  ;;  %v10236_v54 = vpop.f32.mrb[5].mxu0  ;;  %v10653_v49 = vld [vmem:[#allocation14 + $0x30] ss:$12 sps:$4 sm:$0xff]  }
 0xb90   : > { %v1838_v55 = vpop.f32.mrb[44].mxu1  ;;  %v1940_v56 = vpop.f32.mrb[6].mxu0  ;;  %v10657_v54 = vld [vmem:[#allocation14 + $0x48] ss:$12 sps:$4 sm:$0xff]  }
 0xb91   : > { %v10224_v57 = vpop.f32.mrb[45].mxu1  ;;  %v10237_v58 = vpop.f32.mrb[7].mxu0  ;;  %v1995_v59 = vadd.f32 %v1993_v52, %v12477_v53  ;;  %v10659_v52 = vld [vmem:[#allocation14 + $0x4c] ss:$12 sps:$4 sm:$0xff]  }
 0xb92   : > { %v1841_v60 = vpop.f32.mrb[46].mxu1 }
 0xb93   : > { %v10225_v61 = vpop.f32.mrb[47].mxu1  ;;  %v1997_v63 = vsel %vm1321_vm10, %v1995_v59, -inf }
 0xb94   : > { %1998 = vmax.xlane.f32.xlu0 %v1997_v63 }
 0xb98   : > { %v1887_v0 = vpop.f32.mrb[48].mxu1 }
 0xb99   : > { %v10563_v29 = vpack.i.bf16 %v1887_v0, %v1838_v55  ;;  %v10230_v1 = vpop.f32.mrb[49].mxu1  ;;  %v10660_v55 = vld [vmem:[#allocation14 + $0x50] ss:$12 sps:$4 sm:$0xff]  }
 0xb9a   : > { %v1890_v28 = vpop.f32.mrb[50].mxu1 }
 0xb9b   : > { %v10231_v2 = vpop.f32.mrb[51].mxu1 }
 0xba1   : > { %v1987_v27 = vpop.f32.mrb[52].mxu1 }
 0xba2   : > { %v1994_v3 = vmul.f32 0.25, %v1987_v27  ;;  %v10242_v36 = vpop.f32.mrb[53].mxu1 }
 0xba3   : > { %v1990_v4 = vpop.f32.mrb[54].mxu1 }
 0xba4   : > { %v10243_v5 = vpop.f32.mrb[55].mxu1  ;;  %v1996_v6 = vadd.f32 %v1994_v3, %v12483_v62 }
 0xba6   : > { %v2000_v7 = vsel %vm1321_vm10, %v1996_v6, -inf }
 0xba7   : > { %2001 = vmax.xlane.f32.xlu1 %v2000_v7 }
 0xbb8   : > { %2070 = vrot.lane.b32.xlu1 %v12455_v41, %s11722_s8 }
 0xbbc   : > { %10559 = vrot.lane.b32.xlu1 %v10558_v51, %s11721_s28 }
 0xbc0   : > { %10564 = vrot.lane.b32.xlu1 %v10563_v29, %s11719_s1 }
 0xc21   : > { %v1999_v53 = vpop.xlane.xlu0 %1998 }
 0xc22   : > { %v2003_v8 = vsub.f32 %v1995_v59, %v1999_v53 }
 0xc24   : > { %v2005_v9 = vmul.f32 1.442695, %v2003_v8 }
 0xc26   : > { %11205 = vpow2.f32 %v2005_v9 }
 0xc30   : > { %v11206_v37 = vpop.eup %11205 }
 0xc31   : > { %v2009_v62 = vsel %vm1321_vm10, %v11206_v37, 0.0 }
 0xc32   : > { %2010 = vadd.xlane.f32.xlu0 %v2009_v62 }
 0xc34   : > { %v2002_v10 = vpop.xlane.xlu1 %2001 }
 0xc35   : > { %v2004_v11 = vsub.f32 %v1996_v6, %v2002_v10  ;;  %v2168_v10 = vld [vmem:[#allocation16] sm:$0x7] }
 0xc37   : > { %v2007_v12 = vmul.f32 1.442695, %v2004_v11  ;;  %v2173_v11 = vrot.slane %v2168_v10, %v12426_v47 }
 0xc38   : > { %v2071_v40 = vpop.permute.xlu1 %2070 }
 0xc39   : > { %11207 = vpow2.f32 %v2007_v12  ;;  %v2072_v41 = vrot.slane %v2071_v40, 4 }
 0xc3b   : > { %v2077_v13 = vsel %vm1350_vm7, %v2072_v41, 0 }
 0xc3c   : > { %10251 = vmatpush3.bf16.msra.mxu1 %v2077_v13  ;;  %v10560_v1 = vpop.permute.xlu1 %10559 }
 0xc3d   : > { %10256 = vmatprep.subr.bf16.mxu1 %v11714_v38  ;;  %v10561_v2 = vunpack.i.l.bf16 %v10560_v1 }
 0xc3f   : > { %v2143_v5 = vsel %vm1221_vm6, %v12516_v39, %v10561_v2  ;;  %v2177_v39 = vrot.slane %v2168_v10, %v12423_v46  ;;  %v2502_v2 = vld [vmem:[#allocation17 + $0x180] sm:$0xff] }
 0xc40   : > { %v10565_v28 = vpop.permute.xlu1 %10564 }
 0xc41   : > { %v10567_v27 = vunpack.i.h.bf16 %v10565_v28  ;;  %v10566_v3 = vunpack.i.l.bf16 %v10565_v28 }
 0xc43   : > { %v11208_v43 = vpop.eup %11207  ;;  %v2146_v53 = vsel %vm2145_vm11, %v2143_v5, %v10566_v3  ;;  %v2526_v5 = vld [vmem:[#allocation17 + $0x240] sm:$0xff] }
 0xc44   : > { %v2012_v50 = vsel %vm1321_vm10, %v11208_v43, 0.0 }
 0xc45   : > { %2013 = vadd.xlane.f32.xlu0 %v2012_v50 }
 0xc5b   : > { %2021 = vrot.lane.b32.xlu0 %v12450_v34, %s11722_s8  ;;  %v10645_v34 = vld [vmem:[#allocation14] ss:$12 sps:$4 sm:$0xff]  }
 0xcbf   : > { %v2011_v51 = vpop.xlane.xlu0 %2010 }
 0xcc0   : > { %11209 = vrcp.f32 %v2011_v51 }
 0xcca   : > { %v11210_v15 = vpop.eup %11209 }
 0xccb   : > { %v2017_v18 = vmul.f32 %v11210_v15, %v11206_v37 }
 0xccd   : > { %v2019_v21 = vpack.c.bf16 %v2017_v18, %v2017_v18 }
 0xcd2   : > { %v2014_v14 = vpop.xlane.xlu0 %2013 }
 0xcd3   : > { %11211 = vrcp.f32 %v2014_v14 }
 0xcd6   : > { %v2022_v16 = vpop.permute.xlu0 %2021 }
 0xcd7   : > { %v2023_v19 = vrot.slane %v2022_v16, 4  ;;  %v11221_v16 = vld [vmem:[%s12197_s3] sm:$0xff] }
 0xcd9   : > { %v2028_v20 = vsel %vm1350_vm7, %v2023_v19, 0 }
 0xcda   : > { %10245 = vmatpush3.bf16.msra.mxu0 %v2028_v20 }
 0xcdb   : > { %2253 = vmatprep.subr.bf16.mxu0 %v10647_v32  ;;  %v11223_v32 = vld [vmem:[%s12197_s3 + $0x18] sm:$0xff] }
 0xcdd   : > { %v11212_v23 = vpop.eup %11211  ;;  %10247 = vmatmul.mubr.msk.bf16.vlgmr.msra.gmra.mrb[8].mxu0 %vm1321_vm10, %v2019_v21 }
 0xcde   : > { %v2018_v25 = vmul.f32 %v11212_v23, %v11208_v43  ;;  %2285 = vmatprep.mubr.bf16.mxu0 %v11713_v17  ;;  %2254 = vmatpush1.bf16.msra.mxu0 %v10645_v34  ;;  %v11222_v23 = vld [vmem:[%s12197_s3 + $0x8] sm:$0xff] }
 0xcdf   : > { %2255 = vmatprep.subr.bf16.mxu0 %v10651_v31  ;;  %v11224_v31 = vld [vmem:[%s12197_s3 + $0x10] sm:$0xff] }
 0xce0   : > { %v2020_v26 = vpack.c.bf16 %v2018_v25, %v2018_v25 }
 0xce2   : > { %10253 = vmatmul.mubr.msk.bf16.vlgmr.msra.gmra.mrb[56].mxu1 %vm1321_vm10, %v2020_v26  ;;  %2256 = vmatpush1.bf16.msra.mxu0 %v10649_v42  ;;  %v11225_v42 = vld [vmem:[%s12197_s3 + $0x20] sm:$0xff] }
 0xce3   : > { %10264 = vmatprep.mubr.msk.bf16.mxu1 %vm11715_vm5, %v11714_v38  ;;  %10257 = vmatpush3.bf16.msra.mxu1 %v10648_v30 }
 0xce4   : > { %10258 = vmatprep.subr.bf16.mxu1 %v11714_v38  ;;  %2257 = vmatprep.subr.bf16.mxu0 %v10655_v45 }
 0xce6   : > { %2258 = vmatpush1.bf16.msra.mxu0 %v10653_v49  ;;  %v11226_v49 = vld [vmem:[%s12197_s3 + $0x28] sm:$0xff]  ;;  %s669_s3 = scalar_lea.vmem [#allocation23], %s10374_s21 }
 0xce7   : > { %10259 = vmatpush3.bf16.msra.mxu1 %v10652_v33  ;;  %2259 = vmatprep.subr.bf16.mxu0 %v10659_v52  ;;  %s8854_s9 = sshll.u32 %s669_s3, 4  ;;  %s12891_s9 = int_to_ptr.vmem [resolvable:$true] %s8854_s9 }
 0xce8   : > { %10260 = vmatprep.subr.bf16.mxu1 %v11714_v38  ;;  %s11596_s27 = scalar_lea.vmem %s12891_s9, 768  ;;  %p11603_p4 = scmp.lt.s32.totalorder %s12891_s9, %s11601_s24 }
 0xce9   : > { %p11597_p10 = scmp.ne.s32.totalorder %s12891_s9, %s11596_s27 }
 0xcea   : > { %2260 = vmatpush1.bf16.msra.mxu0 %v10657_v54 }
 0xceb   : > { %10261 = vmatpush3.bf16.msra.mxu1 %v10656_v48  ;;  %p11598_p12 = pnand %p11597_p10, %p13018_p8 }
 0xcec   : > { %10262 = vmatprep.subr.bf16.mxu1 %v11714_v38  ;;  %v10562_v38 = vunpack.i.h.bf16 %v10560_v1  ;;  %v2494_v1 = vld [vmem:[#allocation17 + $0x140] sm:$0xff] }
 0xced   : > { %p11599_p3 = pneg %p11598_p12 }
 0xcee   : > { %v2144_v4 = vsel %vm1221_vm6, %v12518_v22, %v10562_v38  ;;  %v2181_v22 = vrot.slane %v2168_v10, %v12420_v44 }
 0xcef   : > { %10263 = vmatpush3.bf16.msra.mxu1 %v10660_v55  ;;  %v2147_v8 = vsel %vm2145_vm11, %v2144_v4, %v10567_v27  ;;  %v2510_v27 = vld [vmem:[#allocation17 + $0x1c0] sm:$0xff] }
 0xcf0   : > { %v2518_v4 = vld [vmem:[#allocation17 + $0x200] sm:$0xff] }
 0xdb0   : > { %v2064_v56 = vpop.f32.mrb[8].mxu0 }
 0xdb1   : > { %v10248_v57 = vpop.f32.mrb[9].mxu0 }
 0xdb2   : > { %v2067_v58 = vpop.f32.mrb[10].mxu0  ;;  %v2454_v57 = vld [vmem:[#allocation17] sm:$0xff] }
 0xdb3   : > { %v10249_v59 = vpop.f32.mrb[11].mxu0  ;;  %v2462_v58 = vld [vmem:[#allocation17 + $0x40] sm:$0xff] }
 0xdb4   : > { %v2470_v59 = vld [vmem:[#allocation17 + $0x80] sm:$0xff] }
 0xdb5   : > { %v2113_v60 = vpop.f32.mrb[56].mxu1 }
 0xdb6   : > { %v10568_v61 = vpack.i.bf16 %v2113_v60, %v2064_v56  ;;  %v10254_v63 = vpop.f32.mrb[57].mxu1  ;;  %v9169_v60 = vcombine.low %v2454_v57, %v2462_v58 }
 0xdb7   : > { %v2116_v0 = vpop.f32.mrb[58].mxu1  ;;  %v2478_v63 = vld [vmem:[#allocation17 + $0xc0] sm:$0xff] }
 0xdb8   : > { %10569 = vrot.lane.b32.xlu0 %v10568_v61, %s11717_s5  ;;  %v10255_v29 = vpop.f32.mrb[59].mxu1  ;;  %v9170_v61 = vcombine.high %v2454_v57, %v2462_v58  ;;  %v9186_v0 = vcombine.high %v2470_v59, %v2478_v63  ;;  %v9185_v28 = vcombine.low %v2470_v59, %v2478_v63  ;;  %v2710_v58 = vld [vmem:[#allocation17 + $0x800] sm:$0xff]  ;;  %s11602_s5 = scalar_lea.vmem %s11601_s24, 1536 }
 0xdb9   : > { %v2486_v29 = vld [vmem:[#allocation17 + $0x100] sm:$0xff]  ;;  %p11604_p1 = scmp.lt.s32.totalorder %s11602_s5, %s11596_s27 }
 0xdba   : > { %4842 = vmatprep.subr.bf16.mxu1 %v9170_v61  ;;  %v9202_v38 = vcombine.high %v2486_v29, %v2494_v1  ;;  %v9201_v3 = vcombine.low %v2486_v29, %v2494_v1  ;;  %v2718_v59 = vld [vmem:[#allocation17 + $0x840] sm:$0xff] }
 0xdbb   : > { %v2582_v61 = vld [vmem:[#allocation17 + $0x400] sm:$0xff]  ;;  %p11605_p13 = por %p11604_p1, %p11603_p4 }
 0xdbc   : > { %v2590_v63 = vld [vmem:[#allocation17 + $0x440] sm:$0xff] }
 0xdbd   : > { %v9298_v29 = vcombine.high %v2582_v61, %v2590_v63  ;;  %v9297_v1 = vcombine.low %v2582_v61, %v2590_v63  ;;  %v2678_v63 = vld [vmem:[#allocation17 + $0x700] sm:$0xff]  ;;  %p11606_p0 = pnand %p11605_p13, %p11599_p3 }
 0xe2a   : > { %v10570_v36 = vpop.permute.xlu0 %10569 }
 0xe2b   : > { %v10572_v6 = vunpack.i.h.bf16 %v10570_v36  ;;  %v10571_v7 = vunpack.i.l.bf16 %v10570_v36  ;;  %v9218_v36 = vcombine.high %v2502_v2, %v2510_v27 }
 0xe2d   : > { %v2150_v9 = vsel %vm2148_vm12, %v2147_v8, %v10572_v6  ;;  %v2149_v37 = vsel %vm2148_vm12, %v2146_v53, %v10571_v7  ;;  %v9217_v6 = vcombine.low %v2502_v2, %v2510_v27  ;;  %v9234_v7 = vcombine.high %v2518_v4, %v2526_v5  ;;  %v2534_v53 = vld [vmem:[#allocation17 + $0x280] sm:$0xff] }
 0xe2e   : > { %v2151_v62 = vpack.c.bf16 %v2150_v9, %v2149_v37  ;;  %v2542_v8 = vld [vmem:[#allocation17 + $0x2c0] sm:$0xff]  ;;  %v9233_v9 = vcombine.low %v2518_v4, %v2526_v5 }
 0xe2f   : > { %v9250_v37 = vcombine.high %v2534_v53, %v2542_v8  ;;  %v2598_v27 = vld [vmem:[#allocation17 + $0x480] sm:$0xff] }
 0xe30   : > { %9167 = vmatmul.mubr.msk.bf16.vlgmr.msra.gmra.mrb[12].mxu0 %vm2249_vm13, %v2151_v62  ;;  %10265 = vmatmul.mubr.msk.bf16.vlgmr.msra.gmra.mrb[60].mxu1 %vm2249_vm13, %v2151_v62  ;;  %v9249_v62 = vcombine.low %v2534_v53, %v2542_v8  ;;  %v2614_v8 = vld [vmem:[#allocation17 + $0x500] sm:$0xff] }
 0xe31   : > { %4917 = vmatprep.mubr.bf16.mxu0 %v11713_v17  ;;  %4843 = vmatpush1.bf16.msra.mxu1 %v9169_v60  ;;  %v9426_v60 = vcombine.high %v2710_v58, %v2718_v59 }
 0xe32   : > { %4844 = vmatprep.subr.bf16.mxu1 %v9186_v0  ;;  %v9425_v0 = vcombine.low %v2710_v58, %v2718_v59  ;;  %v2814_v58 = vld [vmem:[#allocation17 + $0xb40] sm:$0xff] }
 0xe33   : > { %4885 = vmatprep.subr.bf16.mxu0 %v9426_v60 }
 0xe34   : > { %4886 = vmatpush1.bf16.msra.mxu0 %v9425_v0  ;;  %v2686_v0 = vld [vmem:[#allocation17 + $0x740] sm:$0xff] }
 0xe35   : > { %4845 = vmatpush1.bf16.msra.mxu1 %v9185_v28  ;;  %v2726_v28 = vld [vmem:[#allocation17 + $0x880] sm:$0xff] }
 0xe36   : > { %4846 = vmatprep.subr.bf16.mxu1 %v9202_v38  ;;  %v2734_v38 = vld [vmem:[#allocation17 + $0x8c0] sm:$0xff] }
 0xe37   : > { %v9442_v2 = vcombine.high %v2726_v28, %v2734_v38 }
 0xe39   : > { %4847 = vmatpush1.bf16.msra.mxu1 %v9201_v3  ;;  %v2606_v3 = vld [vmem:[#allocation17 + $0x4c0] sm:$0xff]  ;;  %4887 = vmatprep.subr.bf16.mxu0 %v9442_v2 }
 0xe3a   : > { %4848 = vmatprep.subr.bf16.mxu1 %v9218_v36  ;;  %v9441_v36 = vcombine.low %v2726_v28, %v2734_v38  ;;  %v9314_v4 = vcombine.high %v2598_v27, %v2606_v3  ;;  %v9313_v5 = vcombine.low %v2598_v27, %v2606_v3  ;;  %v2830_v28 = vld [vmem:[#allocation17 + $0xbc0] sm:$0xff]  ;;  %v12693_v27 = vld [vmem:[#allocation17 + $0x10] sm:$0xff] }
 0xe3b   : > { %v2694_v38 = vld [vmem:[#allocation17 + $0x780] sm:$0xff]  ;;  %v12695_v3 = vld [vmem:[#allocation17 + $0x50] sm:$0xff] }
 0xe3c   : > { %4888 = vmatpush1.bf16.msra.mxu0 %v9441_v36  ;;  %v2702_v2 = vld [vmem:[#allocation17 + $0x7c0] sm:$0xff] }
 0xe3d   : > { %4849 = vmatpush1.bf16.msra.mxu1 %v9217_v6  ;;  %v2742_v6 = vld [vmem:[#allocation17 + $0x900] sm:$0xff] }
 0xe3e   : > { %4850 = vmatprep.subr.bf16.mxu1 %v9234_v7  ;;  %v2750_v7 = vld [vmem:[#allocation17 + $0x940] sm:$0xff] }
 0xe3f   : > { %v9458_v53 = vcombine.high %v2742_v6, %v2750_v7 }
 0xe41   : > { %4851 = vmatpush1.bf16.msra.mxu1 %v9233_v9  ;;  %v2622_v9 = vld [vmem:[#allocation17 + $0x540] sm:$0xff]  ;;  %4889 = vmatprep.subr.bf16.mxu0 %v9458_v53 }
 0xe42   : > { %4852 = vmatprep.subr.bf16.mxu1 %v9250_v37  ;;  %v9457_v37 = vcombine.low %v2742_v6, %v2750_v7  ;;  %v9410_v7 = vcombine.high %v2694_v38, %v2702_v2 }
 0xe44   : > { %4890 = vmatpush1.bf16.msra.mxu0 %v9457_v37  ;;  %v12701_v37 = vld [vmem:[#allocation17 + $0x8] sm:$0xff] }
 0xe45   : > { %4853 = vmatpush1.bf16.msra.mxu1 %v9249_v62  ;;  %v9330_v62 = vcombine.high %v2614_v8, %v2622_v9 }
 0xf03   : > { %v2287_v12 = vpop.f32.mrb[12].mxu0  ;;  %v2330_v40 = vpop.f32.mrb[60].mxu1 }
 0xf04   : > { %v2288_v41 = vadd.f32 %v2287_v12, %v2173_v11  ;;  %v2289_v13 = vpop.f32.mrb[13].mxu0  ;;  %v10266_v43 = vpop.f32.mrb[61].mxu1  ;;  %v2331_v50 = vadd.f32 %v2330_v40, %v2181_v22 }
 0xf05   : > { %v2290_v51 = vadd.f32 %v2289_v13, %v2177_v39  ;;  %v2291_v14 = vpop.f32.mrb[14].mxu0  ;;  %v2333_v15 = vpop.f32.mrb[62].mxu1 }
 0xf06   : > { %v12638_v18 = vadd.f32 %v11221_v16, %v2288_v41  ;;  %v2292_v19 = vadd.f32 %v2291_v14, %v2173_v11  ;;  %v2293_v20 = vpop.f32.mrb[15].mxu0  ;;  %v10267_v21 = vpop.f32.mrb[63].mxu1  ;;  %v2334_v26 = vadd.f32 %v2333_v15, %v2181_v22  ;;  %v12647_v33 = vadd.f32 %v11224_v31, %v2331_v50 }
 0xf07   : > { %v12641_v25 = vadd.f32 %v11222_v23, %v2290_v51  ;;  %v2294_v34 = vadd.f32 %v2293_v20, %v2177_v39 }
 0xf08   : > { %v12644_v30 = vadd.f32 %v11223_v32, %v2292_v19  ;;  %v12655_v52 = vadd.f32 %v11226_v49, %v2334_v26 }
 0xf09   : > { %v12650_v45 = vadd.f32 %v11225_v42, %v2294_v34  ;;  %v2345_v48 = vadd.f32 %v12641_v25, %v12638_v18  ;;  %v2550_v42 = vld [vmem:[#allocation17 + $0x300] sm:$0xff] }
 0xf0b   : > { %v2346_v54 = vadd.f32 %v2345_v48, %v12647_v33  ;;  %v2349_v55 = vadd.f32 %v12650_v45, %v12644_v30  ;;  %v2558_v48 = vld [vmem:[#allocation17 + $0x340] sm:$0xff] }
 0xf0c   : > { %v9266_v49 = vcombine.high %v2550_v42, %v2558_v48 }
 0xf0d   : > { %2347 = vadd.xlane.f32.xlu1 %v2346_v54  ;;  %v2350_v56 = vadd.f32 %v2349_v55, %v12655_v52  ;;  %v9265_v54 = vcombine.low %v2550_v42, %v2558_v48  ;;  %v2566_v55 = vld [vmem:[#allocation17 + $0x380] sm:$0xff] }
 0xf0e   : > { %4854 = vmatprep.subr.bf16.mxu1 %v9266_v49  ;;  %v2790_v48 = vld [vmem:[#allocation17 + $0xa80] sm:$0xff] }
 0xf0f   : > { %2351 = vadd.xlane.f32.xlu0 %v2350_v56  ;;  %4855 = vmatpush1.bf16.msra.mxu1 %v9265_v54  ;;  %v2574_v56 = vld [vmem:[#allocation17 + $0x3c0] sm:$0xff] }
 0xf10   : > { %v9282_v24 = vcombine.high %v2566_v55, %v2574_v56  ;;  %v9281_v57 = vcombine.low %v2566_v55, %v2574_v56  ;;  %v2798_v49 = vld [vmem:[#allocation17 + $0xac0] sm:$0xff] }
 0xf11   : > { %v2662_v54 = vld [vmem:[#allocation17 + $0x680] sm:$0xff]  ;;  %v9505_v55 = vcombine.low %v2790_v48, %v2798_v49  ;;  %v9506_v56 = vcombine.high %v2790_v48, %v2798_v49  ;;  %v2343_v49 = vld [vmem:[#allocation10] sm:$0x7] }
 0xf12   : > { %4856 = vmatprep.subr.bf16.mxu1 %v9282_v24  ;;  %v2670_v24 = vld [vmem:[#allocation17 + $0x6c0] sm:$0xff] }
 0xf13   : > { %4857 = vmatpush1.bf16.msra.mxu1 %v9281_v57  ;;  %v2806_v57 = vld [vmem:[#allocation17 + $0xb00] sm:$0xff]  ;;  %v9377_v59 = vcombine.low %v2662_v54, %v2670_v24  ;;  %v9378_v60 = vcombine.high %v2662_v54, %v2670_v24  ;;  %v2409_v54 = vrot.slane %v2343_v49, %v12423_v46  ;;  %v2344_v24 = vld [vmem:[#allocation11] sm:$0x7] }
 0xf14   : > { %4858 = vmatprep.subr.bf16.mxu1 %v9298_v29  ;;  %v9522_v61 = vcombine.high %v2806_v57, %v2814_v58  ;;  %v9394_v29 = vcombine.high %v2678_v63, %v2686_v0  ;;  %v9521_v36 = vcombine.low %v2806_v57, %v2814_v58 }
 0xf17   : > { %4859 = vmatpush1.bf16.msra.mxu1 %v9297_v1  ;;  %v2822_v1 = vld [vmem:[#allocation17 + $0xb80] sm:$0xff] }
 0xf18   : > { %4860 = vmatprep.subr.bf16.mxu1 %v9314_v4  ;;  %v9173_v4 = vcombine.low %v12693_v27, %v12695_v3  ;;  %v9538_v6 = vcombine.high %v2822_v1, %v2830_v28  ;;  %v9537_v53 = vcombine.low %v2822_v1, %v2830_v28  ;;  %v2441_v1 = vrot.slane %v2344_v24, %v12420_v44 }
 0xf1b   : > { %4861 = vmatpush1.bf16.msra.mxu1 %v9313_v5  ;;  %v9393_v5 = vcombine.low %v2678_v63, %v2686_v0  ;;  %v2437_v0 = vrot.slane %v2344_v24, %v12423_v46 }
 0xf1c   : > { %4862 = vmatprep.subr.bf16.mxu1 %v9330_v62  ;;  %v12703_v62 = vld [vmem:[#allocation17 + $0x48] sm:$0xff] }
 0xf9a   : > { %v2348_v10 = vpop.xlane.xlu1 %2347 }
 0xf9b   : > { %v2353_v11 = vmul.f32 0.0033333334, %v2348_v10  ;;  %v9329_v10 = vcombine.low %v2614_v8, %v2622_v9  ;;  %v9409_v8 = vcombine.low %v2694_v38, %v2702_v2  ;;  %v9174_v9 = vcombine.high %v12693_v27, %v12695_v3  ;;  %v2503_v27 = vld [vmem:[#allocation17 + $0x188] sm:$0xff] }
 0xf9c   : > { %v2352_v22 = vpop.xlane.xlu0 %2351  ;;  %v2511_v3 = vld [vmem:[#allocation17 + $0x1c8] sm:$0xff] }
 0xf9d   : > { %v12662_v39 = vsub.f32 %v12638_v18, %v2353_v11  ;;  %v12665_v12 = vsub.f32 %v12641_v25, %v2353_v11  ;;  %v12668_v40 = vsub.f32 %v12647_v33, %v2353_v11  ;;  %v2354_v41 = vmul.f32 0.0033333334, %v2352_v22  ;;  %v2758_v11 = vld [vmem:[#allocation17 + $0x980] sm:$0xff]  ;;  %4863 = vmatpush1.bf16.msra.mxu1 %v9329_v10 }
 0xf9e   : > { %v2766_v22 = vld [vmem:[#allocation17 + $0x9c0] sm:$0xff]  ;;  %v9172_v10 = vcombine.high %v12701_v37, %v12703_v62 }
 0xf9f   : > { %v12671_v13 = vsub.f32 %v12644_v30, %v2354_v41  ;;  %v12674_v43 = vsub.f32 %v12650_v45, %v2354_v41  ;;  %v12677_v50 = vsub.f32 %v12655_v52, %v2354_v41  ;;  %v2363_v51 = vsel %vm680_vm0, %v12668_v40, 0.0 }
 0xfa0   : > { %v2367_v14 = vmul.f32 %v12662_v39, %v12662_v39  ;;  %v2368_v15 = vmul.f32 %v12665_v12, %v12665_v12  ;;  %v2369_v16 = vmul.f32 %v2363_v51, %v2363_v51  ;;  %v9474_v41 = vcombine.high %v2758_v11, %v2766_v22  ;;  %v2630_v51 = vld [vmem:[#allocation17 + $0x580] sm:$0xff] }
 0xfa1   : > { %v2370_v19 = vmul.f32 %v12671_v13, %v12671_v13  ;;  %v2366_v20 = vsel %vm680_vm0, %v12677_v50, 0.0  ;;  %v2371_v21 = vmul.f32 %v12674_v43, %v12674_v43  ;;  %v2418_v58 = vmul.f32 %v2409_v54, %v12665_v12 }
 0xfa2   : > { %v2373_v23 = vadd.f32 %v2368_v15, %v2367_v14  ;;  %v2372_v34 = vmul.f32 %v2366_v20, %v2366_v20  ;;  %v2638_v14 = vld [vmem:[#allocation17 + $0x5c0] sm:$0xff]  ;;  %v9473_v15 = vcombine.low %v2758_v11, %v2766_v22  ;;  %4891 = vmatprep.subr.bf16.mxu0 %v9474_v41  ;;  %v9171_v11 = vcombine.low %v12701_v37, %v12703_v62 }
 0xfa3   : > { %v2377_v32 = vadd.f32 %v2371_v21, %v2370_v19  ;;  %v9345_v19 = vcombine.low %v2630_v51, %v2638_v14  ;;  %v2774_v20 = vld [vmem:[#allocation17 + $0xa00] sm:$0xff]  ;;  %v2421_v28 = vmul.f32 %v2409_v54, %v12674_v43  ;;  %v9220_v62 = vcombine.high %v2503_v27, %v2511_v3  ;;  %v2528_v54 = vld [vmem:[#allocation17 + $0x250] sm:$0xff] }
 0xfa4   : > { %v2374_v26 = vadd.f32 %v2373_v23, %v2369_v16  ;;  %v9346_v16 = vcombine.high %v2630_v51, %v2638_v14  ;;  %4892 = vmatpush1.bf16.msra.mxu0 %v9473_v15  ;;  %v2782_v21 = vld [vmem:[#allocation17 + $0xa40] sm:$0xff] }
 0xfa5   : > { %v2378_v31 = vadd.f32 %v2377_v32, %v2372_v34  ;;  %v9490_v23 = vcombine.high %v2774_v20, %v2782_v21  ;;  %v2654_v34 = vld [vmem:[#allocation17 + $0x640] sm:$0xff]  ;;  %v9489_v32 = vcombine.low %v2774_v20, %v2782_v21 }
 0xfa6   : > { %2375 = vadd.xlane.f32.xlu0 %v2374_v26  ;;  %4864 = vmatprep.subr.bf16.mxu1 %v9346_v16  ;;  %v2646_v26 = vld [vmem:[#allocation17 + $0x600] sm:$0xff] }
 0xfa7   : > { %4865 = vmatpush1.bf16.msra.mxu1 %v9345_v19  ;;  %4893 = vmatprep.subr.bf16.mxu0 %v9490_v23  ;;  %v9361_v42 = vcombine.low %v2646_v26, %v2654_v34 }
 0xfa8   : > { %4894 = vmatpush1.bf16.msra.mxu0 %v9489_v32 }
 0xfa9   : > { %4895 = vmatprep.subr.bf16.mxu0 %v9506_v56  ;;  %v2405_v56 = vrot.slane %v2343_v49, %v12426_v47 }
 0xfaa   : > { %2379 = vadd.xlane.f32.xlu0 %v2378_v31  ;;  %v9362_v31 = vcombine.high %v2646_v26, %v2654_v34 }
 0xfac   : > { %4866 = vmatprep.subr.bf16.mxu1 %v9362_v31  ;;  %4896 = vmatpush1.bf16.msra.mxu0 %v9505_v55  ;;  %v2413_v55 = vrot.slane %v2343_v49, %v12420_v44 }
 0xfad   : > { %4867 = vmatpush1.bf16.msra.mxu1 %v9361_v42  ;;  %4897 = vmatprep.subr.bf16.mxu0 %v9522_v61  ;;  %v2420_v61 = vmul.f32 %v2405_v56, %v12671_v13 }
 0xfae   : > { %4868 = vmatprep.subr.bf16.mxu1 %v9378_v60  ;;  %v2417_v60 = vmul.f32 %v2405_v56, %v12662_v39  ;;  %v2422_v38 = vmul.f32 %v2413_v55, %v12677_v50  ;;  %v2527_v56 = vld [vmem:[#allocation17 + $0x248] sm:$0xff] }
 0xfb0   : > { %4898 = vmatpush1.bf16.msra.mxu0 %v9521_v36  ;;  %v2433_v36 = vrot.slane %v2344_v24, %v12426_v47 }
 0xfb1   : > { %4869 = vmatpush1.bf16.msra.mxu1 %v9377_v59  ;;  %4899 = vmatprep.subr.bf16.mxu0 %v9538_v6  ;;  %v2419_v59 = vmul.f32 %v2413_v55, %v12668_v40  ;;  %v2519_v55 = vld [vmem:[#allocation17 + $0x208] sm:$0xff] }
 0xfb2   : > { %4870 = vmatprep.subr.bf16.mxu1 %v9394_v29 }
 0xfb4   : > { %4900 = vmatpush1.bf16.msra.mxu0 %v9537_v53 }
 0xfb5   : > { %4871 = vmatpush1.bf16.msra.mxu1 %v9393_v5  ;;  %5014 = vmatprep.subr.bf16.mxu0 %v9174_v9 }
 0xfb6   : > { %4872 = vmatprep.subr.bf16.mxu1 %v9410_v7 }
 0xfb9   : > { %4873 = vmatpush1.bf16.msra.mxu1 %v9409_v8 }
 0xfba   : > { %4928 = vmatprep.subr.bf16.mxu1 %v9172_v10  ;;  %v2472_v10 = vld [vmem:[#allocation17 + $0x90] sm:$0xff] }
0x1033   : > { %v2376_v22 = vpop.xlane.xlu0 %2375 }
0x1034   : > { %v2381_v41 = vmul.f32 0.0033444816, %v2376_v22  ;;  %v2480_v22 = vld [vmem:[#allocation17 + $0xd0] sm:$0xff] }
0x1036   : > { %11213 = vrsqrt.f32 %v2381_v41  ;;  %vm2385_vm14 = vcmp.eq.f32.partialorder %v2381_v41, inf  ;;  %v2388_v19 = vand.u32 2147483648, %v2381_v41  ;;  %vm2387_vm15 = vcmp.eq.f32.partialorder %v2381_v41, 0.0 }
0x1037   : > { %v2380_v51 = vpop.xlane.xlu0 %2379 }
0x1038   : > { %v2382_v14 = vmul.f32 0.0033444816, %v2380_v51  ;;  %v2479_v51 = vld [vmem:[#allocation17 + $0xc8] sm:$0xff] }
0x103a   : > { %11215 = vrsqrt.f32 %v2382_v14  ;;  %vm2392_vm0 = vcmp.eq.f32.partialorder %v2382_v14, inf  ;;  %v2395_v32 = vand.u32 2147483648, %v2382_v14  ;;  %vm2394_vm1 = vcmp.eq.f32.partialorder %v2382_v14, 0.0 }
0x1040   : > { %v11214_v15 = vpop.eup %11213 }
0x1041   : > { %v2384_v16 = vmul.f32 %v11214_v15, %v2381_v41  ;;  %v9190_v15 = vcombine.high %v2472_v10, %v2480_v22 }
0x1043   : > { %v2386_v20 = vsel %vm2385_vm14, %v2381_v41, %v2384_v16  ;;  %v2471_v41 = vld [vmem:[#allocation17 + $0x88] sm:$0xff]  ;;  %v2488_v16 = vld [vmem:[#allocation17 + $0x110] sm:$0xff] }
0x1044   : > { %v11216_v21 = vpop.eup %11215  ;;  %v2389_v23 = vsel %vm2387_vm15, %v2388_v19, %v2386_v20  ;;  %v2496_v19 = vld [vmem:[#allocation17 + $0x150] sm:$0xff]  ;;  %v9188_v20 = vcombine.high %v2471_v41, %v2479_v51 }
0x1045   : > { %v2397_v26 = vadd.f32 1e-06, %v2389_v23  ;;  %v2391_v34 = vmul.f32 %v11216_v21, %v2382_v14  ;;  %v2487_v21 = vld [vmem:[#allocation17 + $0x108] sm:$0xff] }
0x1046   : > { %v2495_v23 = vld [vmem:[#allocation17 + $0x148] sm:$0xff] }
0x1047   : > { %11217 = vrcp.f32 %v2397_v26  ;;  %v2393_v31 = vsel %vm2392_vm0, %v2382_v14, %v2391_v34  ;;  %v9189_v26 = vcombine.low %v2472_v10, %v2480_v22  ;;  %v9187_v34 = vcombine.low %v2471_v41, %v2479_v51 }
0x1048   : > { %v2396_v42 = vsel %vm2394_vm1, %v2395_v32, %v2393_v31  ;;  %v9206_v32 = vcombine.high %v2488_v16, %v2496_v19  ;;  %v9204_v31 = vcombine.high %v2487_v21, %v2495_v23  ;;  %v9203_v49 = vcombine.low %v2487_v21, %v2495_v23 }
0x1049   : > { %v2398_v48 = vadd.f32 1e-06, %v2396_v42  ;;  %v2504_v42 = vld [vmem:[#allocation17 + $0x190] sm:$0xff] }
0x104b   : > { %11219 = vrcp.f32 %v2398_v48  ;;  %v2512_v48 = vld [vmem:[#allocation17 + $0x1d0] sm:$0xff] }
0x104c   : > { %v9222_v37 = vcombine.high %v2504_v42, %v2512_v48  ;;  %v9221_v24 = vcombine.low %v2504_v42, %v2512_v48  ;;  %v2599_v42 = vld [vmem:[#allocation17 + $0x488] sm:$0xff] }
0x104d   : > { %v2607_v48 = vld [vmem:[#allocation17 + $0x4c8] sm:$0xff] }
0x1051   : > { %v11218_v57 = vpop.eup %11217 }
0x1052   : > { %v2424_v63 = vmul.f32 %v11218_v57, %v2418_v58  ;;  %v2425_v29 = vmul.f32 %v11218_v57, %v2419_v59  ;;  %v2423_v2 = vmul.f32 %v11218_v57, %v2417_v60  ;;  %v9219_v57 = vcombine.low %v2503_v27, %v2511_v3  ;;  %v2536_v60 = vld [vmem:[#allocation17 + $0x290] sm:$0xff] }
0x1053   : > { %v9236_v59 = vcombine.high %v2519_v55, %v2527_v56 }
0x1054   : > { %v2446_v39 = vadd.f32 %v2437_v0, %v2424_v63  ;;  %v2447_v7 = vadd.f32 %v2441_v1, %v2425_v29  ;;  %v2445_v8 = vadd.f32 %v2433_v36, %v2423_v2  ;;  %v2535_v63 = vld [vmem:[#allocation17 + $0x288] sm:$0xff]  ;;  %v2552_v2 = vld [vmem:[#allocation17 + $0x310] sm:$0xff] }
0x1055   : > { %v11220_v12 = vpop.eup %11219 }
0x1056   : > { %v2427_v5 = vmul.f32 %v11220_v12, %v2421_v28  ;;  %v2428_v40 = vmul.f32 %v11220_v12, %v2422_v38  ;;  %v2426_v6 = vmul.f32 %v11220_v12, %v2420_v61  ;;  %v2544_v61 = vld [vmem:[#allocation17 + $0x2d0] sm:$0xff]  ;;  %v2551_v12 = vld [vmem:[#allocation17 + $0x308] sm:$0xff] }
0x1057   : > { %v9254_v28 = vcombine.high %v2536_v60, %v2544_v61 }
0x1058   : > { %v2449_v13 = vadd.f32 %v2437_v0, %v2427_v5  ;;  %v2450_v53 = vadd.f32 %v2441_v1, %v2428_v40  ;;  %v2448_v9 = vadd.f32 %v2433_v36, %v2426_v6  ;;  %v2543_v0 = vld [vmem:[#allocation17 + $0x2c8] sm:$0xff]  ;;  %v9235_v1 = vcombine.low %v2519_v55, %v2527_v56  ;;  %v2560_v36 = vld [vmem:[#allocation17 + $0x350] sm:$0xff] }
0x1059   : > { %v9252_v38 = vcombine.high %v2535_v63, %v2543_v0  ;;  %v2559_v5 = vld [vmem:[#allocation17 + $0x348] sm:$0xff]  ;;  %v9253_v40 = vcombine.low %v2536_v60, %v2544_v61  ;;  %v9251_v6 = vcombine.low %v2535_v63, %v2543_v0  ;;  %v9269_v10 = vcombine.low %v2552_v2, %v2560_v36 }
0x105a   : > { %v12721_v43 = vpack.c.bf16 %v2449_v13, %v2446_v39  ;;  %v12723_v50 = vpack.c.bf16 %v2450_v53, %v2447_v7  ;;  %v12725_v14 = vpack.c.bf16 %v2448_v9, %v2445_v8  ;;  %v9270_v39 = vcombine.high %v2552_v2, %v2560_v36  ;;  %v2568_v13 = vld [vmem:[#allocation17 + $0x390] sm:$0xff]  ;;  %v2567_v8 = vld [vmem:[#allocation17 + $0x388] sm:$0xff] }
0x105b   : > { %v9268_v7 = vcombine.high %v2551_v12, %v2559_v5  ;;  %v2576_v53 = vld [vmem:[#allocation17 + $0x3d0] sm:$0xff]  ;;  %v2575_v9 = vld [vmem:[#allocation17 + $0x3c8] sm:$0xff]  ;;  %v9267_v22 = vcombine.low %v2551_v12, %v2559_v5  ;;  %v9315_v56 = vcombine.low %v2599_v42, %v2607_v48 }
0x105c   : > { %4874 = vmatprep.mubr.bf16.mxu1 %v12721_v43  ;;  %4918 = vmatmul.mubr.bf16.vlgmr.msra.gmra.mrb[16].mxu0 %v12723_v50  ;;  %v9286_v41 = vcombine.high %v2568_v13, %v2576_v53  ;;  %v9284_v51 = vcombine.high %v2567_v8, %v2575_v9  ;;  %v9285_v21 = vcombine.low %v2568_v13, %v2576_v53  ;;  %v2631_v60 = vld [vmem:[#allocation17 + $0x588] sm:$0xff] }
0x105d   : > { %5015 = vmatpush1.bf16.msra.mxu0 %v9173_v4  ;;  %4875 = vmatmul.mubr.bf16.vlgmr.msra.gmra.mrb[64].mxu1 %v12725_v14  ;;  %v9205_v4 = vcombine.low %v2488_v16, %v2496_v19  ;;  %v2592_v16 = vld [vmem:[#allocation17 + $0x450] sm:$0xff]  ;;  %v2583_v19 = vld [vmem:[#allocation17 + $0x408] sm:$0xff]  ;;  %v9283_v23 = vcombine.low %v2567_v8, %v2575_v9 }
0x105e   : > { %4929 = vmatpush1.bf16.msra.mxu1 %v9171_v11  ;;  %5046 = vmatprep.mubr.bf16.mxu0 %v12721_v43  ;;  %v2520_v11 = vld [vmem:[#allocation17 + $0x210] sm:$0xff]  ;;  %v2639_v61 = vld [vmem:[#allocation17 + $0x5c8] sm:$0xff] }
0x105f   : > { %4960 = vmatprep.mubr.bf16.mxu1 %v12721_v43  ;;  %5016 = vmatprep.subr.bf16.mxu0 %v9190_v15  ;;  %v9238_v58 = vcombine.high %v2520_v11, %v2528_v54  ;;  %v9237_v29 = vcombine.low %v2520_v11, %v2528_v54  ;;  %v2584_v15 = vld [vmem:[#allocation17 + $0x410] sm:$0xff]  ;;  %v2615_v11 = vld [vmem:[#allocation17 + $0x508] sm:$0xff]  ;;  %v9347_v5 = vcombine.low %v2631_v60, %v2639_v61 }
0x1060   : > { %4930 = vmatprep.subr.bf16.mxu1 %v9188_v20  ;;  %v2591_v20 = vld [vmem:[#allocation17 + $0x448] sm:$0xff]  ;;  %v9301_v27 = vcombine.low %v2584_v15, %v2592_v16 }
0x1061   : > { %5017 = vmatpush1.bf16.msra.mxu0 %v9189_v26  ;;  %v9302_v26 = vcombine.high %v2584_v15, %v2592_v16  ;;  %v9299_v3 = vcombine.low %v2583_v19, %v2591_v20  ;;  %v2623_v54 = vld [vmem:[#allocation17 + $0x548] sm:$0xff] }
0x1062   : > { %4931 = vmatpush1.bf16.msra.mxu1 %v9187_v34  ;;  %5018 = vmatprep.subr.bf16.mxu0 %v9206_v32  ;;  %v9300_v34 = vcombine.high %v2583_v19, %v2591_v20  ;;  %v2600_v32 = vld [vmem:[#allocation17 + $0x490] sm:$0xff]  ;;  %v9331_v0 = vcombine.low %v2615_v11, %v2623_v54  ;;  %v2647_v2 = vld [vmem:[#allocation17 + $0x608] sm:$0xff] }
0x1063   : > { %4932 = vmatprep.subr.bf16.mxu1 %v9204_v31  ;;  %v2608_v31 = vld [vmem:[#allocation17 + $0x4d0] sm:$0xff]  ;;  %v2655_v36 = vld [vmem:[#allocation17 + $0x648] sm:$0xff] }
0x1064   : > { %v9317_v55 = vcombine.low %v2600_v32, %v2608_v31  ;;  %v2663_v13 = vld [vmem:[#allocation17 + $0x688] sm:$0xff]  ;;  %v9363_v9 = vcombine.low %v2647_v2, %v2655_v36 }
0x1065   : > { %5019 = vmatpush1.bf16.msra.mxu0 %v9205_v4  ;;  %v9318_v4 = vcombine.high %v2600_v32, %v2608_v31  ;;  %v2671_v53 = vld [vmem:[#allocation17 + $0x6c8] sm:$0xff] }
0x1066   : > { %4933 = vmatpush1.bf16.msra.mxu1 %v9203_v49  ;;  %5020 = vmatprep.subr.bf16.mxu0 %v9222_v37  ;;  %v9316_v49 = vcombine.high %v2599_v42, %v2607_v48  ;;  %v2616_v37 = vld [vmem:[#allocation17 + $0x510] sm:$0xff]  ;;  %v2679_v15 = vld [vmem:[#allocation17 + $0x708] sm:$0xff]  ;;  %v9379_v20 = vcombine.low %v2663_v13, %v2671_v53 }
0x1067   : > { %4934 = vmatprep.subr.bf16.mxu1 %v9220_v62  ;;  %v2624_v62 = vld [vmem:[#allocation17 + $0x550] sm:$0xff]  ;;  %v2687_v16 = vld [vmem:[#allocation17 + $0x748] sm:$0xff] }
0x1068   : > { %v9333_v63 = vcombine.low %v2616_v37, %v2624_v62  ;;  %v2695_v32 = vld [vmem:[#allocation17 + $0x788] sm:$0xff]  ;;  %v9395_v48 = vcombine.low %v2679_v15, %v2687_v16 }
0x1069   : > { %5021 = vmatpush1.bf16.msra.mxu0 %v9221_v24  ;;  %v9334_v24 = vcombine.high %v2616_v37, %v2624_v62  ;;  %v2703_v31 = vld [vmem:[#allocation17 + $0x7c8] sm:$0xff] }
0x106a   : > { %4935 = vmatpush1.bf16.msra.mxu1 %v9219_v57  ;;  %5022 = vmatprep.subr.bf16.mxu0 %v9238_v58  ;;  %v9332_v57 = vcombine.high %v2615_v11, %v2623_v54  ;;  %v2632_v58 = vld [vmem:[#allocation17 + $0x590] sm:$0xff]  ;;  %v2711_v37 = vld [vmem:[#allocation17 + $0x808] sm:$0xff]  ;;  %v9411_v54 = vcombine.low %v2695_v32, %v2703_v31 }
0x106b   : > { %4936 = vmatprep.subr.bf16.mxu1 %v9236_v59  ;;  %v2640_v59 = vld [vmem:[#allocation17 + $0x5d0] sm:$0xff]  ;;  %v2719_v62 = vld [vmem:[#allocation17 + $0x848] sm:$0xff] }
0x106c   : > { %v9349_v12 = vcombine.low %v2632_v58, %v2640_v59 }
0x106d   : > { %5023 = vmatpush1.bf16.msra.mxu0 %v9237_v29  ;;  %v9350_v29 = vcombine.high %v2632_v58, %v2640_v59  ;;  %v2727_v58 = vld [vmem:[#allocation17 + $0x888] sm:$0xff] }
0x106e   : > { %4937 = vmatpush1.bf16.msra.mxu1 %v9235_v1  ;;  %5024 = vmatprep.subr.bf16.mxu0 %v9254_v28  ;;  %v9348_v1 = vcombine.high %v2631_v60, %v2639_v61  ;;  %v2648_v28 = vld [vmem:[#allocation17 + $0x610] sm:$0xff]  ;;  %v2735_v59 = vld [vmem:[#allocation17 + $0x8c8] sm:$0xff]  ;;  %v9427_v61 = vcombine.low %v2711_v37, %v2719_v62 }
0x106f   : > { %4938 = vmatprep.subr.bf16.mxu1 %v9252_v38  ;;  %v2656_v38 = vld [vmem:[#allocation17 + $0x650] sm:$0xff] }
0x1070   : > { %v9365_v8 = vcombine.low %v2648_v28, %v2656_v38 }
0x1071   : > { %5025 = vmatpush1.bf16.msra.mxu0 %v9253_v40  ;;  %v9366_v40 = vcombine.high %v2648_v28, %v2656_v38  ;;  %v2743_v28 = vld [vmem:[#allocation17 + $0x908] sm:$0xff] }
0x1072   : > { %4939 = vmatpush1.bf16.msra.mxu1 %v9251_v6  ;;  %5026 = vmatprep.subr.bf16.mxu0 %v9270_v39  ;;  %v9364_v6 = vcombine.high %v2647_v2, %v2655_v36  ;;  %v2664_v39 = vld [vmem:[#allocation17 + $0x690] sm:$0xff]  ;;  %v2751_v38 = vld [vmem:[#allocation17 + $0x948] sm:$0xff]  ;;  %v9443_v36 = vcombine.low %v2727_v58, %v2735_v59 }
0x1073   : > { %4940 = vmatprep.subr.bf16.mxu1 %v9268_v7  ;;  %v2672_v7 = vld [vmem:[#allocation17 + $0x6d0] sm:$0xff] }
0x1074   : > { %v9381_v19 = vcombine.low %v2664_v39, %v2672_v7 }
0x1075   : > { %5027 = vmatpush1.bf16.msra.mxu0 %v9269_v10  ;;  %v9382_v10 = vcombine.high %v2664_v39, %v2672_v7  ;;  %v2759_v39 = vld [vmem:[#allocation17 + $0x988] sm:$0xff] }
0x1076   : > { %4941 = vmatpush1.bf16.msra.mxu1 %v9267_v22  ;;  %5028 = vmatprep.subr.bf16.mxu0 %v9286_v41  ;;  %v9380_v22 = vcombine.high %v2663_v13, %v2671_v53  ;;  %v2680_v41 = vld [vmem:[#allocation17 + $0x710] sm:$0xff]  ;;  %v2767_v7 = vld [vmem:[#allocation17 + $0x9c8] sm:$0xff]  ;;  %v9459_v53 = vcombine.low %v2743_v28, %v2751_v38 }
0x1077   : > { %4942 = vmatprep.subr.bf16.mxu1 %v9284_v51  ;;  %v2688_v51 = vld [vmem:[#allocation17 + $0x750] sm:$0xff] }
0x1078   : > { %v9397_v42 = vcombine.low %v2680_v41, %v2688_v51 }
0x1079   : > { %5029 = vmatpush1.bf16.msra.mxu0 %v9285_v21  ;;  %v9398_v21 = vcombine.high %v2680_v41, %v2688_v51  ;;  %v2775_v41 = vld [vmem:[#allocation17 + $0xa08] sm:$0xff] }
0x107a   : > { %4943 = vmatpush1.bf16.msra.mxu1 %v9283_v23  ;;  %5030 = vmatprep.subr.bf16.mxu0 %v9302_v26  ;;  %v9396_v23 = vcombine.high %v2679_v15, %v2687_v16  ;;  %v2696_v26 = vld [vmem:[#allocation17 + $0x790] sm:$0xff]  ;;  %v2783_v51 = vld [vmem:[#allocation17 + $0xa48] sm:$0xff]  ;;  %v9475_v16 = vcombine.low %v2759_v39, %v2767_v7 }
0x107b   : > { %4944 = vmatprep.subr.bf16.mxu1 %v9300_v34  ;;  %v2704_v34 = vld [vmem:[#allocation17 + $0x7d0] sm:$0xff] }
0x107c   : > { %v9413_v11 = vcombine.low %v2696_v26, %v2704_v34 }
0x107d   : > { %5031 = vmatpush1.bf16.msra.mxu0 %v9301_v27  ;;  %v9414_v27 = vcombine.high %v2696_v26, %v2704_v34  ;;  %v2791_v26 = vld [vmem:[#allocation17 + $0xa88] sm:$0xff] }
0x107e   : > { %4945 = vmatpush1.bf16.msra.mxu1 %v9299_v3  ;;  %5032 = vmatprep.subr.bf16.mxu0 %v9318_v4  ;;  %v9412_v3 = vcombine.high %v2695_v32, %v2703_v31  ;;  %v2712_v4 = vld [vmem:[#allocation17 + $0x810] sm:$0xff]  ;;  %v2799_v34 = vld [vmem:[#allocation17 + $0xac8] sm:$0xff]  ;;  %v9491_v31 = vcombine.low %v2775_v41, %v2783_v51 }
0x107f   : > { %4946 = vmatprep.subr.bf16.mxu1 %v9316_v49  ;;  %v2720_v49 = vld [vmem:[#allocation17 + $0x850] sm:$0xff] }
0x1080   : > { %v9429_v60 = vcombine.low %v2712_v4, %v2720_v49 }
0x1081   : > { %5033 = vmatpush1.bf16.msra.mxu0 %v9317_v55  ;;  %v9430_v55 = vcombine.high %v2712_v4, %v2720_v49  ;;  %v2807_v4 = vld [vmem:[#allocation17 + $0xb08] sm:$0xff] }
0x1082   : > { %4947 = vmatpush1.bf16.msra.mxu1 %v9315_v56  ;;  %5034 = vmatprep.subr.bf16.mxu0 %v9334_v24  ;;  %v9428_v56 = vcombine.high %v2711_v37, %v2719_v62  ;;  %v2728_v24 = vld [vmem:[#allocation17 + $0x890] sm:$0xff]  ;;  %v2815_v49 = vld [vmem:[#allocation17 + $0xb48] sm:$0xff]  ;;  %v9507_v62 = vcombine.low %v2791_v26, %v2799_v34 }
0x1083   : > { %4948 = vmatprep.subr.bf16.mxu1 %v9332_v57  ;;  %v2736_v57 = vld [vmem:[#allocation17 + $0x8d0] sm:$0xff] }
0x1084   : > { %v9445_v2 = vcombine.low %v2728_v24, %v2736_v57 }
0x1085   : > { %5035 = vmatpush1.bf16.msra.mxu0 %v9333_v63  ;;  %v9446_v63 = vcombine.high %v2728_v24, %v2736_v57  ;;  %v2823_v24 = vld [vmem:[#allocation17 + $0xb88] sm:$0xff] }
0x1086   : > { %4949 = vmatpush1.bf16.msra.mxu1 %v9331_v0  ;;  %5036 = vmatprep.subr.bf16.mxu0 %v9350_v29  ;;  %v9444_v0 = vcombine.high %v2727_v58, %v2735_v59  ;;  %v2744_v29 = vld [vmem:[#allocation17 + $0x910] sm:$0xff]  ;;  %v2831_v57 = vld [vmem:[#allocation17 + $0xbc8] sm:$0xff]  ;;  %v9523_v59 = vcombine.low %v2807_v4, %v2815_v49 }
0x1087   : > { %4950 = vmatprep.subr.bf16.mxu1 %v9348_v1  ;;  %v2752_v1 = vld [vmem:[#allocation17 + $0x950] sm:$0xff] }
0x1088   : > { %v9461_v13 = vcombine.low %v2744_v29, %v2752_v1 }
0x1089   : > { %5037 = vmatpush1.bf16.msra.mxu0 %v9349_v12  ;;  %v9462_v12 = vcombine.high %v2744_v29, %v2752_v1  ;;  %v2457_v29 = vld [vmem:[#allocation17 + $0x18] sm:$0xff] }
0x108a   : > { %4951 = vmatpush1.bf16.msra.mxu1 %v9347_v5  ;;  %5038 = vmatprep.subr.bf16.mxu0 %v9366_v40  ;;  %v9460_v5 = vcombine.high %v2743_v28, %v2751_v38  ;;  %v2760_v40 = vld [vmem:[#allocation17 + $0x990] sm:$0xff]  ;;  %v2465_v1 = vld [vmem:[#allocation17 + $0x58] sm:$0xff]  ;;  %v9539_v38 = vcombine.low %v2823_v24, %v2831_v57 }
0x108b   : > { %4952 = vmatprep.subr.bf16.mxu1 %v9364_v6  ;;  %v2768_v6 = vld [vmem:[#allocation17 + $0x9d0] sm:$0xff] }
0x108c   : > { %v9477_v15 = vcombine.low %v2760_v40, %v2768_v6 }
0x108d   : > { %5039 = vmatpush1.bf16.msra.mxu0 %v9365_v8  ;;  %v9478_v8 = vcombine.high %v2760_v40, %v2768_v6  ;;  %v2473_v6 = vld [vmem:[#allocation17 + $0x98] sm:$0xff] }
0x108e   : > { %4953 = vmatpush1.bf16.msra.mxu1 %v9363_v9  ;;  %5040 = vmatprep.subr.bf16.mxu0 %v9382_v10  ;;  %v9476_v9 = vcombine.high %v2759_v39, %v2767_v7  ;;  %v2776_v10 = vld [vmem:[#allocation17 + $0xa10] sm:$0xff]  ;;  %v2481_v39 = vld [vmem:[#allocation17 + $0xd8] sm:$0xff]  ;;  %v9175_v7 = vcombine.low %v2457_v29, %v2465_v1 }
0x108f   : > { %4954 = vmatprep.subr.bf16.mxu1 %v9380_v22  ;;  %v2784_v22 = vld [vmem:[#allocation17 + $0xa50] sm:$0xff] }
0x1090   : > { %v9493_v32 = vcombine.low %v2776_v10, %v2784_v22 }
0x1091   : > { %5041 = vmatpush1.bf16.msra.mxu0 %v9381_v19  ;;  %v9494_v19 = vcombine.high %v2776_v10, %v2784_v22  ;;  %v2489_v10 = vld [vmem:[#allocation17 + $0x118] sm:$0xff] }
0x1092   : > { %4955 = vmatpush1.bf16.msra.mxu1 %v9379_v20  ;;  %5042 = vmatprep.subr.bf16.mxu0 %v9398_v21  ;;  %v9492_v20 = vcombine.high %v2775_v41, %v2783_v51  ;;  %v2792_v21 = vld [vmem:[#allocation17 + $0xa90] sm:$0xff]  ;;  %v2497_v22 = vld [vmem:[#allocation17 + $0x158] sm:$0xff]  ;;  %v9191_v51 = vcombine.low %v2473_v6, %v2481_v39 }
0x1093   : > { %4956 = vmatprep.subr.bf16.mxu1 %v9396_v23  ;;  %v2800_v23 = vld [vmem:[#allocation17 + $0xad0] sm:$0xff] }
0x1094   : > { %v9509_v37 = vcombine.low %v2792_v21, %v2800_v23 }
0x1095   : > { %5043 = vmatpush1.bf16.msra.mxu0 %v9397_v42  ;;  %v9510_v42 = vcombine.high %v2792_v21, %v2800_v23  ;;  %v2505_v21 = vld [vmem:[#allocation17 + $0x198] sm:$0xff] }
0x1096   : > { %4957 = vmatpush1.bf16.msra.mxu1 %v9395_v48  ;;  %5044 = vmatprep.subr.bf16.mxu0 %v9414_v27  ;;  %v9508_v48 = vcombine.high %v2791_v26, %v2799_v34  ;;  %v2808_v27 = vld [vmem:[#allocation17 + $0xb10] sm:$0xff]  ;;  %v2513_v23 = vld [vmem:[#allocation17 + $0x1d8] sm:$0xff]  ;;  %v9207_v34 = vcombine.low %v2489_v10, %v2497_v22 }
0x1097   : > { %4958 = vmatprep.subr.bf16.mxu1 %v9412_v3  ;;  %v2816_v3 = vld [vmem:[#allocation17 + $0xb50] sm:$0xff] }
0x1098   : > { %v9525_v58 = vcombine.low %v2808_v27, %v2816_v3 }
0x1099   : > { %5045 = vmatpush1.bf16.msra.mxu0 %v9413_v11  ;;  %v9526_v11 = vcombine.high %v2808_v27, %v2816_v3  ;;  %v2521_v27 = vld [vmem:[#allocation17 + $0x218] sm:$0xff] }
0x109a   : > { %4959 = vmatpush1.bf16.msra.mxu1 %v9411_v54  ;;  %5057 = vmatprep.subr.bf16.mxu0 %v9430_v55  ;;  %v9524_v54 = vcombine.high %v2807_v4, %v2815_v49  ;;  %v2824_v55 = vld [vmem:[#allocation17 + $0xb90] sm:$0xff]  ;;  %v2529_v3 = vld [vmem:[#allocation17 + $0x258] sm:$0xff]  ;;  %v9223_v49 = vcombine.low %v2505_v21, %v2513_v23 }
0x109b   : > { %4971 = vmatprep.subr.bf16.mxu1 %v9428_v56  ;;  %v2832_v56 = vld [vmem:[#allocation17 + $0xbd0] sm:$0xff] }
0x109c   : > { %5047 = vmatmul.mubr.bf16.vlgmr.msra.gmra.mrb[20].mxu0 %v12725_v14  ;;  %v9541_v28 = vcombine.low %v2824_v55, %v2832_v56 }
0x109d   : > { %4961 = vmatmul.mubr.bf16.vlgmr.msra.gmra.mrb[68].mxu1 %v12725_v14  ;;  %5058 = vmatpush1.bf16.msra.mxu0 %v9429_v60  ;;  %v9542_v60 = vcombine.high %v2824_v55, %v2832_v56  ;;  %v2537_v55 = vld [vmem:[#allocation17 + $0x298] sm:$0xff] }
0x109e   : > { %4972 = vmatpush1.bf16.msra.mxu1 %v9427_v61  ;;  %5059 = vmatprep.subr.bf16.mxu0 %v9446_v63  ;;  %v9540_v61 = vcombine.high %v2823_v24, %v2831_v57  ;;  %v2458_v63 = vld [vmem:[#allocation17 + $0x20] sm:$0xff]  ;;  %v2545_v56 = vld [vmem:[#allocation17 + $0x2d8] sm:$0xff]  ;;  %v9239_v57 = vcombine.low %v2521_v27, %v2529_v3 }
0x109f   : > { %4973 = vmatprep.subr.bf16.mxu1 %v9444_v0  ;;  %5089 = vmatprep.mubr.bf16.mxu0 %v11713_v17  ;;  %v2466_v0 = vld [vmem:[#allocation17 + $0x60] sm:$0xff] }
0x10a0   : > { %5003 = vmatprep.mubr.bf16.mxu1 %v11713_v17  ;;  %v9177_v40 = vcombine.low %v2458_v63, %v2466_v0 }
0x10a1   : > { %5060 = vmatpush1.bf16.msra.mxu0 %v9445_v2  ;;  %v9178_v2 = vcombine.high %v2458_v63, %v2466_v0  ;;  %v2553_v63 = vld [vmem:[#allocation17 + $0x318] sm:$0xff] }
0x10a2   : > { %4974 = vmatpush1.bf16.msra.mxu1 %v9443_v36  ;;  %5061 = vmatprep.subr.bf16.mxu0 %v9462_v12  ;;  %v9176_v36 = vcombine.high %v2457_v29, %v2465_v1  ;;  %v2474_v12 = vld [vmem:[#allocation17 + $0xa0] sm:$0xff]  ;;  %v2561_v0 = vld [vmem:[#allocation17 + $0x358] sm:$0xff]  ;;  %v9255_v1 = vcombine.low %v2537_v55, %v2545_v56 }
0x10a3   : > { %4975 = vmatprep.subr.bf16.mxu1 %v9460_v5  ;;  %v2482_v5 = vld [vmem:[#allocation17 + $0xe0] sm:$0xff] }
0x10a4   : > { %v9193_v41 = vcombine.low %v2474_v12, %v2482_v5 }
0x10a5   : > { %5062 = vmatpush1.bf16.msra.mxu0 %v9461_v13  ;;  %v9194_v13 = vcombine.high %v2474_v12, %v2482_v5  ;;  %v2569_v12 = vld [vmem:[#allocation17 + $0x398] sm:$0xff] }
0x10a6   : > { %4976 = vmatpush1.bf16.msra.mxu1 %v9459_v53  ;;  %5063 = vmatprep.subr.bf16.mxu0 %v9478_v8  ;;  %v2490_v53 = vld [vmem:[#allocation17 + $0x120] sm:$0xff]  ;;  %v2577_v5 = vld [vmem:[#allocation17 + $0x3d8] sm:$0xff] }
0x10a7   : > { %4977 = vmatprep.subr.bf16.mxu1 %v9476_v9  ;;  %v2498_v8 = vld [vmem:[#allocation17 + $0x160] sm:$0xff]  ;;  %v9192_v9 = vcombine.high %v2473_v6, %v2481_v39  ;;  %v9271_v6 = vcombine.low %v2553_v63, %v2561_v0 }
0x10a8   : > { %v9209_v26 = vcombine.low %v2490_v53, %v2498_v8 }
0x10a9   : > { %5064 = vmatpush1.bf16.msra.mxu0 %v9477_v15  ;;  %v9210_v15 = vcombine.high %v2490_v53, %v2498_v8  ;;  %v2594_v53 = vld [vmem:[#allocation17 + $0x460] sm:$0xff]  ;;  %v2585_v8 = vld [vmem:[#allocation17 + $0x418] sm:$0xff] }
0x10aa   : > { %4978 = vmatpush1.bf16.msra.mxu1 %v9475_v16  ;;  %5065 = vmatprep.subr.bf16.mxu0 %v9494_v19  ;;  %v9208_v16 = vcombine.high %v2489_v10, %v2497_v22  ;;  %v2506_v19 = vld [vmem:[#allocation17 + $0x1a0] sm:$0xff]  ;;  %v9287_v22 = vcombine.low %v2569_v12, %v2577_v5 }
0x10ab   : > { %4979 = vmatprep.subr.bf16.mxu1 %v9492_v20  ;;  %v2514_v20 = vld [vmem:[#allocation17 + $0x1e0] sm:$0xff] }
0x10ac   : > { %v9225_v4 = vcombine.low %v2506_v19, %v2514_v20 }
0x10ad   : > { %5066 = vmatpush1.bf16.msra.mxu0 %v9493_v32  ;;  %v9226_v32 = vcombine.high %v2506_v19, %v2514_v20  ;;  %v2601_v19 = vld [vmem:[#allocation17 + $0x498] sm:$0xff] }
0x10ae   : > { %4980 = vmatpush1.bf16.msra.mxu1 %v9491_v31  ;;  %5067 = vmatprep.subr.bf16.mxu0 %v9510_v42  ;;  %v9224_v31 = vcombine.high %v2505_v21, %v2513_v23  ;;  %v2522_v42 = vld [vmem:[#allocation17 + $0x220] sm:$0xff]  ;;  %v2609_v20 = vld [vmem:[#allocation17 + $0x4d8] sm:$0xff] }
0x10af   : > { %4981 = vmatprep.subr.bf16.mxu1 %v9508_v48  ;;  %v2530_v48 = vld [vmem:[#allocation17 + $0x260] sm:$0xff] }
0x10b0   : > { %v9241_v24 = vcombine.low %v2522_v42, %v2530_v48 }
0x10b1   : > { %5068 = vmatpush1.bf16.msra.mxu0 %v9509_v37  ;;  %v9242_v37 = vcombine.high %v2522_v42, %v2530_v48  ;;  %v2617_v42 = vld [vmem:[#allocation17 + $0x518] sm:$0xff] }
0x10b2   : > { %4982 = vmatpush1.bf16.msra.mxu1 %v9507_v62  ;;  %5069 = vmatprep.subr.bf16.mxu0 %v9526_v11  ;;  %v9240_v62 = vcombine.high %v2521_v27, %v2529_v3  ;;  %v2538_v11 = vld [vmem:[#allocation17 + $0x2a0] sm:$0xff]  ;;  %v2625_v48 = vld [vmem:[#allocation17 + $0x558] sm:$0xff]  ;;  %v9319_v3 = vcombine.low %v2601_v19, %v2609_v20 }
0x10b3   : > { %4983 = vmatprep.subr.bf16.mxu1 %v9524_v54  ;;  %v2546_v54 = vld [vmem:[#allocation17 + $0x2e0] sm:$0xff] }
0x10b4   : > { %v9257_v29 = vcombine.low %v2538_v11, %v2546_v54 }
0x10b5   : > { %5070 = vmatpush1.bf16.msra.mxu0 %v9525_v58  ;;  %v9258_v58 = vcombine.high %v2538_v11, %v2546_v54  ;;  %v2633_v11 = vld [vmem:[#allocation17 + $0x598] sm:$0xff] }
0x10b6   : > { %4984 = vmatpush1.bf16.msra.mxu1 %v9523_v59  ;;  %5071 = vmatprep.subr.bf16.mxu0 %v9542_v60  ;;  %v9256_v59 = vcombine.high %v2537_v55, %v2545_v56  ;;  %v2554_v60 = vld [vmem:[#allocation17 + $0x320] sm:$0xff]  ;;  %v2641_v54 = vld [vmem:[#allocation17 + $0x5d8] sm:$0xff]  ;;  %v9335_v56 = vcombine.low %v2617_v42, %v2625_v48 }
0x10b7   : > { %4985 = vmatprep.subr.bf16.mxu1 %v9540_v61  ;;  %v2562_v61 = vld [vmem:[#allocation17 + $0x360] sm:$0xff] }
0x10b9   : > { %5072 = vmatpush1.bf16.msra.mxu0 %v9541_v28  ;;  %v9274_v28 = vcombine.high %v2554_v60, %v2562_v61 }
0x10ba   : > { %4986 = vmatpush1.bf16.msra.mxu1 %v9539_v38  ;;  %5186 = vmatprep.subr.bf16.mxu0 %v9178_v2  ;;  %v9272_v38 = vcombine.high %v2553_v63, %v2561_v0  ;;  %v2570_v2 = vld [vmem:[#allocation17 + $0x3a0] sm:$0xff]  ;;  %v9351_v0 = vcombine.low %v2633_v11, %v2641_v54 }
0x10bb   : > { %5100 = vmatprep.subr.bf16.mxu1 %v9176_v36  ;;  %v2578_v36 = vld [vmem:[#allocation17 + $0x3e0] sm:$0xff] }
0x10bc   : > { %5090 = vmatmul.mubr.bf16.vlgmr.msra.gmra.mrb[20].mxu0 %v12723_v50  ;;  %v9290_v39 = vcombine.high %v2570_v2, %v2578_v36  ;;  %v9289_v10 = vcombine.low %v2570_v2, %v2578_v36  ;;  %v2665_v2 = vld [vmem:[#allocation17 + $0x698] sm:$0xff] }
0x10bd   : > { %5004 = vmatmul.mubr.bf16.vlgmr.msra.gmra.mrb[68].mxu1 %v12723_v50  ;;  %5187 = vmatpush1.bf16.msra.mxu0 %v9177_v40  ;;  %v9273_v40 = vcombine.low %v2554_v60, %v2562_v61  ;;  %v2649_v60 = vld [vmem:[#allocation17 + $0x618] sm:$0xff] }
0x10be   : > { %5218 = vmatprep.mubr.bf16.mxu0 %v12721_v43  ;;  %5101 = vmatpush1.bf16.msra.mxu1 %v9175_v7  ;;  %v9288_v7 = vcombine.high %v2569_v12, %v2577_v5  ;;  %v2657_v61 = vld [vmem:[#allocation17 + $0x658] sm:$0xff] }
0x10bf   : > { %5132 = vmatprep.mubr.bf16.mxu1 %v12721_v43  ;;  %5188 = vmatprep.subr.bf16.mxu0 %v9194_v13  ;;  %v2586_v13 = vld [vmem:[#allocation17 + $0x420] sm:$0xff]  ;;  %v2673_v36 = vld [vmem:[#allocation17 + $0x6d8] sm:$0xff]  ;;  %v9367_v5 = vcombine.low %v2649_v60, %v2657_v61 }
0x10c0   : > { %5102 = vmatprep.subr.bf16.mxu1 %v9192_v9  ;;  %v2593_v9 = vld [vmem:[#allocation17 + $0x458] sm:$0xff]  ;;  %v9305_v21 = vcombine.low %v2586_v13, %v2594_v53 }
0x10c1   : > { %5189 = vmatpush1.bf16.msra.mxu0 %v9193_v41  ;;  %v9306_v41 = vcombine.high %v2586_v13, %v2594_v53  ;;  %v9303_v23 = vcombine.low %v2585_v8, %v2593_v9  ;;  %v2681_v13 = vld [vmem:[#allocation17 + $0x718] sm:$0xff] }
0x10c2   : > { %5103 = vmatpush1.bf16.msra.mxu1 %v9191_v51  ;;  %5190 = vmatprep.subr.bf16.mxu0 %v9210_v15  ;;  %v9304_v51 = vcombine.high %v2585_v8, %v2593_v9  ;;  %v2602_v15 = vld [vmem:[#allocation17 + $0x4a0] sm:$0xff]  ;;  %v2689_v53 = vld [vmem:[#allocation17 + $0x758] sm:$0xff]  ;;  %v9383_v9 = vcombine.low %v2665_v2, %v2673_v36 }
0x10c3   : > { %5104 = vmatprep.subr.bf16.mxu1 %v9208_v16  ;;  %v2610_v16 = vld [vmem:[#allocation17 + $0x4e0] sm:$0xff] }
0x10c4   : > { %v9321_v27 = vcombine.low %v2602_v15, %v2610_v16 }
0x10c5   : > { %5191 = vmatpush1.bf16.msra.mxu0 %v9209_v26  ;;  %v9322_v26 = vcombine.high %v2602_v15, %v2610_v16  ;;  %v2697_v15 = vld [vmem:[#allocation17 + $0x798] sm:$0xff] }
0x10c6   : > { %5105 = vmatpush1.bf16.msra.mxu1 %v9207_v34  ;;  %5192 = vmatprep.subr.bf16.mxu0 %v9226_v32  ;;  %v9320_v34 = vcombine.high %v2601_v19, %v2609_v20  ;;  %v2618_v32 = vld [vmem:[#allocation17 + $0x520] sm:$0xff]  ;;  %v2705_v16 = vld [vmem:[#allocation17 + $0x7d8] sm:$0xff]  ;;  %v9399_v20 = vcombine.low %v2681_v13, %v2689_v53 }
0x10c7   : > { %5106 = vmatprep.subr.bf16.mxu1 %v9224_v31  ;;  %v2626_v31 = vld [vmem:[#allocation17 + $0x560] sm:$0xff] }
0x10c8   : > { %v9337_v55 = vcombine.low %v2618_v32, %v2626_v31 }
0x10c9   : > { %5193 = vmatpush1.bf16.msra.mxu0 %v9225_v4  ;;  %v9338_v4 = vcombine.high %v2618_v32, %v2626_v31  ;;  %v2713_v32 = vld [vmem:[#allocation17 + $0x818] sm:$0xff] }
0x10ca   : > { %5107 = vmatpush1.bf16.msra.mxu1 %v9223_v49  ;;  %5194 = vmatprep.subr.bf16.mxu0 %v9242_v37  ;;  %v9336_v49 = vcombine.high %v2617_v42, %v2625_v48  ;;  %v2634_v37 = vld [vmem:[#allocation17 + $0x5a0] sm:$0xff]  ;;  %v2721_v31 = vld [vmem:[#allocation17 + $0x858] sm:$0xff]  ;;  %v9415_v48 = vcombine.low %v2697_v15, %v2705_v16 }
0x10cb   : > { %5108 = vmatprep.subr.bf16.mxu1 %v9240_v62  ;;  %v2642_v62 = vld [vmem:[#allocation17 + $0x5e0] sm:$0xff] }
0x10cc   : > { %v9353_v63 = vcombine.low %v2634_v37, %v2642_v62 }
0x10cd   : > { %5195 = vmatpush1.bf16.msra.mxu0 %v9241_v24  ;;  %v9354_v24 = vcombine.high %v2634_v37, %v2642_v62  ;;  %v2729_v37 = vld [vmem:[#allocation17 + $0x898] sm:$0xff] }
0x10ce   : > { %5109 = vmatpush1.bf16.msra.mxu1 %v9239_v57  ;;  %5196 = vmatprep.subr.bf16.mxu0 %v9258_v58  ;;  %v9352_v57 = vcombine.high %v2633_v11, %v2641_v54  ;;  %v2650_v58 = vld [vmem:[#allocation17 + $0x620] sm:$0xff]  ;;  %v2737_v62 = vld [vmem:[#allocation17 + $0x8d8] sm:$0xff]  ;;  %v9431_v54 = vcombine.low %v2713_v32, %v2721_v31 }
0x10cf   : > { %5110 = vmatprep.subr.bf16.mxu1 %v9256_v59  ;;  %v2658_v59 = vld [vmem:[#allocation17 + $0x660] sm:$0xff] }
0x10d0   : > { %v9369_v12 = vcombine.low %v2650_v58, %v2658_v59 }
0x10d1   : > { %5197 = vmatpush1.bf16.msra.mxu0 %v9257_v29  ;;  %v9370_v29 = vcombine.high %v2650_v58, %v2658_v59  ;;  %v2745_v58 = vld [vmem:[#allocation17 + $0x918] sm:$0xff] }
0x10d2   : > { %5111 = vmatpush1.bf16.msra.mxu1 %v9255_v1  ;;  %5198 = vmatprep.subr.bf16.mxu0 %v9274_v28  ;;  %v9368_v1 = vcombine.high %v2649_v60, %v2657_v61  ;;  %v2666_v28 = vld [vmem:[#allocation17 + $0x6a0] sm:$0xff]  ;;  %v2753_v59 = vld [vmem:[#allocation17 + $0x958] sm:$0xff]  ;;  %v9447_v61 = vcombine.low %v2729_v37, %v2737_v62 }
0x10d3   : > { %5112 = vmatprep.subr.bf16.mxu1 %v9272_v38  ;;  %v2674_v38 = vld [vmem:[#allocation17 + $0x6e0] sm:$0xff] }
0x10d4   : > { %v9385_v8 = vcombine.low %v2666_v28, %v2674_v38 }
0x10d5   : > { %5199 = vmatpush1.bf16.msra.mxu0 %v9273_v40  ;;  %v9386_v40 = vcombine.high %v2666_v28, %v2674_v38  ;;  %v2761_v28 = vld [vmem:[#allocation17 + $0x998] sm:$0xff] }
0x10d6   : > { %5113 = vmatpush1.bf16.msra.mxu1 %v9271_v6  ;;  %5200 = vmatprep.subr.bf16.mxu0 %v9290_v39  ;;  %v9384_v6 = vcombine.high %v2665_v2, %v2673_v36  ;;  %v2682_v39 = vld [vmem:[#allocation17 + $0x720] sm:$0xff]  ;;  %v2769_v38 = vld [vmem:[#allocation17 + $0x9d8] sm:$0xff]  ;;  %v9463_v36 = vcombine.low %v2745_v58, %v2753_v59 }
0x10d7   : > { %5114 = vmatprep.subr.bf16.mxu1 %v9288_v7  ;;  %v2690_v7 = vld [vmem:[#allocation17 + $0x760] sm:$0xff] }
0x10d8   : > { %v9401_v19 = vcombine.low %v2682_v39, %v2690_v7 }
0x10d9   : > { %5201 = vmatpush1.bf16.msra.mxu0 %v9289_v10  ;;  %v9402_v10 = vcombine.high %v2682_v39, %v2690_v7  ;;  %v2777_v39 = vld [vmem:[#allocation17 + $0xa18] sm:$0xff] }
0x10da   : > { %5115 = vmatpush1.bf16.msra.mxu1 %v9287_v22  ;;  %5202 = vmatprep.subr.bf16.mxu0 %v9306_v41  ;;  %v9400_v22 = vcombine.high %v2681_v13, %v2689_v53  ;;  %v2698_v41 = vld [vmem:[#allocation17 + $0x7a0] sm:$0xff]  ;;  %v2785_v7 = vld [vmem:[#allocation17 + $0xa58] sm:$0xff]  ;;  %v9479_v53 = vcombine.low %v2761_v28, %v2769_v38 }
0x10db   : > { %5116 = vmatprep.subr.bf16.mxu1 %v9304_v51  ;;  %v2706_v51 = vld [vmem:[#allocation17 + $0x7e0] sm:$0xff] }
0x10dc   : > { %v9417_v42 = vcombine.low %v2698_v41, %v2706_v51 }
0x10dd   : > { %5203 = vmatpush1.bf16.msra.mxu0 %v9305_v21  ;;  %v9418_v21 = vcombine.high %v2698_v41, %v2706_v51  ;;  %v2793_v41 = vld [vmem:[#allocation17 + $0xa98] sm:$0xff] }
0x10de   : > { %5117 = vmatpush1.bf16.msra.mxu1 %v9303_v23  ;;  %5204 = vmatprep.subr.bf16.mxu0 %v9322_v26  ;;  %v9416_v23 = vcombine.high %v2697_v15, %v2705_v16  ;;  %v2714_v26 = vld [vmem:[#allocation17 + $0x820] sm:$0xff]  ;;  %v2801_v51 = vld [vmem:[#allocation17 + $0xad8] sm:$0xff]  ;;  %v9495_v16 = vcombine.low %v2777_v39, %v2785_v7 }
0x10df   : > { %5118 = vmatprep.subr.bf16.mxu1 %v9320_v34  ;;  %v2722_v34 = vld [vmem:[#allocation17 + $0x860] sm:$0xff] }
0x10e0   : > { %v9433_v11 = vcombine.low %v2714_v26, %v2722_v34 }
0x10e1   : > { %5205 = vmatpush1.bf16.msra.mxu0 %v9321_v27  ;;  %v9434_v27 = vcombine.high %v2714_v26, %v2722_v34  ;;  %v2809_v26 = vld [vmem:[#allocation17 + $0xb18] sm:$0xff] }
0x10e2   : > { %5119 = vmatpush1.bf16.msra.mxu1 %v9319_v3  ;;  %5206 = vmatprep.subr.bf16.mxu0 %v9338_v4  ;;  %v9432_v3 = vcombine.high %v2713_v32, %v2721_v31  ;;  %v2730_v4 = vld [vmem:[#allocation17 + $0x8a0] sm:$0xff]  ;;  %v2817_v34 = vld [vmem:[#allocation17 + $0xb58] sm:$0xff]  ;;  %v9511_v31 = vcombine.low %v2793_v41, %v2801_v51 }
0x10e3   : > { %5120 = vmatprep.subr.bf16.mxu1 %v9336_v49  ;;  %v2738_v49 = vld [vmem:[#allocation17 + $0x8e0] sm:$0xff] }
0x10e4   : > { %v9449_v60 = vcombine.low %v2730_v4, %v2738_v49 }
0x10e5   : > { %5207 = vmatpush1.bf16.msra.mxu0 %v9337_v55  ;;  %v9450_v55 = vcombine.high %v2730_v4, %v2738_v49  ;;  %v2825_v4 = vld [vmem:[#allocation17 + $0xb98] sm:$0xff] }
0x10e6   : > { %5121 = vmatpush1.bf16.msra.mxu1 %v9335_v56  ;;  %5208 = vmatprep.subr.bf16.mxu0 %v9354_v24  ;;  %v9448_v56 = vcombine.high %v2729_v37, %v2737_v62  ;;  %v2746_v24 = vld [vmem:[#allocation17 + $0x920] sm:$0xff]  ;;  %v2833_v49 = vld [vmem:[#allocation17 + $0xbd8] sm:$0xff]  ;;  %v9527_v62 = vcombine.low %v2809_v26, %v2817_v34 }
0x10e7   : > { %5122 = vmatprep.subr.bf16.mxu1 %v9352_v57  ;;  %v2754_v57 = vld [vmem:[#allocation17 + $0x960] sm:$0xff] }
0x10e8   : > { %v9465_v2 = vcombine.low %v2746_v24, %v2754_v57 }
0x10e9   : > { %5209 = vmatpush1.bf16.msra.mxu0 %v9353_v63  ;;  %v9466_v63 = vcombine.high %v2746_v24, %v2754_v57  ;;  %v2459_v24 = vld [vmem:[#allocation17 + $0x28] sm:$0xff] }
0x10ea   : > { %5123 = vmatpush1.bf16.msra.mxu1 %v9351_v0  ;;  %5210 = vmatprep.subr.bf16.mxu0 %v9370_v29  ;;  %v9464_v0 = vcombine.high %v2745_v58, %v2753_v59  ;;  %v2762_v29 = vld [vmem:[#allocation17 + $0x9a0] sm:$0xff]  ;;  %v2467_v57 = vld [vmem:[#allocation17 + $0x68] sm:$0xff]  ;;  %v9543_v59 = vcombine.low %v2825_v4, %v2833_v49 }
0x10eb   : > { %5124 = vmatprep.subr.bf16.mxu1 %v9368_v1  ;;  %v2770_v1 = vld [vmem:[#allocation17 + $0x9e0] sm:$0xff] }
0x10ec   : > { %v9481_v13 = vcombine.low %v2762_v29, %v2770_v1 }
0x10ed   : > { %5211 = vmatpush1.bf16.msra.mxu0 %v9369_v12  ;;  %v9482_v12 = vcombine.high %v2762_v29, %v2770_v1  ;;  %v2475_v1 = vld [vmem:[#allocation17 + $0xa8] sm:$0xff] }
0x10ee   : > { %5125 = vmatpush1.bf16.msra.mxu1 %v9367_v5  ;;  %5212 = vmatprep.subr.bf16.mxu0 %v9386_v40  ;;  %v9480_v5 = vcombine.high %v2761_v28, %v2769_v38  ;;  %v2778_v40 = vld [vmem:[#allocation17 + $0xa20] sm:$0xff]  ;;  %v2483_v28 = vld [vmem:[#allocation17 + $0xe8] sm:$0xff]  ;;  %v9179_v38 = vcombine.low %v2459_v24, %v2467_v57 }
0x10ef   : > { %5126 = vmatprep.subr.bf16.mxu1 %v9384_v6  ;;  %v2786_v6 = vld [vmem:[#allocation17 + $0xa60] sm:$0xff] }
0x10f0   : > { %v9497_v15 = vcombine.low %v2778_v40, %v2786_v6 }
0x10f1   : > { %5213 = vmatpush1.bf16.msra.mxu0 %v9385_v8  ;;  %v9498_v8 = vcombine.high %v2778_v40, %v2786_v6  ;;  %v2491_v40 = vld [vmem:[#allocation17 + $0x128] sm:$0xff] }
0x10f2   : > { %5127 = vmatpush1.bf16.msra.mxu1 %v9383_v9  ;;  %5214 = vmatprep.subr.bf16.mxu0 %v9402_v10  ;;  %v9496_v9 = vcombine.high %v2777_v39, %v2785_v7  ;;  %v2794_v10 = vld [vmem:[#allocation17 + $0xaa0] sm:$0xff]  ;;  %v2499_v6 = vld [vmem:[#allocation17 + $0x168] sm:$0xff]  ;;  %v9195_v7 = vcombine.low %v2475_v1, %v2483_v28 }
0x10f3   : > { %5128 = vmatprep.subr.bf16.mxu1 %v9400_v22  ;;  %v2802_v22 = vld [vmem:[#allocation17 + $0xae0] sm:$0xff] }
0x10f4   : > { %v9513_v32 = vcombine.low %v2794_v10, %v2802_v22 }
0x10f5   : > { %5215 = vmatpush1.bf16.msra.mxu0 %v9401_v19  ;;  %v9514_v19 = vcombine.high %v2794_v10, %v2802_v22  ;;  %v2507_v10 = vld [vmem:[#allocation17 + $0x1a8] sm:$0xff] }
0x10f6   : > { %5129 = vmatpush1.bf16.msra.mxu1 %v9399_v20  ;;  %5216 = vmatprep.subr.bf16.mxu0 %v9418_v21  ;;  %v9512_v20 = vcombine.high %v2793_v41, %v2801_v51  ;;  %v2810_v21 = vld [vmem:[#allocation17 + $0xb20] sm:$0xff]  ;;  %v2515_v22 = vld [vmem:[#allocation17 + $0x1e8] sm:$0xff]  ;;  %v9211_v51 = vcombine.low %v2491_v40, %v2499_v6 }
0x10f7   : > { %5130 = vmatprep.subr.bf16.mxu1 %v9416_v23  ;;  %v2818_v23 = vld [vmem:[#allocation17 + $0xb60] sm:$0xff] }
0x10f8   : > { %v9529_v37 = vcombine.low %v2810_v21, %v2818_v23 }
0x10f9   : > { %5217 = vmatpush1.bf16.msra.mxu0 %v9417_v42  ;;  %v9530_v42 = vcombine.high %v2810_v21, %v2818_v23  ;;  %v2523_v21 = vld [vmem:[#allocation17 + $0x228] sm:$0xff] }
0x10fa   : > { %5131 = vmatpush1.bf16.msra.mxu1 %v9415_v48  ;;  %5229 = vmatprep.subr.bf16.mxu0 %v9434_v27  ;;  %v9528_v48 = vcombine.high %v2809_v26, %v2817_v34  ;;  %v2826_v27 = vld [vmem:[#allocation17 + $0xba0] sm:$0xff]  ;;  %v2531_v23 = vld [vmem:[#allocation17 + $0x268] sm:$0xff]  ;;  %v9227_v34 = vcombine.low %v2507_v10, %v2515_v22 }
0x10fb   : > { %5143 = vmatprep.subr.bf16.mxu1 %v9432_v3  ;;  %v2834_v3 = vld [vmem:[#allocation17 + $0xbe0] sm:$0xff] }
0x10fc   : > { %5219 = vmatmul.mubr.bf16.vlgmr.msra.gmra.mrb[24].mxu0 %v12725_v14  ;;  %v9545_v58 = vcombine.low %v2826_v27, %v2834_v3 }
0x10fd   : > { %5133 = vmatmul.mubr.bf16.vlgmr.msra.gmra.mrb[72].mxu1 %v12725_v14  ;;  %5230 = vmatpush1.bf16.msra.mxu0 %v9433_v11  ;;  %v9546_v11 = vcombine.high %v2826_v27, %v2834_v3  ;;  %v2539_v27 = vld [vmem:[#allocation17 + $0x2a8] sm:$0xff] }
0x10fe   : > { %5144 = vmatpush1.bf16.msra.mxu1 %v9431_v54  ;;  %5231 = vmatprep.subr.bf16.mxu0 %v9450_v55  ;;  %v9544_v54 = vcombine.high %v2825_v4, %v2833_v49  ;;  %v2460_v55 = vld [vmem:[#allocation17 + $0x30] sm:$0xff]  ;;  %v2547_v3 = vld [vmem:[#allocation17 + $0x2e8] sm:$0xff]  ;;  %v9243_v49 = vcombine.low %v2523_v21, %v2531_v23 }
0x10ff   : > { %5145 = vmatprep.subr.bf16.mxu1 %v9448_v56  ;;  %5261 = vmatprep.mubr.bf16.mxu0 %v11713_v17  ;;  %v2468_v56 = vld [vmem:[#allocation17 + $0x70] sm:$0xff] }
0x1100   : > { %5175 = vmatprep.mubr.bf16.mxu1 %v11713_v17  ;;  %v9181_v29 = vcombine.low %v2460_v55, %v2468_v56 }
0x1101   : > { %5232 = vmatpush1.bf16.msra.mxu0 %v9449_v60  ;;  %v9182_v60 = vcombine.high %v2460_v55, %v2468_v56  ;;  %v2564_v55 = vld [vmem:[#allocation17 + $0x370] sm:$0xff]  ;;  %v2555_v56 = vld [vmem:[#allocation17 + $0x328] sm:$0xff] }
0x1102   : > { %5146 = vmatpush1.bf16.msra.mxu1 %v9447_v61  ;;  %5233 = vmatprep.subr.bf16.mxu0 %v9466_v63  ;;  %v9180_v61 = vcombine.high %v2459_v24, %v2467_v57  ;;  %v2476_v63 = vld [vmem:[#allocation17 + $0xb0] sm:$0xff]  ;;  %v2563_v24 = vld [vmem:[#allocation17 + $0x368] sm:$0xff] }
0x1103   : > { %5147 = vmatprep.subr.bf16.mxu1 %v9464_v0  ;;  %v2484_v0 = vld [vmem:[#allocation17 + $0xf0] sm:$0xff] }
0x1104   : > { %v9197_v39 = vcombine.low %v2476_v63, %v2484_v0 }
0x1105   : > { %5234 = vmatpush1.bf16.msra.mxu0 %v9465_v2  ;;  %v9198_v2 = vcombine.high %v2476_v63, %v2484_v0  ;;  %v9276_v0 = vcombine.high %v2555_v56, %v2563_v24 }
0x1106   : > { %5148 = vmatpush1.bf16.msra.mxu1 %v9463_v36  ;;  %5235 = vmatprep.subr.bf16.mxu0 %v9482_v12  ;;  %v2492_v36 = vld [vmem:[#allocation17 + $0x130] sm:$0xff] }
0x1107   : > { %5149 = vmatprep.subr.bf16.mxu1 %v9480_v5  ;;  %v2500_v12 = vld [vmem:[#allocation17 + $0x170] sm:$0xff]  ;;  %v9196_v5 = vcombine.high %v2475_v1, %v2483_v28 }
0x1108   : > { %v9213_v41 = vcombine.low %v2492_v36, %v2500_v12  ;;  %v2580_v1 = vld [vmem:[#allocation17 + $0x3f0] sm:$0xff] }
0x1109   : > { %5236 = vmatpush1.bf16.msra.mxu0 %v9481_v13  ;;  %v9214_v13 = vcombine.high %v2492_v36, %v2500_v12  ;;  %v2579_v36 = vld [vmem:[#allocation17 + $0x3e8] sm:$0xff] }
0x110a   : > { %5150 = vmatpush1.bf16.msra.mxu1 %v9479_v53  ;;  %5237 = vmatprep.subr.bf16.mxu0 %v9498_v8  ;;  %v9212_v53 = vcombine.high %v2491_v40, %v2499_v6  ;;  %v2508_v8 = vld [vmem:[#allocation17 + $0x1b0] sm:$0xff] }
0x110b   : > { %5151 = vmatprep.subr.bf16.mxu1 %v9496_v9  ;;  %v2516_v9 = vld [vmem:[#allocation17 + $0x1f0] sm:$0xff] }
0x110c   : > { %v9229_v26 = vcombine.low %v2508_v8, %v2516_v9 }
0x110d   : > { %5238 = vmatpush1.bf16.msra.mxu0 %v9497_v15  ;;  %v9230_v15 = vcombine.high %v2508_v8, %v2516_v9 }
0x110e   : > { %5152 = vmatpush1.bf16.msra.mxu1 %v9495_v16  ;;  %5239 = vmatprep.subr.bf16.mxu0 %v9514_v19  ;;  %v9228_v16 = vcombine.high %v2507_v10, %v2515_v22  ;;  %v2524_v19 = vld [vmem:[#allocation17 + $0x230] sm:$0xff] }
0x110f   : > { %5153 = vmatprep.subr.bf16.mxu1 %v9512_v20  ;;  %v2532_v20 = vld [vmem:[#allocation17 + $0x270] sm:$0xff] }
0x1110   : > { %v9245_v4 = vcombine.low %v2524_v19, %v2532_v20 }
0x1111   : > { %5240 = vmatpush1.bf16.msra.mxu0 %v9513_v32  ;;  %v9246_v32 = vcombine.high %v2524_v19, %v2532_v20  ;;  %v2587_v20 = vld [vmem:[#allocation17 + $0x428] sm:$0xff] }
0x1112   : > { %5154 = vmatpush1.bf16.msra.mxu1 %v9511_v31  ;;  %5241 = vmatprep.subr.bf16.mxu0 %v9530_v42  ;;  %v9244_v31 = vcombine.high %v2523_v21, %v2531_v23  ;;  %v2540_v42 = vld [vmem:[#allocation17 + $0x2b0] sm:$0xff]  ;;  %v2595_v21 = vld [vmem:[#allocation17 + $0x468] sm:$0xff] }
0x1113   : > { %5155 = vmatprep.subr.bf16.mxu1 %v9528_v48  ;;  %v2548_v48 = vld [vmem:[#allocation17 + $0x2f0] sm:$0xff] }
0x1114   : > { %v9261_v57 = vcombine.low %v2540_v42, %v2548_v48 }
0x1115   : > { %5242 = vmatpush1.bf16.msra.mxu0 %v9529_v37  ;;  %v9262_v37 = vcombine.high %v2540_v42, %v2548_v48 }
0x1116   : > { %5156 = vmatpush1.bf16.msra.mxu1 %v9527_v62  ;;  %5243 = vmatprep.subr.bf16.mxu0 %v9546_v11  ;;  %v12754_v62 = vld [vmem:[#allocation19] sm:$0xff]  ;;  %v9260_v11 = vcombine.high %v2539_v27, %v2547_v3 }
0x1117   : > { %5157 = vmatprep.subr.bf16.mxu1 %v9544_v54  ;;  %v2556_v54 = vld [vmem:[#allocation17 + $0x330] sm:$0xff] }
0x1118   : > { %v9277_v6 = vcombine.low %v2556_v54, %v2564_v55 }
0x1119   : > { %5244 = vmatpush1.bf16.msra.mxu0 %v9545_v58  ;;  %v2845_v58 = vrot.slane %v12754_v62, %v12426_v47 }
0x111a   : > { %5158 = vmatpush1.bf16.msra.mxu1 %v9543_v59  ;;  %5358 = vmatprep.subr.bf16.mxu0 %v9182_v60  ;;  %v9259_v59 = vcombine.low %v2539_v27, %v2547_v3  ;;  %v2849_v60 = vrot.slane %v12754_v62, %v12423_v46  ;;  %v9308_v27 = vcombine.high %v2587_v20, %v2595_v21  ;;  %v2604_v3 = vld [vmem:[#allocation17 + $0x4b0] sm:$0xff] }
0x111b   : > { %5272 = vmatprep.subr.bf16.mxu1 %v9180_v61  ;;  %v9278_v61 = vcombine.high %v2556_v54, %v2564_v55  ;;  %v2611_v54 = vld [vmem:[#allocation17 + $0x4e8] sm:$0xff] }
0x111c   : > { %5262 = vmatmul.mubr.bf16.vlgmr.msra.gmra.mrb[24].mxu0 %v12723_v50 }
0x111d   : > { %5176 = vmatmul.mubr.bf16.vlgmr.msra.gmra.mrb[72].mxu1 %v12723_v50  ;;  %5359 = vmatpush1.bf16.msra.mxu0 %v9181_v29  ;;  %v2572_v29 = vld [vmem:[#allocation17 + $0x3b0] sm:$0xff] }
0x111e   : > { %5390 = vmatprep.mubr.bf16.mxu0 %v12721_v43  ;;  %5273 = vmatpush1.bf16.msra.mxu1 %v9179_v38  ;;  %v9294_v8 = vcombine.high %v2572_v29, %v2580_v1 }
0x111f   : > { %5304 = vmatprep.mubr.bf16.mxu1 %v12721_v43  ;;  %5360 = vmatprep.subr.bf16.mxu0 %v9198_v2  ;;  %v2571_v2 = vld [vmem:[#allocation17 + $0x3a8] sm:$0xff] }
0x1120   : > { %5274 = vmatprep.subr.bf16.mxu1 %v9196_v5 }
0x1121   : > { %5361 = vmatpush1.bf16.msra.mxu0 %v9197_v39 }
0x1122   : > { %5275 = vmatpush1.bf16.msra.mxu1 %v9195_v7  ;;  %5362 = vmatprep.subr.bf16.mxu0 %v9214_v13 }
0x1123   : > { %5276 = vmatprep.subr.bf16.mxu1 %v9212_v53  ;;  %v9275_v53 = vcombine.low %v2555_v56, %v2563_v24  ;;  %v9307_v24 = vcombine.low %v2587_v20, %v2595_v21  ;;  %v2675_v20 = vld [vmem:[#allocation17 + $0x6e8] sm:$0xff] }
0x1125   : > { %5363 = vmatpush1.bf16.msra.mxu0 %v9213_v41  ;;  %v9292_v41 = vcombine.high %v2571_v2, %v2579_v36 }
0x1126   : > { %5277 = vmatpush1.bf16.msra.mxu1 %v9211_v51  ;;  %5364 = vmatprep.subr.bf16.mxu0 %v9230_v15  ;;  %v2588_v51 = vld [vmem:[#allocation17 + $0x430] sm:$0xff] }
0x1127   : > { %5278 = vmatprep.subr.bf16.mxu1 %v9228_v16  ;;  %v2596_v15 = vld [vmem:[#allocation17 + $0x470] sm:$0xff] }
0x1128   : > { %v9309_v56 = vcombine.low %v2588_v51, %v2596_v15 }
0x1129   : > { %5365 = vmatpush1.bf16.msra.mxu0 %v9229_v26  ;;  %v9293_v26 = vcombine.low %v2572_v29, %v2580_v1 }
0x112a   : > { %5279 = vmatpush1.bf16.msra.mxu1 %v9227_v34  ;;  %5366 = vmatprep.subr.bf16.mxu0 %v9246_v32  ;;  %v9291_v32 = vcombine.low %v2571_v2, %v2579_v36  ;;  %v2636_v2 = vld [vmem:[#allocation17 + $0x5b0] sm:$0xff] }
0x112b   : > { %5280 = vmatprep.subr.bf16.mxu1 %v9244_v31  ;;  %v9310_v31 = vcombine.high %v2588_v51, %v2596_v15  ;;  %v2644_v36 = vld [vmem:[#allocation17 + $0x5f0] sm:$0xff] }
0x112c   : > { %v2668_v15 = vld [vmem:[#allocation17 + $0x6b0] sm:$0xff] }
0x112d   : > { %5367 = vmatpush1.bf16.msra.mxu0 %v9245_v4  ;;  %v2612_v4 = vld [vmem:[#allocation17 + $0x4f0] sm:$0xff] }
0x112e   : > { %5281 = vmatpush1.bf16.msra.mxu1 %v9243_v49  ;;  %5368 = vmatprep.subr.bf16.mxu0 %v9262_v37  ;;  %v9325_v29 = vcombine.low %v2604_v3, %v2612_v4 }
0x112f   : > { %v4919_v63 = vpop.f32.mrb[16].mxu0  ;;  %5282 = vmatprep.subr.bf16.mxu1 %v9260_v11  ;;  %v2603_v11 = vld [vmem:[#allocation17 + $0x4a8] sm:$0xff] }
0x1130   : > { %v4876_v28 = vpop.f32.mrb[64].mxu1  ;;  %v4921_v38 = vpop.f32.mrb[17].mxu0  ;;  %v9323_v1 = vcombine.low %v2603_v11, %v2611_v54 }
0x1131   : > { %v4877_v12 = vadd.f32 %v4876_v28, %v2845_v58  ;;  %5369 = vmatpush1.bf16.msra.mxu0 %v9261_v57  ;;  %v4878_v5 = vpop.f32.mrb[65].mxu1  ;;  %v4923_v40 = vpop.f32.mrb[18].mxu0  ;;  %v9326_v57 = vcombine.high %v2604_v3, %v2612_v4 }
0x1132   : > { %v4879_v39 = vadd.f32 %v4878_v5, %v2849_v60  ;;  %5283 = vmatpush1.bf16.msra.mxu1 %v9259_v59  ;;  %v4880_v7 = vpop.f32.mrb[66].mxu1  ;;  %v4925_v13 = vpop.f32.mrb[19].mxu0  ;;  %5370 = vmatprep.subr.bf16.mxu0 %v9278_v61  ;;  %v9324_v59 = vcombine.high %v2603_v11, %v2611_v54  ;;  %v2628_v61 = vld [vmem:[#allocation17 + $0x570] sm:$0xff]  ;;  %v2643_v5 = vld [vmem:[#allocation17 + $0x5e8] sm:$0xff] }
0x1133   : > { %v4920_v9 = vadd.f32 %v4919_v63, %v4877_v12  ;;  %v4881_v10 = vadd.f32 %v4880_v7, %v2845_v58  ;;  %v4882_v22 = vpop.f32.mrb[67].mxu1  ;;  %5284 = vmatprep.subr.bf16.mxu1 %v9276_v0  ;;  %v2619_v63 = vld [vmem:[#allocation17 + $0x528] sm:$0xff]  ;;  %v2708_v11 = vld [vmem:[#allocation17 + $0x7f0] sm:$0xff] }
0x1134   : > { %v4922_v16 = vadd.f32 %v4921_v38, %v4879_v39  ;;  %v4883_v19 = vadd.f32 %v4882_v22, %v2849_v60  ;;  %v2620_v60 = vld [vmem:[#allocation17 + $0x530] sm:$0xff]  ;;  %v2627_v0 = vld [vmem:[#allocation17 + $0x568] sm:$0xff]  ;;  %v9358_v39 = vcombine.high %v2636_v2, %v2644_v36 }
0x1135   : > { %v4924_v23 = vadd.f32 %v4923_v40, %v4881_v10  ;;  %5371 = vmatpush1.bf16.msra.mxu0 %v9277_v6  ;;  %v5530_v42 = vmax.f32 %v4920_v9, 0.0  ;;  %v9342_v28 = vcombine.high %v2620_v60, %v2628_v61  ;;  %v9340_v38 = vcombine.high %v2619_v63, %v2627_v0  ;;  %v2635_v12 = vld [vmem:[#allocation17 + $0x5a8] sm:$0xff] }
0x1136   : > { %v4926_v34 = vadd.f32 %v4925_v13, %v4883_v19  ;;  %5285 = vmatpush1.bf16.msra.mxu1 %v9275_v53  ;;  %5372 = vmatprep.subr.bf16.mxu0 %v9294_v8  ;;  %v5531_v49 = vmax.f32 %v4922_v16, 0.0  ;;  %v9341_v40 = vcombine.low %v2620_v60, %v2628_v61  ;;  %v9339_v6 = vcombine.low %v2619_v63, %v2627_v0  ;;  %v2652_v13 = vld [vmem:[#allocation17 + $0x630] sm:$0xff]  ;;  %v2651_v8 = vld [vmem:[#allocation17 + $0x628] sm:$0xff] }
0x1137   : > { %v5546_v48 = vmax.f32 %v4924_v23, 0.0  ;;  %5286 = vmatprep.subr.bf16.mxu1 %v9292_v41  ;;  %v9356_v7 = vcombine.high %v2635_v12, %v2643_v5  ;;  %v2660_v53 = vld [vmem:[#allocation17 + $0x670] sm:$0xff]  ;;  %v2659_v9 = vld [vmem:[#allocation17 + $0x668] sm:$0xff]  ;;  %v9357_v10 = vcombine.low %v2636_v2, %v2644_v36  ;;  %v9355_v22 = vcombine.low %v2635_v12, %v2643_v5 }
0x1138   : > { %v5547_v37 = vmax.f32 %v4926_v34, 0.0  ;;  %v9374_v41 = vcombine.high %v2652_v13, %v2660_v53  ;;  %v9372_v51 = vcombine.high %v2651_v8, %v2659_v9  ;;  %v2676_v16 = vld [vmem:[#allocation17 + $0x6f0] sm:$0xff]  ;;  %v2667_v19 = vld [vmem:[#allocation17 + $0x6a8] sm:$0xff]  ;;  %v9373_v21 = vcombine.low %v2652_v13, %v2660_v53 }
0x1139   : > { %v12760_v55 = vpack.c.bf16 %v5546_v48, %v5530_v42  ;;  %5373 = vmatpush1.bf16.msra.mxu0 %v9293_v26  ;;  %v9371_v23 = vcombine.low %v2651_v8, %v2659_v9  ;;  %v9390_v26 = vcombine.high %v2668_v15, %v2676_v16  ;;  %v9388_v34 = vcombine.high %v2667_v19, %v2675_v20  ;;  %v2683_v42 = vld [vmem:[#allocation17 + $0x728] sm:$0xff]  ;;  %v2716_v61 = vld [vmem:[#allocation17 + $0x830] sm:$0xff] }
0x113a   : > { %5287 = vmatpush1.bf16.msra.mxu1 %v9291_v32  ;;  %5374 = vmatprep.subr.bf16.mxu0 %v9310_v31  ;;  %v12762_v58 = vpack.c.bf16 %v5547_v37, %v5531_v49  ;;  %v2684_v32 = vld [vmem:[#allocation17 + $0x730] sm:$0xff]  ;;  %v2691_v48 = vld [vmem:[#allocation17 + $0x768] sm:$0xff]  ;;  %v9387_v3 = vcombine.low %v2667_v19, %v2675_v20 }
0x113b   : > { %5288 = vmatprep.subr.bf16.mxu1 %v9308_v27  ;;  %v2692_v31 = vld [vmem:[#allocation17 + $0x770] sm:$0xff]  ;;  %v9389_v27 = vcombine.low %v2668_v15, %v2676_v16  ;;  %v9404_v49 = vcombine.high %v2683_v42, %v2691_v48  ;;  %v2699_v54 = vld [vmem:[#allocation17 + $0x7a8] sm:$0xff] }
0x113c   : > { %v9406_v4 = vcombine.high %v2684_v32, %v2692_v31  ;;  %v2700_v37 = vld [vmem:[#allocation17 + $0x7b0] sm:$0xff]  ;;  %v2715_v0 = vld [vmem:[#allocation17 + $0x828] sm:$0xff] }
0x113d   : > { %5375 = vmatpush1.bf16.msra.mxu0 %v9309_v56  ;;  %v2707_v56 = vld [vmem:[#allocation17 + $0x7e8] sm:$0xff]  ;;  %v2724_v63 = vld [vmem:[#allocation17 + $0x870] sm:$0xff] }
0x113e   : > { %5289 = vmatpush1.bf16.msra.mxu1 %v9307_v24  ;;  %5376 = vmatprep.subr.bf16.mxu0 %v9326_v57  ;;  %v9405_v24 = vcombine.low %v2684_v32, %v2692_v31  ;;  %v9403_v57 = vcombine.low %v2683_v42, %v2691_v48  ;;  %v9420_v60 = vcombine.high %v2699_v54, %v2707_v56  ;;  %v2732_v36 = vld [vmem:[#allocation17 + $0x8b0] sm:$0xff]  ;;  %v2731_v5 = vld [vmem:[#allocation17 + $0x8a8] sm:$0xff] }
0x113f   : > { %5290 = vmatprep.subr.bf16.mxu1 %v9324_v59  ;;  %v9422_v59 = vcombine.high %v2700_v37, %v2708_v11  ;;  %v2740_v12 = vld [vmem:[#allocation17 + $0x8f0] sm:$0xff]  ;;  %v2747_v9 = vld [vmem:[#allocation17 + $0x928] sm:$0xff] }
0x1140   : > { %v2748_v53 = vld [vmem:[#allocation17 + $0x930] sm:$0xff]  ;;  %v2763_v20 = vld [vmem:[#allocation17 + $0x9a8] sm:$0xff] }
0x1141   : > { %5377 = vmatpush1.bf16.msra.mxu0 %v9325_v29  ;;  %v2723_v29 = vld [vmem:[#allocation17 + $0x868] sm:$0xff]  ;;  %v2756_v8 = vld [vmem:[#allocation17 + $0x970] sm:$0xff] }
0x1142   : > { %5291 = vmatpush1.bf16.msra.mxu1 %v9323_v1  ;;  %5378 = vmatprep.subr.bf16.mxu0 %v9342_v28  ;;  %v9421_v1 = vcombine.low %v2700_v37, %v2708_v11  ;;  %v9419_v28 = vcombine.low %v2699_v54, %v2707_v56  ;;  %v9436_v2 = vcombine.high %v2715_v0, %v2723_v29  ;;  %v2764_v16 = vld [vmem:[#allocation17 + $0x9b0] sm:$0xff]  ;;  %v2779_v48 = vld [vmem:[#allocation17 + $0xa28] sm:$0xff] }
0x1143   : > { %5292 = vmatprep.subr.bf16.mxu1 %v9340_v38  ;;  %v9438_v38 = vcombine.high %v2716_v61, %v2724_v63  ;;  %v2772_v19 = vld [vmem:[#allocation17 + $0x9f0] sm:$0xff]  ;;  %v2795_v56 = vld [vmem:[#allocation17 + $0xaa8] sm:$0xff] }
0x1144   : > { %v2780_v31 = vld [vmem:[#allocation17 + $0xa30] sm:$0xff] }
0x1145   : > { %5379 = vmatpush1.bf16.msra.mxu0 %v9341_v40  ;;  %v2739_v40 = vld [vmem:[#allocation17 + $0x8e8] sm:$0xff]  ;;  %v2788_v42 = vld [vmem:[#allocation17 + $0xa70] sm:$0xff] }
0x1146   : > { %5293 = vmatpush1.bf16.msra.mxu1 %v9339_v6  ;;  %5380 = vmatprep.subr.bf16.mxu0 %v9358_v39  ;;  %v9437_v6 = vcombine.low %v2716_v61, %v2724_v63  ;;  %v9435_v39 = vcombine.low %v2715_v0, %v2723_v29  ;;  %v9452_v13 = vcombine.high %v2731_v5, %v2739_v40  ;;  %v2796_v11 = vld [vmem:[#allocation17 + $0xab0] sm:$0xff]  ;;  %v2811_v29 = vld [vmem:[#allocation17 + $0xb28] sm:$0xff] }
0x1147   : > { %5294 = vmatprep.subr.bf16.mxu1 %v9356_v7  ;;  %v9454_v7 = vcombine.high %v2732_v36, %v2740_v12  ;;  %v2804_v54 = vld [vmem:[#allocation17 + $0xaf0] sm:$0xff] }
0x1148   : > { %v2812_v63 = vld [vmem:[#allocation17 + $0xb30] sm:$0xff] }
0x1149   : > { %5381 = vmatpush1.bf16.msra.mxu0 %v9357_v10  ;;  %v2755_v10 = vld [vmem:[#allocation17 + $0x968] sm:$0xff]  ;;  %v2820_v0 = vld [vmem:[#allocation17 + $0xb70] sm:$0xff] }
0x114a   : > { %5295 = vmatpush1.bf16.msra.mxu1 %v9355_v22  ;;  %5382 = vmatprep.subr.bf16.mxu0 %v9374_v41  ;;  %v9453_v22 = vcombine.low %v2732_v36, %v2740_v12  ;;  %v9451_v41 = vcombine.low %v2731_v5, %v2739_v40  ;;  %v9468_v15 = vcombine.high %v2747_v9, %v2755_v10  ;;  %v2828_v12 = vld [vmem:[#allocation17 + $0xbb0] sm:$0xff]  ;;  %v2827_v40 = vld [vmem:[#allocation17 + $0xba8] sm:$0xff] }
0x114b   : > { %5296 = vmatprep.subr.bf16.mxu1 %v9372_v51  ;;  %v9470_v51 = vcombine.high %v2748_v53, %v2756_v8  ;;  %v2836_v5 = vld [vmem:[#allocation17 + $0xbf0] sm:$0xff] }
0x114d   : > { %5383 = vmatpush1.bf16.msra.mxu0 %v9373_v21  ;;  %v2771_v21 = vld [vmem:[#allocation17 + $0x9e8] sm:$0xff] }
0x114e   : > { %5297 = vmatpush1.bf16.msra.mxu1 %v9371_v23  ;;  %5384 = vmatprep.subr.bf16.mxu0 %v9390_v26  ;;  %v9469_v23 = vcombine.low %v2748_v53, %v2756_v8  ;;  %v9467_v26 = vcombine.low %v2747_v9, %v2755_v10  ;;  %v9484_v32 = vcombine.high %v2763_v20, %v2771_v21  ;;  %v2461_v8 = vld [vmem:[#allocation17 + $0x38] sm:$0xff] }
0x114f   : > { %5298 = vmatprep.subr.bf16.mxu1 %v9388_v34  ;;  %v9486_v34 = vcombine.high %v2764_v16, %v2772_v19  ;;  %v2469_v9 = vld [vmem:[#allocation17 + $0x78] sm:$0xff]  ;;  %v9549_v10 = vcombine.low %v2828_v12, %v2836_v5 }
0x1151   : > { %5385 = vmatpush1.bf16.msra.mxu0 %v9389_v27  ;;  %v2787_v27 = vld [vmem:[#allocation17 + $0xa68] sm:$0xff] }
0x1152   : > { %5299 = vmatpush1.bf16.msra.mxu1 %v9387_v3  ;;  %5386 = vmatprep.subr.bf16.mxu0 %v9406_v4  ;;  %v9485_v3 = vcombine.low %v2764_v16, %v2772_v19  ;;  %v9483_v4 = vcombine.low %v2763_v20, %v2771_v21  ;;  %v9500_v37 = vcombine.high %v2779_v48, %v2787_v27  ;;  %v2477_v16 = vld [vmem:[#allocation17 + $0xb8] sm:$0xff] }
0x1153   : > { %5300 = vmatprep.subr.bf16.mxu1 %v9404_v49  ;;  %v9502_v49 = vcombine.high %v2780_v31, %v2788_v42  ;;  %v2485_v19 = vld [vmem:[#allocation17 + $0xf8] sm:$0xff]  ;;  %v9183_v20 = vcombine.low %v2461_v8, %v2469_v9 }
0x1154   : > { %v10666_v21 = vld [vmem:[#allocation20 + $0x1c] ss:$12 sps:$4 sm:$0xff]  }
0x1155   : > { %5387 = vmatpush1.bf16.msra.mxu0 %v9405_v24  ;;  %v2803_v24 = vld [vmem:[#allocation17 + $0xae8] sm:$0xff] }
0x1156   : > { %5301 = vmatpush1.bf16.msra.mxu1 %v9403_v57  ;;  %5388 = vmatprep.subr.bf16.mxu0 %v9422_v59  ;;  %v9501_v57 = vcombine.low %v2780_v31, %v2788_v42  ;;  %v9499_v59 = vcombine.low %v2779_v48, %v2787_v27  ;;  %v9516_v61 = vcombine.high %v2795_v56, %v2803_v24  ;;  %v10669_v42 = vld [vmem:[#allocation20 + $0x34] ss:$12 sps:$4 sm:$0xff]   ;;  %v2509_v27 = vld [vmem:[#allocation17 + $0x1b8] sm:$0xff] }
0x1157   : > { %5302 = vmatprep.subr.bf16.mxu1 %v9420_v60  ;;  %v9518_v60 = vcombine.high %v2796_v11, %v2804_v54  ;;  %v9199_v31 = vcombine.low %v2477_v16, %v2485_v19 }
0x1159   : > { %5389 = vmatpush1.bf16.msra.mxu0 %v9421_v1  ;;  %v2819_v1 = vld [vmem:[#allocation17 + $0xb68] sm:$0xff] }
0x115a   : > { %5303 = vmatpush1.bf16.msra.mxu1 %v9419_v28  ;;  %5401 = vmatprep.subr.bf16.mxu0 %v9438_v38  ;;  %v9517_v28 = vcombine.low %v2796_v11, %v2804_v54  ;;  %v9515_v38 = vcombine.low %v2795_v56, %v2803_v24  ;;  %v9532_v36 = vcombine.high %v2811_v29, %v2819_v1  ;;  %v2525_v54 = vld [vmem:[#allocation17 + $0x238] sm:$0xff] }
0x115b   : > { %5315 = vmatprep.subr.bf16.mxu1 %v9436_v2  ;;  %v9534_v2 = vcombine.high %v2812_v63, %v2820_v0  ;;  %v2533_v56 = vld [vmem:[#allocation17 + $0x278] sm:$0xff] }
0x115c   : > { %5391 = vmatmul.mubr.bf16.vlgmr.msra.gmra.mrb[28].mxu0 %v12725_v14  ;;  %v10670_v24 = vld [vmem:[#allocation20 + $0x48] ss:$12 sps:$4 sm:$0xff]  }
0x115d   : > { %5305 = vmatmul.mubr.bf16.vlgmr.msra.gmra.mrb[76].mxu1 %v12725_v14  ;;  %5402 = vmatpush1.bf16.msra.mxu0 %v9437_v6  ;;  %v2835_v6 = vld [vmem:[#allocation17 + $0xbe8] sm:$0xff] }
0x115e   : > { %5316 = vmatpush1.bf16.msra.mxu1 %v9435_v39  ;;  %5403 = vmatprep.subr.bf16.mxu0 %v9454_v7  ;;  %v9533_v39 = vcombine.low %v2812_v63, %v2820_v0  ;;  %v9531_v7 = vcombine.low %v2811_v29, %v2819_v1  ;;  %v9548_v53 = vcombine.high %v2827_v40, %v2835_v6  ;;  %v2549_v63 = vld [vmem:[#allocation17 + $0x2f8] sm:$0xff]  ;;  %v2864_v29 = vsub.s32 5, %v12417_v35 }
0x115f   : > { %5317 = vmatprep.subr.bf16.mxu1 %v9452_v13  ;;  %5433 = vmatprep.mubr.bf16.mxu0 %v11713_v17  ;;  %v9550_v13 = vcombine.high %v2828_v12, %v2836_v5  ;;  %v10673_v0 = vld [vmem:[#allocation20 + $0x60] ss:$12 sps:$4 sm:$0xff]   ;;  %v9247_v1 = vcombine.low %v2525_v54, %v2533_v56 }
0x1160   : > { %5347 = vmatprep.mubr.bf16.mxu1 %v11713_v17  ;;  %v2557_v12 = vld [vmem:[#allocation17 + $0x338] sm:$0xff] }
0x1161   : > { %5404 = vmatpush1.bf16.msra.mxu0 %v9453_v22  ;;  %v9547_v22 = vcombine.low %v2827_v40, %v2835_v6  ;;  %v2565_v5 = vld [vmem:[#allocation17 + $0x378] sm:$0xff]  ;;  %v2853_v40 = vrot.slane %v12754_v62, %v12420_v44  ;;  %v2865_v6 = vrot.slane %v12754_v62, %v2864_v29 }
0x1162   : > { %5318 = vmatpush1.bf16.msra.mxu1 %v9451_v41  ;;  %5405 = vmatprep.subr.bf16.mxu0 %v9470_v51  ;;  %v10663_v41 = vld [vmem:[#allocation20 + $0x4] ss:$12 sps:$4 sm:$0xff]   ;;  %v9184_v51 = vcombine.high %v2461_v8, %v2469_v9  ;;  %v9280_v9 = vcombine.high %v2557_v12, %v2565_v5 }
0x1163   : > { %5319 = vmatprep.subr.bf16.mxu1 %v9468_v15  ;;  %v10661_v15 = vld [vmem:[#allocation20] ss:$12 sps:$4 sm:$0xff]  }
0x1165   : > { %5406 = vmatpush1.bf16.msra.mxu0 %v9469_v23  ;;  %v9200_v23 = vcombine.high %v2477_v16, %v2485_v19 }
0x1166   : > { %5320 = vmatpush1.bf16.msra.mxu1 %v9467_v26  ;;  %5407 = vmatprep.subr.bf16.mxu0 %v9486_v34  ;;  %v2493_v26 = vld [vmem:[#allocation17 + $0x138] sm:$0xff] }
0x1167   : > { %5321 = vmatprep.subr.bf16.mxu1 %v9484_v32  ;;  %v2501_v34 = vld [vmem:[#allocation17 + $0x178] sm:$0xff]  ;;  %v10664_v32 = vld [vmem:[#allocation20 + $0x18] ss:$12 sps:$4 sm:$0xff]  }
0x1168   : > { %v9216_v48 = vcombine.high %v2493_v26, %v2501_v34 }
0x1169   : > { %5408 = vmatpush1.bf16.msra.mxu0 %v9485_v3  ;;  %v2517_v3 = vld [vmem:[#allocation17 + $0x1f8] sm:$0xff] }
0x116a   : > { %5322 = vmatpush1.bf16.msra.mxu1 %v9483_v4  ;;  %5409 = vmatprep.subr.bf16.mxu0 %v9502_v49  ;;  %v10667_v4 = vld [vmem:[#allocation20 + $0x30] ss:$12 sps:$4 sm:$0xff]   ;;  %v9215_v49 = vcombine.low %v2493_v26, %v2501_v34  ;;  %v9232_v11 = vcombine.high %v2509_v27, %v2517_v3 }
0x116b   : > { %5323 = vmatprep.subr.bf16.mxu1 %v9500_v37  ;;  %v10672_v37 = vld [vmem:[#allocation20 + $0x4c] ss:$12 sps:$4 sm:$0xff]  }
0x116d   : > { %5410 = vmatpush1.bf16.msra.mxu0 %v9501_v57  ;;  %v10675_v57 = vld [vmem:[#allocation20 + $0x64] ss:$12 sps:$4 sm:$0xff]  }
0x116e   : > { %5324 = vmatpush1.bf16.msra.mxu1 %v9499_v59  ;;  %5411 = vmatprep.subr.bf16.mxu0 %v9518_v60  ;;  %v9248_v59 = vcombine.high %v2525_v54, %v2533_v56  ;;  %v2860_v60 = vsub.s32 4, %v12417_v35  ;;  %v2589_v54 = vld [vmem:[#allocation17 + $0x438] sm:$0xff] }
0x116f   : > { %5325 = vmatprep.subr.bf16.mxu1 %v9516_v61  ;;  %v2541_v61 = vld [vmem:[#allocation17 + $0x2b8] sm:$0xff] }
0x1170   : > { %v2597_v56 = vld [vmem:[#allocation17 + $0x478] sm:$0xff] }
0x1171   : > { %5412 = vmatpush1.bf16.msra.mxu0 %v9517_v28  ;;  %v10678_v28 = vld [vmem:[#allocation20 + $0x7c] ss:$12 sps:$4 sm:$0xff]  }
0x1172   : > { %5326 = vmatpush1.bf16.msra.mxu1 %v9515_v38  ;;  %5413 = vmatprep.subr.bf16.mxu0 %v9534_v2  ;;  %v2856_v38 = vsub.s32 3, %v12417_v35  ;;  %v9264_v2 = vcombine.high %v2541_v61, %v2549_v63 }
0x1173   : > { %5327 = vmatprep.subr.bf16.mxu1 %v9532_v36  ;;  %v2861_v36 = vrot.slane %v12754_v62, %v2860_v60 }
0x1175   : > { %5414 = vmatpush1.bf16.msra.mxu0 %v9533_v39  ;;  %v10676_v39 = vld [vmem:[#allocation20 + $0x78] ss:$12 sps:$4 sm:$0xff]  }
0x1176   : > { %5328 = vmatpush1.bf16.msra.mxu1 %v9531_v7  ;;  %5415 = vmatprep.subr.bf16.mxu0 %v9550_v13  ;;  %v2857_v7 = vrot.slane %v12754_v62, %v2856_v38  ;;  %v9263_v13 = vcombine.low %v2541_v61, %v2549_v63  ;;  %v10682_v61 = vld [vmem:[#allocation20 + $0xa8] ss:$12 sps:$4 sm:$0xff]  }
0x1177   : > { %5329 = vmatprep.subr.bf16.mxu1 %v9548_v53  ;;  %v10681_v53 = vld [vmem:[#allocation20 + $0x94] ss:$12 sps:$4 sm:$0xff]  }
0x1179   : > { %5416 = vmatpush1.bf16.msra.mxu0 %v9549_v10 }
0x117a   : > { %5330 = vmatpush1.bf16.msra.mxu1 %v9547_v22  ;;  %8155 = vmatprep.subr.bf16.mxu0 %v10663_v41 }
0x117b   : > { %5444 = vmatprep.subr.bf16.mxu1 %v9184_v51  ;;  %v2573_v51 = vld [vmem:[#allocation17 + $0x3b8] sm:$0xff] }
0x117c   : > { %5434 = vmatmul.mubr.bf16.vlgmr.msra.gmra.mrb[28].mxu0 %v12723_v50 }
0x117d   : > { %5348 = vmatmul.mubr.bf16.vlgmr.msra.gmra.mrb[76].mxu1 %v12723_v50  ;;  %8156 = vmatpush1.bf16.msra.mxu0 %v10661_v15  ;;  %v2581_v15 = vld [vmem:[#allocation17 + $0x3f8] sm:$0xff] }
0x117e   : > { %8187 = vmatprep.mubr.bf16.mxu0 %v12762_v58  ;;  %5445 = vmatpush1.bf16.msra.mxu1 %v9183_v20 }
0x117f   : > { %5476 = vmatprep.mubr.bf16.mxu1 %v12721_v43  ;;  %8157 = vmatprep.subr.bf16.mxu0 %v10666_v21  ;;  %v9231_v43 = vcombine.low %v2509_v27, %v2517_v3 }
0x1180   : > { %5446 = vmatprep.subr.bf16.mxu1 %v9200_v23  ;;  %v10679_v23 = vld [vmem:[#allocation20 + $0x90] ss:$12 sps:$4 sm:$0xff]  }
0x1181   : > { %8158 = vmatpush1.bf16.msra.mxu0 %v10664_v32 }
0x1182   : > { %5447 = vmatpush1.bf16.msra.mxu1 %v9199_v31  ;;  %8159 = vmatprep.subr.bf16.mxu0 %v10669_v42  ;;  %v9279_v31 = vcombine.low %v2557_v12, %v2565_v5  ;;  %v10684_v42 = vld [vmem:[#allocation20 + $0xac] ss:$12 sps:$4 sm:$0xff]   ;;  %v9312_v5 = vcombine.high %v2589_v54, %v2597_v56 }
0x1183   : > { %5448 = vmatprep.subr.bf16.mxu1 %v9216_v48 }
0x1185   : > { %8160 = vmatpush1.bf16.msra.mxu0 %v10667_v4  ;;  %v9296_v4 = vcombine.high %v2573_v51, %v2581_v15 }
0x1186   : > { %5449 = vmatpush1.bf16.msra.mxu1 %v9215_v49  ;;  %8161 = vmatprep.subr.bf16.mxu0 %v10672_v37 }
0x1187   : > { %5450 = vmatprep.subr.bf16.mxu1 %v9232_v11 }
0x1189   : > { %8162 = vmatpush1.bf16.msra.mxu0 %v10670_v24 }
0x118a   : > { %5451 = vmatpush1.bf16.msra.mxu1 %v9231_v43  ;;  %8163 = vmatprep.subr.bf16.mxu0 %v10675_v57 }
0x118b   : > { %5452 = vmatprep.subr.bf16.mxu1 %v9248_v59 }
0x118d   : > { %8164 = vmatpush1.bf16.msra.mxu0 %v10673_v0 }
0x118e   : > { %5453 = vmatpush1.bf16.msra.mxu1 %v9247_v1  ;;  %8165 = vmatprep.subr.bf16.mxu0 %v10678_v28  ;;  %v9295_v28 = vcombine.low %v2573_v51, %v2581_v15  ;;  %v10693_v51 = vld [vmem:[#allocation20 + $0xf4] ss:$12 sps:$4 sm:$0xff]  }
0x118f   : > { %v5091_v8 = vpop.f32.mrb[20].mxu0  ;;  %5454 = vmatprep.subr.bf16.mxu1 %v9264_v2  ;;  %v10687_v2 = vld [vmem:[#allocation20 + $0xc4] ss:$12 sps:$4 sm:$0xff]  }
0x1190   : > { %v10288_v10 = vadd.f32 %v5091_v8, %v2861_v36  ;;  %v5005_v22 = vpop.f32.mrb[68].mxu1  ;;  %v5093_v41 = vpop.f32.mrb[21].mxu0 }
0x1191   : > { %v10284_v16 = vadd.f32 %v5005_v22, %v2853_v40  ;;  %v10289_v19 = vadd.f32 %v5093_v41, %v2865_v6  ;;  %v5007_v20 = vpop.f32.mrb[69].mxu1  ;;  %v5095_v21 = vpop.f32.mrb[22].mxu0  ;;  %8166 = vmatpush1.bf16.msra.mxu0 %v10676_v39  ;;  %v2613_v39 = vld [vmem:[#allocation17 + $0x4f8] sm:$0xff]  ;;  %v10688_v22 = vld [vmem:[#allocation20 + $0xd8] ss:$12 sps:$4 sm:$0xff]  }
0x1192   : > { %v10285_v26 = vadd.f32 %v5007_v20, %v2857_v7  ;;  %v10290_v34 = vadd.f32 %v5095_v21, %v2861_v36  ;;  %v5009_v32 = vpop.f32.mrb[70].mxu1  ;;  %v5097_v62 = vpop.f32.mrb[23].mxu0  ;;  %5455 = vmatpush1.bf16.msra.mxu1 %v9263_v13  ;;  %8167 = vmatprep.subr.bf16.mxu0 %v10681_v53  ;;  %v5534_v49 = vmax.f32 %v10288_v10, 0.0  ;;  %v9311_v13 = vcombine.low %v2589_v54, %v2597_v56  ;;  %v10690_v53 = vld [vmem:[#allocation20 + $0xdc] ss:$12 sps:$4 sm:$0xff]  }
0x1193   : > { %v10286_v48 = vadd.f32 %v5009_v32, %v2853_v40  ;;  %v10291_v27 = vadd.f32 %v5097_v62, %v2865_v6  ;;  %v5011_v3 = vpop.f32.mrb[71].mxu1  ;;  %5456 = vmatprep.subr.bf16.mxu1 %v9280_v9  ;;  %v5532_v24 = vmax.f32 %v10284_v16, 0.0  ;;  %v5535_v43 = vmax.f32 %v10289_v19, 0.0  ;;  %v2605_v6 = vld [vmem:[#allocation17 + $0x4b8] sm:$0xff]  ;;  %v10691_v20 = vld [vmem:[#allocation20 + $0xf0] ss:$12 sps:$4 sm:$0xff]  }
0x1194   : > { %v5550_v37 = vmax.f32 %v10290_v34, 0.0  ;;  %v10287_v11 = vadd.f32 %v5011_v3, %v2857_v7  ;;  %v5533_v63 = vmax.f32 %v10285_v26, 0.0  ;;  %v10685_v7 = vld [vmem:[#allocation20 + $0xc0] ss:$12 sps:$4 sm:$0xff]   ;;  %v9328_v8 = vcombine.high %v2605_v6, %v2613_v39  ;;  %v10694_v62 = vld [vmem:[#allocation20 + $0x108] ss:$12 sps:$4 sm:$0xff]  }
0x1195   : > { %v5548_v57 = vmax.f32 %v10286_v48, 0.0  ;;  %v5551_v59 = vmax.f32 %v10291_v27, 0.0  ;;  %8168 = vmatpush1.bf16.msra.mxu0 %v10679_v23  ;;  %v2621_v9 = vld [vmem:[#allocation17 + $0x538] sm:$0xff]  ;;  %v9327_v41 = vcombine.low %v2605_v6, %v2613_v39 }
0x1196   : > { %v12786_v0 = vpack.c.bf16 %v5550_v37, %v5534_v49  ;;  %v5549_v1 = vmax.f32 %v10287_v11, 0.0  ;;  %5457 = vmatpush1.bf16.msra.mxu1 %v9279_v31  ;;  %8169 = vmatprep.subr.bf16.mxu0 %v10684_v42  ;;  %v2629_v10 = vld [vmem:[#allocation17 + $0x578] sm:$0xff]  ;;  %v10699_v42 = vld [vmem:[#allocation20 + $0x124] ss:$12 sps:$4 sm:$0xff]  }
0x1197   : > { %v12788_v36 = vpack.c.bf16 %v5548_v57, %v5532_v24  ;;  %v12790_v12 = vpack.c.bf16 %v5551_v59, %v5535_v43  ;;  %5458 = vmatprep.subr.bf16.mxu1 %v9296_v4  ;;  %v9344_v15 = vcombine.high %v2621_v9, %v2629_v10  ;;  %v2637_v16 = vld [vmem:[#allocation17 + $0x5b8] sm:$0xff]  ;;  %v9343_v21 = vcombine.low %v2621_v9, %v2629_v10  ;;  %v10700_v24 = vld [vmem:[#allocation20 + $0x138] ss:$12 sps:$4 sm:$0xff]   ;;  %v10705_v57 = vld [vmem:[#allocation20 + $0x154] ss:$12 sps:$4 sm:$0xff]  }
0x1198   : > { %v12792_v40 = vpack.c.bf16 %v5549_v1, %v5533_v63  ;;  %v2645_v19 = vld [vmem:[#allocation17 + $0x5f8] sm:$0xff]  ;;  %v10703_v1 = vld [vmem:[#allocation20 + $0x150] ss:$12 sps:$4 sm:$0xff]  }
0x1199   : > { %8170 = vmatpush1.bf16.msra.mxu0 %v10682_v61  ;;  %v10696_v23 = vld [vmem:[#allocation20 + $0x10c] ss:$12 sps:$4 sm:$0xff]   ;;  %v9360_v26 = vcombine.high %v2637_v16, %v2645_v19  ;;  %v9359_v31 = vcombine.low %v2637_v16, %v2645_v19  ;;  %v10702_v37 = vld [vmem:[#allocation20 + $0x13c] ss:$12 sps:$4 sm:$0xff]  }
0x119a   : > { %5459 = vmatpush1.bf16.msra.mxu1 %v9295_v28  ;;  %8171 = vmatprep.subr.bf16.mxu0 %v10687_v2  ;;  %v2653_v34 = vld [vmem:[#allocation17 + $0x638] sm:$0xff] }
0x119b   : > { %5460 = vmatprep.subr.bf16.mxu1 %v9312_v5  ;;  %v2661_v32 = vld [vmem:[#allocation17 + $0x678] sm:$0xff] }
0x119c   : > { %v9376_v48 = vcombine.high %v2653_v34, %v2661_v32  ;;  %v2669_v27 = vld [vmem:[#allocation17 + $0x6b8] sm:$0xff]  ;;  %v9375_v49 = vcombine.low %v2653_v34, %v2661_v32 }
0x119d   : > { %8172 = vmatpush1.bf16.msra.mxu0 %v10685_v7  ;;  %v2677_v3 = vld [vmem:[#allocation17 + $0x6f8] sm:$0xff] }
0x119e   : > { %5461 = vmatpush1.bf16.msra.mxu1 %v9311_v13  ;;  %8173 = vmatprep.subr.bf16.mxu0 %v10690_v53  ;;  %v10697_v4 = vld [vmem:[#allocation20 + $0x120] ss:$12 sps:$4 sm:$0xff]   ;;  %v9392_v11 = vcombine.high %v2669_v27, %v2677_v3  ;;  %v9391_v43 = vcombine.low %v2669_v27, %v2677_v3  ;;  %v10706_v7 = vld [vmem:[#allocation20 + $0x168] ss:$12 sps:$4 sm:$0xff]   ;;  %v10711_v53 = vld [vmem:[#allocation20 + $0x184] ss:$12 sps:$4 sm:$0xff]  }
0x119f   : > { %5462 = vmatprep.subr.bf16.mxu1 %v9328_v8  ;;  %v2685_v54 = vld [vmem:[#allocation17 + $0x738] sm:$0xff] }
0x11a0   : > { %v2693_v56 = vld [vmem:[#allocation17 + $0x778] sm:$0xff] }
0x11a1   : > { %8174 = vmatpush1.bf16.msra.mxu0 %v10688_v22  ;;  %v9408_v59 = vcombine.high %v2685_v54, %v2693_v56  ;;  %v2701_v61 = vld [vmem:[#allocation17 + $0x7b8] sm:$0xff]  ;;  %v9407_v28 = vcombine.low %v2685_v54, %v2693_v56 }
0x11a2   : > { %5463 = vmatpush1.bf16.msra.mxu1 %v9327_v41  ;;  %8175 = vmatprep.subr.bf16.mxu0 %v10693_v51  ;;  %v2709_v63 = vld [vmem:[#allocation17 + $0x7f8] sm:$0xff] }
0x11a3   : > { %5464 = vmatprep.subr.bf16.mxu1 %v9344_v15  ;;  %v10708_v2 = vld [vmem:[#allocation20 + $0x16c] ss:$12 sps:$4 sm:$0xff]   ;;  %v9424_v5 = vcombine.high %v2701_v61, %v2709_v63  ;;  %v9423_v13 = vcombine.low %v2701_v61, %v2709_v63  ;;  %v10714_v51 = vld [vmem:[#allocation20 + $0x19c] ss:$12 sps:$4 sm:$0xff]  }
0x11a4   : > { %v2717_v6 = vld [vmem:[#allocation17 + $0x838] sm:$0xff]  ;;  %v10724_v61 = vld [vmem:[#allocation20 + $0x1f8] ss:$12 sps:$4 sm:$0xff]  }
0x11a5   : > { %8176 = vmatpush1.bf16.msra.mxu0 %v10691_v20  ;;  %v2725_v39 = vld [vmem:[#allocation17 + $0x878] sm:$0xff]  ;;  %v10712_v20 = vld [vmem:[#allocation20 + $0x198] ss:$12 sps:$4 sm:$0xff]  }
0x11a6   : > { %5465 = vmatpush1.bf16.msra.mxu1 %v9343_v21  ;;  %8177 = vmatprep.subr.bf16.mxu0 %v10696_v23  ;;  %v9440_v8 = vcombine.high %v2717_v6, %v2725_v39  ;;  %v2733_v9 = vld [vmem:[#allocation17 + $0x8b8] sm:$0xff]  ;;  %v9439_v41 = vcombine.low %v2717_v6, %v2725_v39  ;;  %v10717_v23 = vld [vmem:[#allocation20 + $0x1b4] ss:$12 sps:$4 sm:$0xff]   ;;  %v10727_v6 = vld [vmem:[#allocation20 + $0x210] ss:$12 sps:$4 sm:$0xff]  }
0x11a7   : > { %5466 = vmatprep.subr.bf16.mxu1 %v9360_v26  ;;  %v2741_v10 = vld [vmem:[#allocation17 + $0x8f8] sm:$0xff] }
0x11a8   : > { %v10709_v22 = vld [vmem:[#allocation20 + $0x180] ss:$12 sps:$4 sm:$0xff]   ;;  %v9456_v15 = vcombine.high %v2733_v9, %v2741_v10  ;;  %v9455_v21 = vcombine.low %v2733_v9, %v2741_v10  ;;  %v10718_v3 = vld [vmem:[#allocation20 + $0x1c8] ss:$12 sps:$4 sm:$0xff]   ;;  %v10735_v9 = vld [vmem:[#allocation20 + $0x244] ss:$12 sps:$4 sm:$0xff]  }
0x11a9   : > { %8178 = vmatpush1.bf16.msra.mxu0 %v10694_v62  ;;  %v2749_v16 = vld [vmem:[#allocation17 + $0x938] sm:$0xff]  ;;  %v10715_v62 = vld [vmem:[#allocation20 + $0x1b0] ss:$12 sps:$4 sm:$0xff]  }
0x11aa   : > { %5467 = vmatpush1.bf16.msra.mxu1 %v9359_v31  ;;  %8179 = vmatprep.subr.bf16.mxu0 %v10699_v42  ;;  %v2757_v19 = vld [vmem:[#allocation17 + $0x978] sm:$0xff] }
0x11ab   : > { %5468 = vmatprep.subr.bf16.mxu1 %v9376_v48  ;;  %v9472_v26 = vcombine.high %v2749_v16, %v2757_v19  ;;  %v2765_v34 = vld [vmem:[#allocation17 + $0x9b8] sm:$0xff]  ;;  %v9471_v31 = vcombine.low %v2749_v16, %v2757_v19  ;;  %v10738_v16 = vld [vmem:[#allocation20 + $0x258] ss:$12 sps:$4 sm:$0xff]  }
0x11ac   : > { %v2773_v32 = vld [vmem:[#allocation17 + $0x9f8] sm:$0xff] }
0x11ad   : > { %8180 = vmatpush1.bf16.msra.mxu0 %v10697_v4  ;;  %v9488_v42 = vcombine.high %v2765_v34, %v2773_v32  ;;  %v2781_v48 = vld [vmem:[#allocation17 + $0xa38] sm:$0xff]  ;;  %v9487_v4 = vcombine.low %v2765_v34, %v2773_v32  ;;  %v10751_v32 = vld [vmem:[#allocation20 + $0x110] ss:$12 sps:$4 sm:$0xff]  }
0x11ae   : > { %5469 = vmatpush1.bf16.msra.mxu1 %v9375_v49  ;;  %8181 = vmatprep.subr.bf16.mxu0 %v10702_v37  ;;  %v2789_v27 = vld [vmem:[#allocation17 + $0xa78] sm:$0xff]  ;;  %v10723_v49 = vld [vmem:[#allocation20 + $0x1e4] ss:$12 sps:$4 sm:$0xff]  }
0x11af   : > { %5470 = vmatprep.subr.bf16.mxu1 %v9392_v11  ;;  %v9504_v37 = vcombine.high %v2781_v48, %v2789_v27  ;;  %v2797_v11 = vld [vmem:[#allocation17 + $0xab8] sm:$0xff]  ;;  %v9503_v56 = vcombine.low %v2781_v48, %v2789_v27  ;;  %v2868_v48 = vsub.s32 6, %v12417_v35 }
0x11b0   : > { %v10721_v54 = vld [vmem:[#allocation20 + $0x1e0] ss:$12 sps:$4 sm:$0xff]   ;;  %v10736_v10 = vld [vmem:[#allocation20 + $0xc8] ss:$12 sps:$4 sm:$0xff]  }
0x11b1   : > { %8182 = vmatpush1.bf16.msra.mxu0 %v10700_v24  ;;  %v10726_v24 = vld [vmem:[#allocation20 + $0x1fc] ss:$12 sps:$4 sm:$0xff]   ;;  %v10742_v19 = vld [vmem:[#allocation20 + $0x20] ss:$12 sps:$4 sm:$0xff]  }
0x11b2   : > { %5471 = vmatpush1.bf16.msra.mxu1 %v9391_v43  ;;  %8183 = vmatprep.subr.bf16.mxu0 %v10705_v57  ;;  %v2813_v57 = vld [vmem:[#allocation17 + $0xb38] sm:$0xff] }
0x11b3   : > { %5472 = vmatprep.subr.bf16.mxu1 %v9408_v59  ;;  %v2821_v59 = vld [vmem:[#allocation17 + $0xb78] sm:$0xff] }
0x11b4   : > { %v9535_v39 = vcombine.low %v2813_v57, %v2821_v59  ;;  %v10750_v34 = vld [vmem:[#allocation20 + $0x28c] ss:$12 sps:$4 sm:$0xff]   ;;  %v10757_v27 = vld [vmem:[#allocation20 + $0x68] ss:$12 sps:$4 sm:$0xff]  }
0x11b5   : > { %8184 = vmatpush1.bf16.msra.mxu0 %v10703_v1  ;;  %v10729_v1 = vld [vmem:[#allocation20 + $0x214] ss:$12 sps:$4 sm:$0xff]  }
0x11b6   : > { %5473 = vmatpush1.bf16.msra.mxu1 %v9407_v28  ;;  %8185 = vmatprep.subr.bf16.mxu0 %v10708_v2  ;;  %v9536_v28 = vcombine.high %v2813_v57, %v2821_v59  ;;  %v2829_v2 = vld [vmem:[#allocation17 + $0xbb8] sm:$0xff]  ;;  %v10765_v57 = vld [vmem:[#allocation20 + $0x2d4] ss:$12 sps:$4 sm:$0xff]  }
0x11b7   : > { %5474 = vmatprep.subr.bf16.mxu1 %v9424_v5  ;;  %v2837_v5 = vld [vmem:[#allocation17 + $0xbf8] sm:$0xff] }
0x11b9   : > { %8186 = vmatpush1.bf16.msra.mxu0 %v10706_v7  ;;  %v10732_v7 = vld [vmem:[#allocation20 + $0x22c] ss:$12 sps:$4 sm:$0xff]  }
0x11ba   : > { %5475 = vmatpush1.bf16.msra.mxu1 %v9423_v13  ;;  %8198 = vmatprep.subr.bf16.mxu0 %v10711_v53  ;;  %v9552_v13 = vcombine.high %v2829_v2, %v2837_v5  ;;  %v10730_v53 = vld [vmem:[#allocation20 + $0x228] ss:$12 sps:$4 sm:$0xff]  }
0x11bb   : > { %5487 = vmatprep.subr.bf16.mxu1 %v9440_v8  ;;  %v9551_v8 = vcombine.low %v2829_v2, %v2837_v5 }
0x11bc   : > { %8188 = vmatmul.mubr.bf16.vlgmr.msra.gmra.mrb[32].mxu0 %v12760_v55 }
0x11bd   : > { %5477 = vmatmul.mubr.bf16.vlgmr.msra.gmra.mrb[80].mxu1 %v12725_v14  ;;  %8199 = vmatpush1.bf16.msra.mxu0 %v10709_v22  ;;  %v10720_v14 = vld [vmem:[#allocation20 + $0x1cc] ss:$12 sps:$4 sm:$0xff]  }
0x11be   : > { %8230 = vmatprep.mubr.bf16.mxu0 %v12792_v40  ;;  %5488 = vmatpush1.bf16.msra.mxu1 %v9439_v41  ;;  %v10733_v22 = vld [vmem:[#allocation20 + $0x240] ss:$12 sps:$4 sm:$0xff]   ;;  %v10737_v41 = vld [vmem:[#allocation20 + $0x8] ss:$12 sps:$4 sm:$0xff]  }
0x11bf   : > { %8200 = vmatprep.subr.bf16.mxu0 %v10714_v51  ;;  %5489 = vmatprep.subr.bf16.mxu1 %v9456_v15  ;;  %v10740_v51 = vld [vmem:[#allocation20 + $0x25c] ss:$12 sps:$4 sm:$0xff]   ;;  %v10741_v15 = vld [vmem:[#allocation20 + $0xe0] ss:$12 sps:$4 sm:$0xff]  }
0x11c0   : > { %5519 = vmatprep.mubr.bf16.mxu1 %v11713_v17  ;;  %v2805_v17 = vld [vmem:[#allocation17 + $0xaf8] sm:$0xff] }
0x11c1   : > { %8201 = vmatpush1.bf16.msra.mxu0 %v10712_v20  ;;  %v9520_v43 = vcombine.high %v2797_v11, %v2805_v17  ;;  %v9519_v63 = vcombine.low %v2797_v11, %v2805_v17  ;;  %v10745_v20 = vld [vmem:[#allocation20 + $0x274] ss:$12 sps:$4 sm:$0xff]  }
0x11c2   : > { %5490 = vmatpush1.bf16.msra.mxu1 %v9455_v21  ;;  %8202 = vmatprep.subr.bf16.mxu0 %v10717_v23  ;;  %v10746_v21 = vld [vmem:[#allocation20 + $0xf8] ss:$12 sps:$4 sm:$0xff]   ;;  %v10743_v23 = vld [vmem:[#allocation20 + $0x270] ss:$12 sps:$4 sm:$0xff]  }
0x11c3   : > { %5491 = vmatprep.subr.bf16.mxu1 %v9472_v26  ;;  %v10747_v26 = vld [vmem:[#allocation20 + $0x38] ss:$12 sps:$4 sm:$0xff]   ;;  %v11227_v11 = vld [vmem:[#allocation19] sm:$0xff] }
0x11c4   : > { %v2869_v17 = vrot.slane %v11227_v11, %v2868_v48 }
0x11c5   : > { %8203 = vmatpush1.bf16.msra.mxu0 %v10715_v62  ;;  %v10752_v62 = vld [vmem:[#allocation20 + $0x50] ss:$12 sps:$4 sm:$0xff]  }
0x11c6   : > { %5492 = vmatpush1.bf16.msra.mxu1 %v9471_v31  ;;  %8204 = vmatprep.subr.bf16.mxu0 %v10720_v14  ;;  %v10755_v31 = vld [vmem:[#allocation20 + $0x2a4] ss:$12 sps:$4 sm:$0xff]   ;;  %v10753_v14 = vld [vmem:[#allocation20 + $0x2a0] ss:$12 sps:$4 sm:$0xff]  }
0x11c7   : > { %5493 = vmatprep.subr.bf16.mxu1 %v9488_v42  ;;  %v12800_v42 = vld [vmem:[#allocation19 + $0x8] sm:$0xff] }
0x11c9   : > { %8205 = vmatpush1.bf16.msra.mxu0 %v10718_v3  ;;  %v10760_v3 = vld [vmem:[#allocation20 + $0x2bc] ss:$12 sps:$4 sm:$0xff]  }
0x11ca   : > { %5494 = vmatpush1.bf16.msra.mxu1 %v9487_v4  ;;  %8206 = vmatprep.subr.bf16.mxu0 %v10723_v49  ;;  %v2872_v4 = vsub.s32 7, %v12417_v35  ;;  %v10761_v49 = vld [vmem:[#allocation20 + $0x140] ss:$12 sps:$4 sm:$0xff]   ;;  %v11007_v35 = vld [vmem:[#allocation20 + $0x998] ss:$12 sps:$4 sm:$0xff]  }
0x11cb   : > { %5495 = vmatprep.subr.bf16.mxu1 %v9504_v37  ;;  %v2877_v37 = vrot.slane %v12800_v42, %v12426_v47 }
0x11cd   : > { %8207 = vmatpush1.bf16.msra.mxu0 %v10721_v54  ;;  %v2881_v54 = vrot.slane %v12800_v42, %v12423_v46 }
0x11ce   : > { %5496 = vmatpush1.bf16.msra.mxu1 %v9503_v56  ;;  %8208 = vmatprep.subr.bf16.mxu0 %v10726_v24  ;;  %v10758_v56 = vld [vmem:[#allocation20 + $0x2b8] ss:$12 sps:$4 sm:$0xff]   ;;  %v2873_v24 = vrot.slane %v11227_v11, %v2872_v4 }
0x11cf   : > { %5497 = vmatprep.subr.bf16.mxu1 %v9520_v43  ;;  %v10762_v43 = vld [vmem:[#allocation20 + $0x80] ss:$12 sps:$4 sm:$0xff]  }
0x11d1   : > { %8209 = vmatpush1.bf16.msra.mxu0 %v10724_v61  ;;  %v10766_v61 = vld [vmem:[#allocation20 + $0x158] ss:$12 sps:$4 sm:$0xff]  }
0x11d2   : > { %5498 = vmatpush1.bf16.msra.mxu1 %v9519_v63  ;;  %8210 = vmatprep.subr.bf16.mxu0 %v10729_v1 }
0x11d3   : > { %5499 = vmatprep.subr.bf16.mxu1 %v9536_v28 }
0x11d5   : > { %8211 = vmatpush1.bf16.msra.mxu0 %v10727_v6 }
0x11d6   : > { %5500 = vmatpush1.bf16.msra.mxu1 %v9535_v39  ;;  %8212 = vmatprep.subr.bf16.mxu0 %v10732_v7  ;;  %v10763_v7 = vld [vmem:[#allocation20 + $0x2d0] ss:$12 sps:$4 sm:$0xff]  }
0x11d7   : > { %5501 = vmatprep.subr.bf16.mxu1 %v9552_v13 }
0x11d9   : > { %8213 = vmatpush1.bf16.msra.mxu0 %v10730_v53 }
0x11da   : > { %5502 = vmatpush1.bf16.msra.mxu1 %v9551_v8  ;;  %8214 = vmatprep.subr.bf16.mxu0 %v10735_v9 }
0x11db   : > { %9984 = vmatprep.subr.bf16.mxu1 %v10736_v10  ;;  %v10767_v10 = vld [vmem:[#allocation20 + $0x98] ss:$12 sps:$4 sm:$0xff]  }
0x11dd   : > { %5520 = vmatmul.mubr.bf16.vlgmr.msra.gmra.mrb[80].mxu1 %v12723_v50  ;;  %8215 = vmatpush1.bf16.msra.mxu0 %v10733_v22  ;;  %v10748_v50 = vld [vmem:[#allocation20 + $0x288] ss:$12 sps:$4 sm:$0xff]   ;;  %v10770_v22 = vld [vmem:[#allocation20 + $0x2ec] ss:$12 sps:$4 sm:$0xff]  }
0x11de   : > { %9985 = vmatpush3.bf16.msra.mxu1 %v10737_v41  ;;  %8531 = vmatprep.mubr.bf16.mxu1 %v12762_v58  ;;  %v10756_v58 = vld [vmem:[#allocation20 + $0x128] ss:$12 sps:$4 sm:$0xff]  }
0x11df   : > { %8216 = vmatprep.subr.bf16.mxu0 %v10740_v51  ;;  %9986 = vmatprep.subr.bf16.mxu1 %v10741_v15 }
0x11e1   : > { %8217 = vmatpush1.bf16.msra.mxu0 %v10738_v16  ;;  %v10771_v16 = vld [vmem:[#allocation20 + $0x170] ss:$12 sps:$4 sm:$0xff]  }
0x11e2   : > { %9987 = vmatpush3.bf16.msra.mxu1 %v10742_v19  ;;  %8218 = vmatprep.subr.bf16.mxu0 %v10745_v20 }
0x11e3   : > { %9988 = vmatprep.subr.bf16.mxu1 %v10746_v21 }
0x11e5   : > { %8219 = vmatpush1.bf16.msra.mxu0 %v10743_v23 }
0x11e6   : > { %9989 = vmatpush3.bf16.msra.mxu1 %v10747_v26  ;;  %8220 = vmatprep.subr.bf16.mxu0 %v10750_v34 }
0x11e7   : > { %9990 = vmatprep.subr.bf16.mxu1 %v10751_v32 }
0x11e9   : > { %8221 = vmatpush1.bf16.msra.mxu0 %v10748_v50  ;;  %v10768_v50 = vld [vmem:[#allocation20 + $0x2e8] ss:$12 sps:$4 sm:$0xff]  }
0x11ea   : > { %9991 = vmatpush3.bf16.msra.mxu1 %v10752_v62  ;;  %8222 = vmatprep.subr.bf16.mxu0 %v10755_v31 }
0x11eb   : > { %9992 = vmatprep.subr.bf16.mxu1 %v10756_v58 }
0x11ed   : > { %8223 = vmatpush1.bf16.msra.mxu0 %v10753_v14  ;;  %v10772_v14 = vld [vmem:[#allocation20 + $0xb0] ss:$12 sps:$4 sm:$0xff]  }
0x11ee   : > { %9993 = vmatpush3.bf16.msra.mxu1 %v10757_v27  ;;  %8224 = vmatprep.subr.bf16.mxu0 %v10760_v3  ;;  %v10775_v27 = vld [vmem:[#allocation20 + $0x304] ss:$12 sps:$4 sm:$0xff]  }
0x11ef   : > { %v5263_v59 = vpop.f32.mrb[24].mxu0  ;;  %9994 = vmatprep.subr.bf16.mxu1 %v10761_v49 }
0x11f0   : > { %v10296_v63 = vadd.f32 %v5263_v59, %v2877_v37  ;;  %v5177_v1 = vpop.f32.mrb[72].mxu1  ;;  %v5265_v28 = vpop.f32.mrb[25].mxu0  ;;  %v10782_v59 = vld [vmem:[#allocation20 + $0x1a0] ss:$12 sps:$4 sm:$0xff]  }
0x11f1   : > { %v10292_v2 = vadd.f32 %v5177_v1, %v2869_v17  ;;  %v10297_v5 = vadd.f32 %v5265_v28, %v2881_v54  ;;  %v5179_v6 = vpop.f32.mrb[73].mxu1  ;;  %v5267_v39 = vpop.f32.mrb[26].mxu0  ;;  %8225 = vmatpush1.bf16.msra.mxu0 %v10758_v56  ;;  %v10777_v56 = vld [vmem:[#allocation20 + $0x188] ss:$12 sps:$4 sm:$0xff]   ;;  %v10790_v1 = vld [vmem:[#allocation20 + $0x34c] ss:$12 sps:$4 sm:$0xff]  }
0x11f2   : > { %v10293_v13 = vadd.f32 %v5179_v6, %v2873_v24  ;;  %v10298_v53 = vadd.f32 %v5267_v39, %v2877_v37  ;;  %v5181_v8 = vpop.f32.mrb[74].mxu1  ;;  %v5269_v9 = vpop.f32.mrb[27].mxu0  ;;  %9995 = vmatpush3.bf16.msra.mxu1 %v10762_v43  ;;  %8226 = vmatprep.subr.bf16.mxu0 %v10765_v57  ;;  %v5538_v19 = vmax.f32 %v10296_v63, 0.0  ;;  %v10776_v37 = vld [vmem:[#allocation20 + $0x248] ss:$12 sps:$4 sm:$0xff]  }
0x11f3   : > { %v10294_v41 = vadd.f32 %v5181_v8, %v2869_v17  ;;  %v10299_v51 = vadd.f32 %v5269_v9, %v2881_v54  ;;  %v5183_v15 = vpop.f32.mrb[75].mxu1  ;;  %9996 = vmatprep.subr.bf16.mxu1 %v10766_v61  ;;  %v5536_v23 = vmax.f32 %v10292_v2, 0.0  ;;  %v5539_v26 = vmax.f32 %v10297_v5, 0.0  ;;  %v10773_v17 = vld [vmem:[#allocation20 + $0x300] ss:$12 sps:$4 sm:$0xff]  }
0x11f4   : > { %v5554_v20 = vmax.f32 %v10298_v53, 0.0  ;;  %v10295_v21 = vadd.f32 %v5183_v15, %v2873_v24  ;;  %v5537_v62 = vmax.f32 %v10293_v13, 0.0  ;;  %v10780_v54 = vld [vmem:[#allocation20 + $0x31c] ss:$12 sps:$4 sm:$0xff]   ;;  %v10781_v24 = vld [vmem:[#allocation20 + $0x260] ss:$12 sps:$4 sm:$0xff]  }
0x11f5   : > { %v5552_v34 = vmax.f32 %v10294_v41, 0.0  ;;  %v5555_v32 = vmax.f32 %v10299_v51, 0.0  ;;  %8227 = vmatpush1.bf16.msra.mxu0 %v10763_v7  ;;  %v10778_v43 = vld [vmem:[#allocation20 + $0x318] ss:$12 sps:$4 sm:$0xff]   ;;  %v10785_v57 = vld [vmem:[#allocation20 + $0x334] ss:$12 sps:$4 sm:$0xff]  }
0x11f6   : > { %v12812_v31 = vpack.c.bf16 %v5554_v20, %v5538_v19  ;;  %v5553_v58 = vmax.f32 %v10295_v21, 0.0  ;;  %9997 = vmatpush3.bf16.msra.mxu1 %v10767_v10  ;;  %8228 = vmatprep.subr.bf16.mxu0 %v10770_v22  ;;  %v10786_v61 = vld [vmem:[#allocation20 + $0x278] ss:$12 sps:$4 sm:$0xff]   ;;  %v10783_v63 = vld [vmem:[#allocation20 + $0x330] ss:$12 sps:$4 sm:$0xff]  }
0x11f7   : > { %v12814_v3 = vpack.c.bf16 %v5552_v34, %v5536_v23  ;;  %v12816_v49 = vpack.c.bf16 %v5555_v32, %v5539_v26  ;;  %9998 = vmatprep.subr.bf16.mxu1 %v10771_v16  ;;  %v10787_v28 = vld [vmem:[#allocation20 + $0x1b8] ss:$12 sps:$4 sm:$0xff]   ;;  %v10791_v2 = vld [vmem:[#allocation20 + $0x290] ss:$12 sps:$4 sm:$0xff]   ;;  %v10788_v5 = vld [vmem:[#allocation20 + $0x348] ss:$12 sps:$4 sm:$0xff]  }
0x11f8   : > { %v12818_v11 = vpack.c.bf16 %v5553_v58, %v5537_v62  ;;  %v10792_v6 = vld [vmem:[#allocation20 + $0x1d0] ss:$12 sps:$4 sm:$0xff]   ;;  %v10796_v39 = vld [vmem:[#allocation20 + $0x2a8] ss:$12 sps:$4 sm:$0xff]   ;;  %v10801_v53 = vld [vmem:[#allocation20 + $0x2c0] ss:$12 sps:$4 sm:$0xff]  }
0x11f9   : > { %8229 = vmatpush1.bf16.msra.mxu0 %v10768_v50  ;;  %v10800_v7 = vld [vmem:[#allocation20 + $0x37c] ss:$12 sps:$4 sm:$0xff]   ;;  %v10798_v8 = vld [vmem:[#allocation20 + $0x378] ss:$12 sps:$4 sm:$0xff]   ;;  %v10805_v9 = vld [vmem:[#allocation20 + $0x394] ss:$12 sps:$4 sm:$0xff]  }
0x11fa   : > { %9999 = vmatpush3.bf16.msra.mxu1 %v10772_v14  ;;  %8241 = vmatprep.subr.bf16.mxu0 %v10775_v27  ;;  %v10797_v13 = vld [vmem:[#allocation20 + $0x1e8] ss:$12 sps:$4 sm:$0xff]   ;;  %v10802_v10 = vld [vmem:[#allocation20 + $0x200] ss:$12 sps:$4 sm:$0xff]   ;;  %v10806_v22 = vld [vmem:[#allocation20 + $0x2d8] ss:$12 sps:$4 sm:$0xff]  }
0x11fb   : > { %10006 = vmatprep.subr.bf16.mxu1 %v10776_v37  ;;  %v10803_v41 = vld [vmem:[#allocation20 + $0x390] ss:$12 sps:$4 sm:$0xff]   ;;  %v10810_v51 = vld [vmem:[#allocation20 + $0x3ac] ss:$12 sps:$4 sm:$0xff]   ;;  %v10808_v19 = vld [vmem:[#allocation20 + $0x3a8] ss:$12 sps:$4 sm:$0xff]  }
0x11fc   : > { %8231 = vmatmul.mubr.bf16.vlgmr.msra.gmra.mrb[32].mxu0 %v12788_v36  ;;  %v10807_v15 = vld [vmem:[#allocation20 + $0x218] ss:$12 sps:$4 sm:$0xff]   ;;  %v10811_v16 = vld [vmem:[#allocation20 + $0x2f0] ss:$12 sps:$4 sm:$0xff]   ;;  %v10816_v23 = vld [vmem:[#allocation20 + $0x3c8] ss:$12 sps:$4 sm:$0xff]  }
0x11fd   : > { %8242 = vmatpush1.bf16.msra.mxu0 %v10773_v17  ;;  %8273 = vmatprep.mubr.bf16.mxu0 %v12790_v12  ;;  %v10815_v20 = vld [vmem:[#allocation20 + $0x3c4] ss:$12 sps:$4 sm:$0xff]   ;;  %v10813_v26 = vld [vmem:[#allocation20 + $0x3c0] ss:$12 sps:$4 sm:$0xff]   ;;  %v10820_v34 = vld [vmem:[#allocation20 + $0x3dc] ss:$12 sps:$4 sm:$0xff]  }
0x11fe   : > { %8532 = vmatmul.mubr.bf16.vlgmr.msra.gmra.mrb[84].mxu1 %v12760_v55  ;;  %8243 = vmatprep.subr.bf16.mxu0 %v10780_v54  ;;  %v10795_v55 = vld [vmem:[#allocation20 + $0x364] ss:$12 sps:$4 sm:$0xff]   ;;  %v10817_v32 = vld [vmem:[#allocation20 + $0x308] ss:$12 sps:$4 sm:$0xff]   ;;  %v10821_v50 = vld [vmem:[#allocation20 + $0x3e0] ss:$12 sps:$4 sm:$0xff]  }
0x11ff   : > { %10007 = vmatpush3.bf16.msra.mxu1 %v10777_v56  ;;  %8572 = vmatprep.mubr.bf16.mxu1 %v12792_v40  ;;  %v10793_v40 = vld [vmem:[#allocation20 + $0x360] ss:$12 sps:$4 sm:$0xff]   ;;  %v10812_v21 = vld [vmem:[#allocation20 + $0x230] ss:$12 sps:$4 sm:$0xff]   ;;  %v10818_v62 = vld [vmem:[#allocation20 + $0x3d8] ss:$12 sps:$4 sm:$0xff]  }
0x1200   : > { %10008 = vmatprep.subr.bf16.mxu1 %v10781_v24  ;;  %v10825_v58 = vld [vmem:[#allocation20 + $0x3f4] ss:$12 sps:$4 sm:$0xff]   ;;  %v10826_v27 = vld [vmem:[#allocation20 + $0x3f8] ss:$12 sps:$4 sm:$0xff]   ;;  %v10823_v37 = vld [vmem:[#allocation20 + $0x3f0] ss:$12 sps:$4 sm:$0xff]  }
0x1201   : > { %8244 = vmatpush1.bf16.msra.mxu0 %v10778_v43  ;;  %v10822_v14 = vld [vmem:[#allocation20 + $0x320] ss:$12 sps:$4 sm:$0xff]   ;;  %v10827_v54 = vld [vmem:[#allocation20 + $0x338] ss:$12 sps:$4 sm:$0xff]   ;;  %v10831_v56 = vld [vmem:[#allocation20 + $0x410] ss:$12 sps:$4 sm:$0xff]  }
0x1202   : > { %8245 = vmatprep.subr.bf16.mxu0 %v10785_v57  ;;  %v10830_v17 = vld [vmem:[#allocation20 + $0x40c] ss:$12 sps:$4 sm:$0xff]   ;;  %v10828_v24 = vld [vmem:[#allocation20 + $0x408] ss:$12 sps:$4 sm:$0xff]   ;;  %v10832_v43 = vld [vmem:[#allocation20 + $0x350] ss:$12 sps:$4 sm:$0xff]  }
0x1203   : > { %10009 = vmatpush3.bf16.msra.mxu1 %v10782_v59  ;;  %v10836_v57 = vld [vmem:[#allocation20 + $0x428] ss:$12 sps:$4 sm:$0xff]  }
0x1204   : > { %10010 = vmatprep.subr.bf16.mxu1 %v10786_v61  ;;  %v10840_v59 = vld [vmem:[#allocation20 + $0x43c] ss:$12 sps:$4 sm:$0xff]  }
0x1205   : > { %8246 = vmatpush1.bf16.msra.mxu0 %v10783_v63  ;;  %v10837_v61 = vld [vmem:[#allocation20 + $0x368] ss:$12 sps:$4 sm:$0xff]   ;;  %v10841_v63 = vld [vmem:[#allocation20 + $0x440] ss:$12 sps:$4 sm:$0xff]  }
0x1206   : > { %8247 = vmatprep.subr.bf16.mxu0 %v10790_v1  ;;  %v10838_v1 = vld [vmem:[#allocation20 + $0x438] ss:$12 sps:$4 sm:$0xff]  }
0x1207   : > { %10011 = vmatpush3.bf16.msra.mxu1 %v10787_v28  ;;  %v10845_v28 = vld [vmem:[#allocation20 + $0x454] ss:$12 sps:$4 sm:$0xff]  }
0x1208   : > { %10012 = vmatprep.subr.bf16.mxu1 %v10791_v2  ;;  %v10842_v2 = vld [vmem:[#allocation20 + $0x380] ss:$12 sps:$4 sm:$0xff]  }
0x1209   : > { %8248 = vmatpush1.bf16.msra.mxu0 %v10788_v5  ;;  %v10846_v5 = vld [vmem:[#allocation20 + $0x458] ss:$12 sps:$4 sm:$0xff]  }
0x120a   : > { %8249 = vmatprep.subr.bf16.mxu0 %v10795_v55  ;;  %v10843_v55 = vld [vmem:[#allocation20 + $0x450] ss:$12 sps:$4 sm:$0xff]  }
0x120b   : > { %10013 = vmatpush3.bf16.msra.mxu1 %v10792_v6  ;;  %v10850_v6 = vld [vmem:[#allocation20 + $0x46c] ss:$12 sps:$4 sm:$0xff]  }
0x120c   : > { %10014 = vmatprep.subr.bf16.mxu1 %v10796_v39  ;;  %v10847_v39 = vld [vmem:[#allocation20 + $0x398] ss:$12 sps:$4 sm:$0xff]  }
0x120d   : > { %8250 = vmatpush1.bf16.msra.mxu0 %v10793_v40  ;;  %v10851_v40 = vld [vmem:[#allocation20 + $0x470] ss:$12 sps:$4 sm:$0xff]  }
0x120e   : > { %8251 = vmatprep.subr.bf16.mxu0 %v10800_v7  ;;  %v10848_v7 = vld [vmem:[#allocation20 + $0x468] ss:$12 sps:$4 sm:$0xff]  }
0x120f   : > { %10015 = vmatpush3.bf16.msra.mxu1 %v10797_v13  ;;  %v10855_v13 = vld [vmem:[#allocation20 + $0x484] ss:$12 sps:$4 sm:$0xff]  }
0x1210   : > { %10016 = vmatprep.subr.bf16.mxu1 %v10801_v53  ;;  %v10852_v53 = vld [vmem:[#allocation20 + $0x3b0] ss:$12 sps:$4 sm:$0xff]  }
0x1211   : > { %8252 = vmatpush1.bf16.msra.mxu0 %v10798_v8  ;;  %v10856_v8 = vld [vmem:[#allocation20 + $0x548] ss:$12 sps:$4 sm:$0xff]  }
0x1212   : > { %8253 = vmatprep.subr.bf16.mxu0 %v10805_v9  ;;  %v10853_v9 = vld [vmem:[#allocation20 + $0x480] ss:$12 sps:$4 sm:$0xff]  }
0x1213   : > { %10017 = vmatpush3.bf16.msra.mxu1 %v10802_v10  ;;  %v10860_v10 = vld [vmem:[#allocation20 + $0x49c] ss:$12 sps:$4 sm:$0xff]  }
0x1214   : > { %10018 = vmatprep.subr.bf16.mxu1 %v10806_v22  ;;  %v10857_v22 = vld [vmem:[#allocation20 + $0x488] ss:$12 sps:$4 sm:$0xff]  }
0x1215   : > { %8254 = vmatpush1.bf16.msra.mxu0 %v10803_v41  ;;  %v10861_v41 = vld [vmem:[#allocation20 + $0x560] ss:$12 sps:$4 sm:$0xff]  }
0x1216   : > { %8255 = vmatprep.subr.bf16.mxu0 %v10810_v51  ;;  %v10858_v51 = vld [vmem:[#allocation20 + $0x498] ss:$12 sps:$4 sm:$0xff]  }
0x1217   : > { %10019 = vmatpush3.bf16.msra.mxu1 %v10807_v15  ;;  %v10865_v15 = vld [vmem:[#allocation20 + $0x4b4] ss:$12 sps:$4 sm:$0xff]  }
0x1218   : > { %10020 = vmatprep.subr.bf16.mxu1 %v10811_v16  ;;  %v10862_v16 = vld [vmem:[#allocation20 + $0x4a0] ss:$12 sps:$4 sm:$0xff]  }
0x1219   : > { %8256 = vmatpush1.bf16.msra.mxu0 %v10808_v19  ;;  %v10866_v19 = vld [vmem:[#allocation20 + $0x578] ss:$12 sps:$4 sm:$0xff]  }
0x121a   : > { %8257 = vmatprep.subr.bf16.mxu0 %v10815_v20  ;;  %v10863_v20 = vld [vmem:[#allocation20 + $0x4b0] ss:$12 sps:$4 sm:$0xff]  }
0x121b   : > { %10021 = vmatpush3.bf16.msra.mxu1 %v10812_v21  ;;  %v10870_v21 = vld [vmem:[#allocation20 + $0x4cc] ss:$12 sps:$4 sm:$0xff]  }
0x121c   : > { %10028 = vmatprep.subr.bf16.mxu1 %v10816_v23  ;;  %v10867_v23 = vld [vmem:[#allocation20 + $0x4b8] ss:$12 sps:$4 sm:$0xff]  }
0x121d   : > { %8258 = vmatpush1.bf16.msra.mxu0 %v10813_v26  ;;  %v10871_v26 = vld [vmem:[#allocation20 + $0x590] ss:$12 sps:$4 sm:$0xff]  }
0x121e   : > { %8573 = vmatmul.mubr.bf16.vlgmr.msra.gmra.mrb[88].mxu1 %v12788_v36  ;;  %8259 = vmatprep.subr.bf16.mxu0 %v10820_v34  ;;  %v10835_v36 = vld [vmem:[#allocation20 + $0x424] ss:$12 sps:$4 sm:$0xff]   ;;  %v10868_v34 = vld [vmem:[#allocation20 + $0x4c8] ss:$12 sps:$4 sm:$0xff]  }
0x121f   : > { %10029 = vmatpush3.bf16.msra.mxu1 %v10817_v32  ;;  %8613 = vmatprep.mubr.bf16.mxu1 %v12790_v12  ;;  %v10833_v12 = vld [vmem:[#allocation20 + $0x420] ss:$12 sps:$4 sm:$0xff]   ;;  %v10872_v32 = vld [vmem:[#allocation20 + $0x4d0] ss:$12 sps:$4 sm:$0xff]  }
0x1220   : > { %10030 = vmatprep.subr.bf16.mxu1 %v10821_v50  ;;  %v10876_v50 = vld [vmem:[#allocation20 + $0x5a8] ss:$12 sps:$4 sm:$0xff]  }
0x1221   : > { %8260 = vmatpush1.bf16.msra.mxu0 %v10818_v62  ;;  %v10880_v62 = vld [vmem:[#allocation20 + $0x4fc] ss:$12 sps:$4 sm:$0xff]  }
0x1222   : > { %8261 = vmatprep.subr.bf16.mxu0 %v10825_v58  ;;  %v10877_v58 = vld [vmem:[#allocation20 + $0x4e8] ss:$12 sps:$4 sm:$0xff]  }
0x1223   : > { %10031 = vmatpush3.bf16.msra.mxu1 %v10822_v14  ;;  %v2893_v14 = vrot.slane %v12800_v42, %v2860_v60 }
0x1224   : > { %10032 = vmatprep.subr.bf16.mxu1 %v10826_v27  ;;  %v10881_v27 = vld [vmem:[#allocation20 + $0x5c0] ss:$12 sps:$4 sm:$0xff]  }
0x1225   : > { %8262 = vmatpush1.bf16.msra.mxu0 %v10823_v37  ;;  %v2885_v37 = vrot.slane %v12800_v42, %v12420_v44 }
0x1226   : > { %8263 = vmatprep.subr.bf16.mxu0 %v10830_v17  ;;  %v2897_v17 = vrot.slane %v12800_v42, %v2864_v29  ;;  %v10883_v29 = vld [vmem:[#allocation20 + $0x510] ss:$12 sps:$4 sm:$0xff]  }
0x1227   : > { %10033 = vmatpush3.bf16.msra.mxu1 %v10827_v54  ;;  %v10878_v54 = vld [vmem:[#allocation20 + $0x4f8] ss:$12 sps:$4 sm:$0xff]  }
0x1228   : > { %10034 = vmatprep.subr.bf16.mxu1 %v10831_v56  ;;  %v2889_v56 = vrot.slane %v12800_v42, %v2856_v38  ;;  %v10890_v38 = vld [vmem:[#allocation20 + $0x52c] ss:$12 sps:$4 sm:$0xff]  }
0x1229   : > { %8264 = vmatpush1.bf16.msra.mxu0 %v10828_v24  ;;  %v10885_v24 = vld [vmem:[#allocation20 + $0x514] ss:$12 sps:$4 sm:$0xff]  }
0x122a   : > { %8265 = vmatprep.subr.bf16.mxu0 %v10835_v36 }
0x122b   : > { %10035 = vmatpush3.bf16.msra.mxu1 %v10832_v43  ;;  %v10882_v43 = vld [vmem:[#allocation20 + $0x500] ss:$12 sps:$4 sm:$0xff]  }
0x122c   : > { %10036 = vmatprep.subr.bf16.mxu1 %v10836_v57 }
0x122d   : > { %8266 = vmatpush1.bf16.msra.mxu0 %v10833_v12 }
0x122e   : > { %8267 = vmatprep.subr.bf16.mxu0 %v10840_v59  ;;  %v10886_v59 = vld [vmem:[#allocation20 + $0x5d8] ss:$12 sps:$4 sm:$0xff]  }
0x122f   : > { %10037 = vmatpush3.bf16.msra.mxu1 %v10837_v61 }
0x1230   : > { %10038 = vmatprep.subr.bf16.mxu1 %v10841_v63 }
0x1231   : > { %8268 = vmatpush1.bf16.msra.mxu0 %v10838_v1 }
0x1232   : > { %8269 = vmatprep.subr.bf16.mxu0 %v10845_v28 }
0x1233   : > { %10039 = vmatpush3.bf16.msra.mxu1 %v10842_v2 }
0x1234   : > { %10040 = vmatprep.subr.bf16.mxu1 %v10846_v5 }
0x1235   : > { %8270 = vmatpush1.bf16.msra.mxu0 %v10843_v55 }
0x1236   : > { %8271 = vmatprep.subr.bf16.mxu0 %v10850_v6 }
0x1237   : > { %10041 = vmatpush3.bf16.msra.mxu1 %v10847_v39 }
0x1238   : > { %10042 = vmatprep.subr.bf16.mxu1 %v10851_v40 }
0x1239   : > { %8272 = vmatpush1.bf16.msra.mxu0 %v10848_v7 }
0x123a   : > { %8284 = vmatprep.subr.bf16.mxu0 %v10855_v13  ;;  %v10887_v13 = vld [vmem:[#allocation20 + $0x518] ss:$12 sps:$4 sm:$0xff]  }
0x123b   : > { %10043 = vmatpush3.bf16.msra.mxu1 %v10852_v53 }
0x123c   : > { %8274 = vmatmul.mubr.bf16.vlgmr.msra.gmra.mrb[32].mxu0 %v12786_v0  ;;  %10050 = vmatprep.subr.bf16.mxu1 %v10856_v8 }
0x123d   : > { %8285 = vmatpush1.bf16.msra.mxu0 %v10853_v9  ;;  %8316 = vmatprep.mubr.bf16.mxu0 %v12818_v11 }
0x123e   : > { %8614 = vmatmul.mubr.bf16.vlgmr.msra.gmra.mrb[92].mxu1 %v12786_v0  ;;  %8286 = vmatprep.subr.bf16.mxu0 %v10860_v10  ;;  %v10875_v0 = vld [vmem:[#allocation20 + $0x4e4] ss:$12 sps:$4 sm:$0xff]  }
0x123f   : > { %10051 = vmatpush3.bf16.msra.mxu1 %v10857_v22  ;;  %8654 = vmatprep.mubr.bf16.mxu1 %v12818_v11  ;;  %v10873_v11 = vld [vmem:[#allocation20 + $0x4e0] ss:$12 sps:$4 sm:$0xff]   ;;  %v10891_v10 = vld [vmem:[#allocation20 + $0x5f0] ss:$12 sps:$4 sm:$0xff]  }
0x1240   : > { %10052 = vmatprep.subr.bf16.mxu1 %v10861_v41 }
0x1241   : > { %8287 = vmatpush1.bf16.msra.mxu0 %v10858_v51 }
0x1242   : > { %8288 = vmatprep.subr.bf16.mxu0 %v10865_v15 }
0x1243   : > { %10053 = vmatpush3.bf16.msra.mxu1 %v10862_v16  ;;  %v10888_v16 = vld [vmem:[#allocation20 + $0x528] ss:$12 sps:$4 sm:$0xff]  }
0x1244   : > { %10054 = vmatprep.subr.bf16.mxu1 %v10866_v19 }
0x1245   : > { %8289 = vmatpush1.bf16.msra.mxu0 %v10863_v20 }
0x1246   : > { %8290 = vmatprep.subr.bf16.mxu0 %v10870_v21 }
0x1247   : > { %10055 = vmatpush3.bf16.msra.mxu1 %v10867_v23  ;;  %v10895_v23 = vld [vmem:[#allocation20 + $0x544] ss:$12 sps:$4 sm:$0xff]  }
0x1248   : > { %10056 = vmatprep.subr.bf16.mxu1 %v10871_v26 }
0x1249   : > { %8291 = vmatpush1.bf16.msra.mxu0 %v10868_v34 }
0x124a   : > { %8292 = vmatprep.subr.bf16.mxu0 %v10875_v0  ;;  %v10892_v0 = vld [vmem:[#allocation20 + $0x530] ss:$12 sps:$4 sm:$0xff]  }
0x124b   : > { %10057 = vmatpush3.bf16.msra.mxu1 %v10872_v32 }
0x124c   : > { %10058 = vmatprep.subr.bf16.mxu1 %v10876_v50  ;;  %v10896_v50 = vld [vmem:[#allocation20 + $0x6c8] ss:$12 sps:$4 sm:$0xff]  }
0x124d   : > { %8293 = vmatpush1.bf16.msra.mxu0 %v10873_v11  ;;  %v10893_v11 = vld [vmem:[#allocation20 + $0x540] ss:$12 sps:$4 sm:$0xff]  }
0x124e   : > { %8294 = vmatprep.subr.bf16.mxu0 %v10880_v62  ;;  %v10900_v62 = vld [vmem:[#allocation20 + $0x55c] ss:$12 sps:$4 sm:$0xff]  }
0x124f   : > { %10059 = vmatpush3.bf16.msra.mxu1 %v10877_v58  ;;  %v5435_v36 = vpop.f32.mrb[28].mxu0  ;;  %v10897_v58 = vld [vmem:[#allocation20 + $0x608] ss:$12 sps:$4 sm:$0xff]  }
0x1250   : > { %v10304_v60 = vadd.f32 %v5435_v36, %v2893_v14  ;;  %v5349_v57 = vpop.f32.mrb[76].mxu1  ;;  %v5437_v12 = vpop.f32.mrb[29].mxu0  ;;  %10060 = vmatprep.subr.bf16.mxu1 %v10881_v27  ;;  %v10898_v27 = vld [vmem:[#allocation20 + $0x558] ss:$12 sps:$4 sm:$0xff]  }
0x1251   : > { %v10300_v61 = vadd.f32 %v5349_v57, %v2885_v37  ;;  %v10305_v63 = vadd.f32 %v5437_v12, %v2897_v17  ;;  %v5351_v1 = vpop.f32.mrb[77].mxu1  ;;  %v5439_v28 = vpop.f32.mrb[30].mxu0  ;;  %8295 = vmatpush1.bf16.msra.mxu0 %v10878_v54  ;;  %v10906_v54 = vld [vmem:[#allocation20 + $0x6f8] ss:$12 sps:$4 sm:$0xff]   ;;  %v10912_v12 = vld [vmem:[#allocation20 + $0x650] ss:$12 sps:$4 sm:$0xff]  }
0x1252   : > { %v10301_v2 = vadd.f32 %v5351_v1, %v2889_v56  ;;  %v10306_v5 = vadd.f32 %v5439_v28, %v2893_v14  ;;  %v5353_v55 = vpop.f32.mrb[78].mxu1  ;;  %v5441_v6 = vpop.f32.mrb[31].mxu0  ;;  %8296 = vmatprep.subr.bf16.mxu0 %v10885_v24  ;;  %v5542_v53 = vmax.f32 %v10304_v60, 0.0  ;;  %v10901_v14 = vld [vmem:[#allocation20 + $0x6e0] ss:$12 sps:$4 sm:$0xff]  }
0x1253   : > { %v10302_v39 = vadd.f32 %v5353_v55, %v2885_v37  ;;  %v10307_v40 = vadd.f32 %v5441_v6, %v2897_v17  ;;  %10061 = vmatpush3.bf16.msra.mxu1 %v10882_v43  ;;  %v5355_v7 = vpop.f32.mrb[79].mxu1  ;;  %v5540_v22 = vmax.f32 %v10300_v61, 0.0  ;;  %v5543_v41 = vmax.f32 %v10305_v63, 0.0  ;;  %v10905_v37 = vld [vmem:[#allocation20 + $0x574] ss:$12 sps:$4 sm:$0xff]  }
0x1254   : > { %v5558_v8 = vmax.f32 %v10306_v5, 0.0  ;;  %v10303_v9 = vadd.f32 %v5355_v7, %v2889_v56  ;;  %10062 = vmatprep.subr.bf16.mxu1 %v10886_v59  ;;  %v5541_v19 = vmax.f32 %v10301_v2, 0.0  ;;  %v10902_v17 = vld [vmem:[#allocation20 + $0x620] ss:$12 sps:$4 sm:$0xff]   ;;  %v10903_v56 = vld [vmem:[#allocation20 + $0x570] ss:$12 sps:$4 sm:$0xff]  }
0x1255   : > { %v5556_v51 = vmax.f32 %v10302_v39, 0.0  ;;  %v5559_v15 = vmax.f32 %v10307_v40, 0.0  ;;  %8297 = vmatpush1.bf16.msra.mxu0 %v10883_v29  ;;  %v10910_v24 = vld [vmem:[#allocation20 + $0x58c] ss:$12 sps:$4 sm:$0xff]   ;;  %v10911_v43 = vld [vmem:[#allocation20 + $0x710] ss:$12 sps:$4 sm:$0xff]  }
0x1256   : > { %v12841_v20 = vpack.c.bf16 %v5558_v8, %v5542_v53  ;;  %v5557_v21 = vmax.f32 %v10303_v9, 0.0  ;;  %8298 = vmatprep.subr.bf16.mxu0 %v10890_v38  ;;  %v10907_v36 = vld [vmem:[#allocation20 + $0x638] ss:$12 sps:$4 sm:$0xff]   ;;  %v10908_v60 = vld [vmem:[#allocation20 + $0x588] ss:$12 sps:$4 sm:$0xff]  }
0x1257   : > { %v12843_v26 = vpack.c.bf16 %v5556_v51, %v5540_v22  ;;  %v12845_v34 = vpack.c.bf16 %v5559_v15, %v5543_v41  ;;  %10063 = vmatpush3.bf16.msra.mxu1 %v10887_v13  ;;  %v10915_v57 = vld [vmem:[#allocation20 + $0x5a4] ss:$12 sps:$4 sm:$0xff]   ;;  %v10916_v59 = vld [vmem:[#allocation20 + $0x728] ss:$12 sps:$4 sm:$0xff]   ;;  %v10913_v61 = vld [vmem:[#allocation20 + $0x5a0] ss:$12 sps:$4 sm:$0xff]  }
0x1258   : > { %v12847_v32 = vpack.c.bf16 %v5557_v21, %v5541_v19  ;;  %10064 = vmatprep.subr.bf16.mxu1 %v10891_v10  ;;  %v10920_v63 = vld [vmem:[#allocation20 + $0x5bc] ss:$12 sps:$4 sm:$0xff]   ;;  %v10921_v28 = vld [vmem:[#allocation20 + $0x740] ss:$12 sps:$4 sm:$0xff]   ;;  %v10918_v29 = vld [vmem:[#allocation20 + $0x5b8] ss:$12 sps:$4 sm:$0xff]  }
0x1259   : > { %8299 = vmatpush1.bf16.msra.mxu0 %v10888_v16  ;;  %v10917_v1 = vld [vmem:[#allocation20 + $0x668] ss:$12 sps:$4 sm:$0xff]   ;;  %v10922_v5 = vld [vmem:[#allocation20 + $0x680] ss:$12 sps:$4 sm:$0xff]   ;;  %v10926_v55 = vld [vmem:[#allocation20 + $0x758] ss:$12 sps:$4 sm:$0xff]  }
0x125a   : > { %8300 = vmatprep.subr.bf16.mxu0 %v10895_v23  ;;  %v10925_v2 = vld [vmem:[#allocation20 + $0x5d4] ss:$12 sps:$4 sm:$0xff]   ;;  %v10923_v6 = vld [vmem:[#allocation20 + $0x5d0] ss:$12 sps:$4 sm:$0xff]   ;;  %v10930_v38 = vld [vmem:[#allocation20 + $0x5ec] ss:$12 sps:$4 sm:$0xff]  }
0x125b   : > { %10065 = vmatpush3.bf16.msra.mxu1 %v10892_v0  ;;  %v10927_v39 = vld [vmem:[#allocation20 + $0x698] ss:$12 sps:$4 sm:$0xff]   ;;  %v10931_v40 = vld [vmem:[#allocation20 + $0x770] ss:$12 sps:$4 sm:$0xff]   ;;  %v10928_v7 = vld [vmem:[#allocation20 + $0x5e8] ss:$12 sps:$4 sm:$0xff]  }
0x125c   : > { %10072 = vmatprep.subr.bf16.mxu1 %v10896_v50  ;;  %v10935_v13 = vld [vmem:[#allocation20 + $0x604] ss:$12 sps:$4 sm:$0xff]   ;;  %v10936_v8 = vld [vmem:[#allocation20 + $0x848] ss:$12 sps:$4 sm:$0xff]   ;;  %v10933_v9 = vld [vmem:[#allocation20 + $0x600] ss:$12 sps:$4 sm:$0xff]  }
0x125d   : > { %8301 = vmatpush1.bf16.msra.mxu0 %v10893_v11  ;;  %v10932_v53 = vld [vmem:[#allocation20 + $0x6b0] ss:$12 sps:$4 sm:$0xff]   ;;  %v10937_v22 = vld [vmem:[#allocation20 + $0x788] ss:$12 sps:$4 sm:$0xff]   ;;  %v10941_v41 = vld [vmem:[#allocation20 + $0x860] ss:$12 sps:$4 sm:$0xff]  }
0x125e   : > { %8655 = vmatmul.mubr.bf16.vlgmr.msra.gmra.mrb[96].mxu1 %v12814_v3  ;;  %8302 = vmatprep.subr.bf16.mxu0 %v10900_v62  ;;  %v10940_v10 = vld [vmem:[#allocation20 + $0x61c] ss:$12 sps:$4 sm:$0xff]   ;;  %v10938_v51 = vld [vmem:[#allocation20 + $0x618] ss:$12 sps:$4 sm:$0xff]   ;;  %v10945_v15 = vld [vmem:[#allocation20 + $0x634] ss:$12 sps:$4 sm:$0xff]  }
0x125f   : > { %10073 = vmatpush3.bf16.msra.mxu1 %v10897_v58  ;;  %8695 = vmatprep.mubr.bf16.mxu1 %v12816_v49  ;;  %v10942_v16 = vld [vmem:[#allocation20 + $0x7a0] ss:$12 sps:$4 sm:$0xff]   ;;  %v10946_v19 = vld [vmem:[#allocation20 + $0x878] ss:$12 sps:$4 sm:$0xff]   ;;  %v10943_v21 = vld [vmem:[#allocation20 + $0x630] ss:$12 sps:$4 sm:$0xff]  }
0x1260   : > { %10074 = vmatprep.subr.bf16.mxu1 %v10901_v14  ;;  %v10947_v23 = vld [vmem:[#allocation20 + $0x7b8] ss:$12 sps:$4 sm:$0xff]   ;;  %v10951_v0 = vld [vmem:[#allocation20 + $0x890] ss:$12 sps:$4 sm:$0xff]   ;;  %v10956_v62 = vld [vmem:[#allocation20 + $0x8a8] ss:$12 sps:$4 sm:$0xff]  }
0x1261   : > { %8303 = vmatpush1.bf16.msra.mxu0 %v10898_v27  ;;  %v10955_v50 = vld [vmem:[#allocation20 + $0x664] ss:$12 sps:$4 sm:$0xff]   ;;  %v10953_v58 = vld [vmem:[#allocation20 + $0x660] ss:$12 sps:$4 sm:$0xff]   ;;  %v10960_v14 = vld [vmem:[#allocation20 + $0x67c] ss:$12 sps:$4 sm:$0xff]  }
0x1262   : > { %8304 = vmatprep.subr.bf16.mxu0 %v10905_v37  ;;  %v10952_v11 = vld [vmem:[#allocation20 + $0x7d0] ss:$12 sps:$4 sm:$0xff]   ;;  %v10957_v27 = vld [vmem:[#allocation20 + $0x7e8] ss:$12 sps:$4 sm:$0xff]   ;;  %v10961_v37 = vld [vmem:[#allocation20 + $0x8c0] ss:$12 sps:$4 sm:$0xff]  }
0x1263   : > { %10075 = vmatpush3.bf16.msra.mxu1 %v10902_v17  ;;  %v10958_v17 = vld [vmem:[#allocation20 + $0x678] ss:$12 sps:$4 sm:$0xff]  }
0x1264   : > { %10076 = vmatprep.subr.bf16.mxu1 %v10906_v54  ;;  %v10965_v54 = vld [vmem:[#allocation20 + $0x694] ss:$12 sps:$4 sm:$0xff]  }
0x1265   : > { %8305 = vmatpush1.bf16.msra.mxu0 %v10903_v56  ;;  %v10962_v56 = vld [vmem:[#allocation20 + $0x800] ss:$12 sps:$4 sm:$0xff]  }
0x1266   : > { %8306 = vmatprep.subr.bf16.mxu0 %v10910_v24  ;;  %v10966_v24 = vld [vmem:[#allocation20 + $0x8d8] ss:$12 sps:$4 sm:$0xff]  }
0x1267   : > { %10077 = vmatpush3.bf16.msra.mxu1 %v10907_v36  ;;  %v10963_v36 = vld [vmem:[#allocation20 + $0x690] ss:$12 sps:$4 sm:$0xff]  }
0x1268   : > { %10078 = vmatprep.subr.bf16.mxu1 %v10911_v43  ;;  %v10970_v43 = vld [vmem:[#allocation20 + $0x6ac] ss:$12 sps:$4 sm:$0xff]  }
0x1269   : > { %8307 = vmatpush1.bf16.msra.mxu0 %v10908_v60  ;;  %v10967_v60 = vld [vmem:[#allocation20 + $0x818] ss:$12 sps:$4 sm:$0xff]  }
0x126a   : > { %8308 = vmatprep.subr.bf16.mxu0 %v10915_v57  ;;  %v10971_v57 = vld [vmem:[#allocation20 + $0x8f0] ss:$12 sps:$4 sm:$0xff]  }
0x126b   : > { %10079 = vmatpush3.bf16.msra.mxu1 %v10912_v12  ;;  %v10968_v12 = vld [vmem:[#allocation20 + $0x6a8] ss:$12 sps:$4 sm:$0xff]  }
0x126c   : > { %10080 = vmatprep.subr.bf16.mxu1 %v10916_v59  ;;  %v10975_v59 = vld [vmem:[#allocation20 + $0x6c4] ss:$12 sps:$4 sm:$0xff]  }
0x126d   : > { %8309 = vmatpush1.bf16.msra.mxu0 %v10913_v61  ;;  %v10972_v61 = vld [vmem:[#allocation20 + $0x830] ss:$12 sps:$4 sm:$0xff]  }
0x126e   : > { %8310 = vmatprep.subr.bf16.mxu0 %v10920_v63  ;;  %v10976_v63 = vld [vmem:[#allocation20 + $0x9c8] ss:$12 sps:$4 sm:$0xff]  }
0x126f   : > { %10081 = vmatpush3.bf16.msra.mxu1 %v10917_v1  ;;  %v10973_v1 = vld [vmem:[#allocation20 + $0x6c0] ss:$12 sps:$4 sm:$0xff]  }
0x1270   : > { %10082 = vmatprep.subr.bf16.mxu1 %v10921_v28  ;;  %v10980_v28 = vld [vmem:[#allocation20 + $0x6dc] ss:$12 sps:$4 sm:$0xff]  }
0x1271   : > { %8311 = vmatpush1.bf16.msra.mxu0 %v10918_v29  ;;  %v10977_v29 = vld [vmem:[#allocation20 + $0x908] ss:$12 sps:$4 sm:$0xff]  }
0x1272   : > { %8312 = vmatprep.subr.bf16.mxu0 %v10925_v2  ;;  %v10981_v2 = vld [vmem:[#allocation20 + $0x9e0] ss:$12 sps:$4 sm:$0xff]  }
0x1273   : > { %10083 = vmatpush3.bf16.msra.mxu1 %v10922_v5  ;;  %v10978_v5 = vld [vmem:[#allocation20 + $0x6d8] ss:$12 sps:$4 sm:$0xff]  }
0x1274   : > { %10084 = vmatprep.subr.bf16.mxu1 %v10926_v55  ;;  %v10985_v55 = vld [vmem:[#allocation20 + $0x6f4] ss:$12 sps:$4 sm:$0xff]  }
0x1275   : > { %8313 = vmatpush1.bf16.msra.mxu0 %v10923_v6  ;;  %v10982_v6 = vld [vmem:[#allocation20 + $0x920] ss:$12 sps:$4 sm:$0xff]  }
0x1276   : > { %8314 = vmatprep.subr.bf16.mxu0 %v10930_v38  ;;  %v10986_v38 = vld [vmem:[#allocation20 + $0x9f8] ss:$12 sps:$4 sm:$0xff]  }
0x1277   : > { %10085 = vmatpush3.bf16.msra.mxu1 %v10927_v39  ;;  %v10983_v39 = vld [vmem:[#allocation20 + $0x6f0] ss:$12 sps:$4 sm:$0xff]  }
0x1278   : > { %10086 = vmatprep.subr.bf16.mxu1 %v10931_v40  ;;  %v10990_v40 = vld [vmem:[#allocation20 + $0x70c] ss:$12 sps:$4 sm:$0xff]  }
0x1279   : > { %8315 = vmatpush1.bf16.msra.mxu0 %v10928_v7  ;;  %v10987_v7 = vld [vmem:[#allocation20 + $0x938] ss:$12 sps:$4 sm:$0xff]  }
0x127a   : > { %8327 = vmatprep.subr.bf16.mxu0 %v10935_v13  ;;  %v10991_v13 = vld [vmem:[#allocation20 + $0xa10] ss:$12 sps:$4 sm:$0xff]  }
0x127b   : > { %10087 = vmatpush3.bf16.msra.mxu1 %v10932_v53  ;;  %v10988_v53 = vld [vmem:[#allocation20 + $0x708] ss:$12 sps:$4 sm:$0xff]  }
0x127c   : > { %8317 = vmatmul.mubr.bf16.vlgmr.msra.gmra.mrb[32].mxu0 %v12814_v3  ;;  %10094 = vmatprep.subr.bf16.mxu1 %v10936_v8  ;;  %v10950_v3 = vld [vmem:[#allocation20 + $0x64c] ss:$12 sps:$4 sm:$0xff]   ;;  %v10995_v8 = vld [vmem:[#allocation20 + $0x724] ss:$12 sps:$4 sm:$0xff]  }
0x127d   : > { %8328 = vmatpush1.bf16.msra.mxu0 %v10933_v9  ;;  %8359 = vmatprep.mubr.bf16.mxu0 %v12816_v49  ;;  %v10948_v49 = vld [vmem:[#allocation20 + $0x648] ss:$12 sps:$4 sm:$0xff]   ;;  %v10992_v9 = vld [vmem:[#allocation20 + $0x950] ss:$12 sps:$4 sm:$0xff]  }
0x127e   : > { %8696 = vmatmul.mubr.bf16.vlgmr.msra.gmra.mrb[100].mxu1 %v12812_v31  ;;  %8329 = vmatprep.subr.bf16.mxu0 %v10940_v10  ;;  %v10996_v10 = vld [vmem:[#allocation20 + $0xa28] ss:$12 sps:$4 sm:$0xff]  }
0x127f   : > { %10095 = vmatpush3.bf16.msra.mxu1 %v10937_v22  ;;  %8736 = vmatprep.mubr.bf16.mxu1 %v12847_v32  ;;  %v10993_v22 = vld [vmem:[#allocation20 + $0x720] ss:$12 sps:$4 sm:$0xff]  }
0x1280   : > { %10096 = vmatprep.subr.bf16.mxu1 %v10941_v41  ;;  %v11000_v41 = vld [vmem:[#allocation20 + $0x73c] ss:$12 sps:$4 sm:$0xff]  }
0x1281   : > { %8330 = vmatpush1.bf16.msra.mxu0 %v10938_v51  ;;  %v10997_v51 = vld [vmem:[#allocation20 + $0x968] ss:$12 sps:$4 sm:$0xff]  }
0x1282   : > { %8331 = vmatprep.subr.bf16.mxu0 %v10945_v15  ;;  %v11001_v15 = vld [vmem:[#allocation20 + $0xa40] ss:$12 sps:$4 sm:$0xff]  }
0x1283   : > { %10097 = vmatpush3.bf16.msra.mxu1 %v10942_v16  ;;  %v2901_v16 = vrot.slane %v12800_v42, %v2868_v48  ;;  %v11010_v48 = vld [vmem:[#allocation20 + $0x76c] ss:$12 sps:$4 sm:$0xff]  }
0x1284   : > { %10098 = vmatprep.subr.bf16.mxu1 %v10946_v19  ;;  %v10998_v19 = vld [vmem:[#allocation20 + $0x738] ss:$12 sps:$4 sm:$0xff]  }
0x1285   : > { %8332 = vmatpush1.bf16.msra.mxu0 %v10943_v21  ;;  %v2905_v21 = vrot.slane %v12800_v42, %v2872_v4  ;;  %v11011_v42 = vld [vmem:[#allocation20 + $0xa70] ss:$12 sps:$4 sm:$0xff]  }
0x1286   : > { %8333 = vmatprep.subr.bf16.mxu0 %v10950_v3  ;;  %v11005_v3 = vld [vmem:[#allocation20 + $0x754] ss:$12 sps:$4 sm:$0xff]  }
0x1287   : > { %10099 = vmatpush3.bf16.msra.mxu1 %v10947_v23  ;;  %v11002_v23 = vld [vmem:[#allocation20 + $0x980] ss:$12 sps:$4 sm:$0xff]  }
0x1288   : > { %10100 = vmatprep.subr.bf16.mxu1 %v10951_v0 }
0x1289   : > { %8334 = vmatpush1.bf16.msra.mxu0 %v10948_v49  ;;  %v11006_v49 = vld [vmem:[#allocation20 + $0xa58] ss:$12 sps:$4 sm:$0xff]  }
0x128a   : > { %8335 = vmatprep.subr.bf16.mxu0 %v10955_v50 }
0x128b   : > { %10101 = vmatpush3.bf16.msra.mxu1 %v10952_v11 }
0x128c   : > { %10102 = vmatprep.subr.bf16.mxu1 %v10956_v62  ;;  %v11003_v62 = vld [vmem:[#allocation20 + $0x750] ss:$12 sps:$4 sm:$0xff]  }
0x128d   : > { %8336 = vmatpush1.bf16.msra.mxu0 %v10953_v58 }
0x128e   : > { %8337 = vmatprep.subr.bf16.mxu0 %v10960_v14 }
0x128f   : > { %10103 = vmatpush3.bf16.msra.mxu1 %v10957_v27 }
0x1290   : > { %10104 = vmatprep.subr.bf16.mxu1 %v10961_v37 }
0x1291   : > { %8338 = vmatpush1.bf16.msra.mxu0 %v10958_v17 }
0x1292   : > { %8339 = vmatprep.subr.bf16.mxu0 %v10965_v54 }
0x1293   : > { %10105 = vmatpush3.bf16.msra.mxu1 %v10962_v56  ;;  %v11008_v56 = vld [vmem:[#allocation20 + $0x768] ss:$12 sps:$4 sm:$0xff]  }
0x1294   : > { %10106 = vmatprep.subr.bf16.mxu1 %v10966_v24 }
0x1295   : > { %8340 = vmatpush1.bf16.msra.mxu0 %v10963_v36 }
0x1296   : > { %8341 = vmatprep.subr.bf16.mxu0 %v10970_v43  ;;  %v11015_v43 = vld [vmem:[#allocation20 + $0x784] ss:$12 sps:$4 sm:$0xff]  }
0x1297   : > { %10107 = vmatpush3.bf16.msra.mxu1 %v10967_v60 }
0x1298   : > { %10108 = vmatprep.subr.bf16.mxu1 %v10971_v57  ;;  %v11012_v57 = vld [vmem:[#allocation20 + $0x9b0] ss:$12 sps:$4 sm:$0xff]  }
0x1299   : > { %8342 = vmatpush1.bf16.msra.mxu0 %v10968_v12 }
0x129a   : > { %8343 = vmatprep.subr.bf16.mxu0 %v10975_v59  ;;  %v11016_v59 = vld [vmem:[#allocation20 + $0xb48] ss:$12 sps:$4 sm:$0xff]  }
0x129b   : > { %10109 = vmatpush3.bf16.msra.mxu1 %v10972_v61  ;;  %v11013_v61 = vld [vmem:[#allocation20 + $0x780] ss:$12 sps:$4 sm:$0xff]  }
0x129c   : > { %10116 = vmatprep.subr.bf16.mxu1 %v10976_v63  ;;  %v11020_v63 = vld [vmem:[#allocation20 + $0x79c] ss:$12 sps:$4 sm:$0xff]  }
0x129d   : > { %8344 = vmatpush1.bf16.msra.mxu0 %v10973_v1  ;;  %v11017_v1 = vld [vmem:[#allocation20 + $0xa88] ss:$12 sps:$4 sm:$0xff]  }
0x129e   : > { %8737 = vmatmul.mubr.bf16.vlgmr.msra.gmra.mrb[104].mxu1 %v12843_v26  ;;  %8345 = vmatprep.subr.bf16.mxu0 %v10980_v28  ;;  %v11021_v28 = vld [vmem:[#allocation20 + $0xb60] ss:$12 sps:$4 sm:$0xff]  }
0x129f   : > { %10117 = vmatpush3.bf16.msra.mxu1 %v10977_v29  ;;  %8777 = vmatprep.mubr.bf16.mxu1 %v12845_v34  ;;  %v11018_v29 = vld [vmem:[#allocation20 + $0x798] ss:$12 sps:$4 sm:$0xff]  }
0x12a0   : > { %10118 = vmatprep.subr.bf16.mxu1 %v10981_v2  ;;  %v11025_v2 = vld [vmem:[#allocation20 + $0x7b4] ss:$12 sps:$4 sm:$0xff]  }
0x12a1   : > { %8346 = vmatpush1.bf16.msra.mxu0 %v10978_v5  ;;  %v11022_v5 = vld [vmem:[#allocation20 + $0xaa0] ss:$12 sps:$4 sm:$0xff]  }
0x12a2   : > { %8347 = vmatprep.subr.bf16.mxu0 %v10985_v55  ;;  %v11026_v55 = vld [vmem:[#allocation20 + $0xb78] ss:$12 sps:$4 sm:$0xff]  }
0x12a3   : > { %10119 = vmatpush3.bf16.msra.mxu1 %v10982_v6  ;;  %v11023_v6 = vld [vmem:[#allocation20 + $0x7b0] ss:$12 sps:$4 sm:$0xff]  }
0x12a4   : > { %10120 = vmatprep.subr.bf16.mxu1 %v10986_v38  ;;  %v11027_v38 = vld [vmem:[#allocation20 + $0xab8] ss:$12 sps:$4 sm:$0xff]  }
0x12a5   : > { %8348 = vmatpush1.bf16.msra.mxu0 %v10983_v39  ;;  %v11031_v39 = vld [vmem:[#allocation20 + $0xb90] ss:$12 sps:$4 sm:$0xff]  }
0x12a6   : > { %8349 = vmatprep.subr.bf16.mxu0 %v10990_v40  ;;  %v11035_v40 = vld [vmem:[#allocation20 + $0x7e4] ss:$12 sps:$4 sm:$0xff]  }
0x12a7   : > { %10121 = vmatpush3.bf16.msra.mxu1 %v10987_v7  ;;  %v11032_v7 = vld [vmem:[#allocation20 + $0xad0] ss:$12 sps:$4 sm:$0xff]  }
0x12a8   : > { %10122 = vmatprep.subr.bf16.mxu1 %v10991_v13  ;;  %v11036_v13 = vld [vmem:[#allocation20 + $0xba8] ss:$12 sps:$4 sm:$0xff]  }
0x12a9   : > { %8350 = vmatpush1.bf16.msra.mxu0 %v10988_v53  ;;  %v11033_v53 = vld [vmem:[#allocation20 + $0x7e0] ss:$12 sps:$4 sm:$0xff]  }
0x12aa   : > { %8351 = vmatprep.subr.bf16.mxu0 %v10995_v8  ;;  %v11040_v8 = vld [vmem:[#allocation20 + $0x7fc] ss:$12 sps:$4 sm:$0xff]  }
0x12ab   : > { %10123 = vmatpush3.bf16.msra.mxu1 %v10992_v9  ;;  %v11037_v9 = vld [vmem:[#allocation20 + $0xae8] ss:$12 sps:$4 sm:$0xff]  }
0x12ac   : > { %10124 = vmatprep.subr.bf16.mxu1 %v10996_v10  ;;  %v11041_v10 = vld [vmem:[#allocation20 + $0xbc0] ss:$12 sps:$4 sm:$0xff]  }
0x12ad   : > { %8352 = vmatpush1.bf16.msra.mxu0 %v10993_v22  ;;  %v11038_v22 = vld [vmem:[#allocation20 + $0x7f8] ss:$12 sps:$4 sm:$0xff]  }
0x12ae   : > { %8353 = vmatprep.subr.bf16.mxu0 %v11000_v41  ;;  %v11045_v41 = vld [vmem:[#allocation20 + $0x814] ss:$12 sps:$4 sm:$0xff]  }
0x12af   : > { %10125 = vmatpush3.bf16.msra.mxu1 %v10997_v51  ;;  %v11042_v51 = vld [vmem:[#allocation20 + $0xb00] ss:$12 sps:$4 sm:$0xff]  }
0x12b0   : > { %v5521_v0 = vpop.f32.mrb[80].mxu1  ;;  %10126 = vmatprep.subr.bf16.mxu1 %v11001_v15  ;;  %v11046_v15 = vld [vmem:[#allocation20 + $0xbd8] ss:$12 sps:$4 sm:$0xff]  }
0x12b1   : > { %v10308_v50 = vadd.f32 %v5521_v0, %v2901_v16  ;;  %v5523_v11 = vpop.f32.mrb[81].mxu1  ;;  %8354 = vmatpush1.bf16.msra.mxu0 %v10998_v19  ;;  %v11043_v19 = vld [vmem:[#allocation20 + $0x810] ss:$12 sps:$4 sm:$0xff]  }
0x12b2   : > { %v10309_v58 = vadd.f32 %v5523_v11, %v2905_v21  ;;  %v5525_v14 = vpop.f32.mrb[82].mxu1  ;;  %8355 = vmatprep.subr.bf16.mxu0 %v11005_v3  ;;  %v11050_v3 = vld [vmem:[#allocation20 + $0x82c] ss:$12 sps:$4 sm:$0xff]   ;;  %v11051_v11 = vld [vmem:[#allocation20 + $0xbf0] ss:$12 sps:$4 sm:$0xff]  }
0x12b3   : > { %v10310_v27 = vadd.f32 %v5525_v14, %v2901_v16  ;;  %10127 = vmatpush3.bf16.msra.mxu1 %v11002_v23  ;;  %v5527_v37 = vpop.f32.mrb[83].mxu1  ;;  %v5544_v4 = vmax.f32 %v10308_v50, 0.0  ;;  %v11055_v14 = vld [vmem:[#allocation20 + $0x844] ss:$12 sps:$4 sm:$0xff]  }
0x12b4   : > { %v10311_v17 = vadd.f32 %v5527_v37, %v2905_v21  ;;  %10128 = vmatprep.subr.bf16.mxu1 %v11006_v49  ;;  %v5545_v24 = vmax.f32 %v10309_v58, 0.0  ;;  %v11047_v49 = vld [vmem:[#allocation20 + $0xb18] ss:$12 sps:$4 sm:$0xff]   ;;  %v11048_v58 = vld [vmem:[#allocation20 + $0x828] ss:$12 sps:$4 sm:$0xff]  }
0x12b5   : > { %v5560_v54 = vmax.f32 %v10310_v27, 0.0  ;;  %8356 = vmatpush1.bf16.msra.mxu0 %v11003_v62  ;;  %v11053_v27 = vld [vmem:[#allocation20 + $0x840] ss:$12 sps:$4 sm:$0xff]   ;;  %v11058_v37 = vld [vmem:[#allocation20 + $0x85c] ss:$12 sps:$4 sm:$0xff]  }
0x12b6   : > { %v5561_v36 = vmax.f32 %v10311_v17, 0.0  ;;  %8357 = vmatprep.subr.bf16.mxu0 %v11010_v48  ;;  %v11052_v48 = vld [vmem:[#allocation20 + $0xb30] ss:$12 sps:$4 sm:$0xff]   ;;  %v11061_v17 = vld [vmem:[#allocation20 + $0x874] ss:$12 sps:$4 sm:$0xff]  }
0x12b7   : > { %v12863_v60 = vpack.c.bf16 %v5560_v54, %v5544_v4  ;;  %10129 = vmatpush3.bf16.msra.mxu1 %v11007_v35  ;;  %v11056_v35 = vld [vmem:[#allocation20 + $0x858] ss:$12 sps:$4 sm:$0xff]   ;;  %v11062_v54 = vld [vmem:[#allocation20 + $0x888] ss:$12 sps:$4 sm:$0xff]  }
0x12b8   : > { %v12865_v12 = vpack.c.bf16 %v5561_v36, %v5545_v24  ;;  %10130 = vmatprep.subr.bf16.mxu1 %v11011_v42  ;;  %v11059_v42 = vld [vmem:[#allocation20 + $0x870] ss:$12 sps:$4 sm:$0xff]   ;;  %v11064_v4 = vld [vmem:[#allocation20 + $0x88c] ss:$12 sps:$4 sm:$0xff]  }
0x12b9   : > { %8358 = vmatpush1.bf16.msra.mxu0 %v11008_v56  ;;  %v11067_v56 = vld [vmem:[#allocation20 + $0x8a4] ss:$12 sps:$4 sm:$0xff]   ;;  %v11065_v24 = vld [vmem:[#allocation20 + $0x8a0] ss:$12 sps:$4 sm:$0xff]   ;;  %v11070_v36 = vld [vmem:[#allocation20 + $0x8bc] ss:$12 sps:$4 sm:$0xff]  }
0x12ba   : > { %8370 = vmatprep.subr.bf16.mxu0 %v11015_v43  ;;  %v12872_v43 = vld [vmem:[#allocation22] sm:$0x7] }
0x12bb   : > { %10131 = vmatpush3.bf16.msra.mxu1 %v11012_v57  ;;  %v11068_v57 = vld [vmem:[#allocation20 + $0x8b8] ss:$12 sps:$4 sm:$0xff]  }
0x12bc   : > { %8360 = vmatmul.mubr.bf16.vlgmr.msra.gmra.mrb[32].mxu0 %v12812_v31  ;;  %10138 = vmatprep.subr.bf16.mxu1 %v11016_v59  ;;  %v11030_v31 = vld [vmem:[#allocation20 + $0x7cc] ss:$12 sps:$4 sm:$0xff]   ;;  %v11073_v59 = vld [vmem:[#allocation20 + $0x8d4] ss:$12 sps:$4 sm:$0xff]  }
0x12bd   : > { %8371 = vmatpush1.bf16.msra.mxu0 %v11013_v61  ;;  %8402 = vmatprep.mubr.bf16.mxu0 %v12847_v32  ;;  %v11028_v32 = vld [vmem:[#allocation20 + $0x7c8] ss:$12 sps:$4 sm:$0xff]   ;;  %v6103_v61 = vrot.slane %v12872_v43, %v12420_v44  ;;  %v11077_v44 = vld [vmem:[#allocation20 + $0x900] ss:$12 sps:$4 sm:$0xff]  }
0x12be   : > { %8778 = vmatmul.mubr.bf16.vlgmr.msra.gmra.mrb[108].mxu1 %v12841_v20  ;;  %8372 = vmatprep.subr.bf16.mxu0 %v11020_v63 }
0x12bf   : > { %10139 = vmatpush3.bf16.msra.mxu1 %v11017_v1  ;;  %8818 = vmatprep.mubr.bf16.mxu1 %v12865_v12  ;;  %v11071_v1 = vld [vmem:[#allocation20 + $0x8d0] ss:$12 sps:$4 sm:$0xff]  }
0x12c0   : > { %10140 = vmatprep.subr.bf16.mxu1 %v11021_v28 }
0x12c1   : > { %8373 = vmatpush1.bf16.msra.mxu0 %v11018_v29  ;;  %v11076_v29 = vld [vmem:[#allocation20 + $0x8ec] ss:$12 sps:$4 sm:$0xff]  }
0x12c2   : > { %8374 = vmatprep.subr.bf16.mxu0 %v11025_v2 }
0x12c3   : > { %10141 = vmatpush3.bf16.msra.mxu1 %v11022_v5 }
0x12c4   : > { %10142 = vmatprep.subr.bf16.mxu1 %v11026_v55 }
0x12c5   : > { %8375 = vmatpush1.bf16.msra.mxu0 %v11023_v6 }
0x12c6   : > { %8376 = vmatprep.subr.bf16.mxu0 %v11030_v31 }
0x12c7   : > { %10143 = vmatpush3.bf16.msra.mxu1 %v11027_v38 }
0x12c8   : > { %10144 = vmatprep.subr.bf16.mxu1 %v11031_v39 }
0x12c9   : > { %8377 = vmatpush1.bf16.msra.mxu0 %v11028_v32  ;;  %v11074_v32 = vld [vmem:[#allocation20 + $0x8e8] ss:$12 sps:$4 sm:$0xff]  }
0x12ca   : > { %8378 = vmatprep.subr.bf16.mxu0 %v11035_v40  ;;  %v11079_v40 = vld [vmem:[#allocation20 + $0x904] ss:$12 sps:$4 sm:$0xff]  }
0x12cb   : > { %10145 = vmatpush3.bf16.msra.mxu1 %v11032_v7 }
0x12cc   : > { %10146 = vmatprep.subr.bf16.mxu1 %v11036_v13  ;;  %v11082_v13 = vld [vmem:[#allocation20 + $0x91c] ss:$12 sps:$4 sm:$0xff]  }
0x12cd   : > { %8379 = vmatpush1.bf16.msra.mxu0 %v11033_v53  ;;  %v11080_v53 = vld [vmem:[#allocation20 + $0x918] ss:$12 sps:$4 sm:$0xff]  }
0x12ce   : > { %8380 = vmatprep.subr.bf16.mxu0 %v11040_v8  ;;  %v11085_v8 = vld [vmem:[#allocation20 + $0x934] ss:$12 sps:$4 sm:$0xff]  }
0x12cf   : > { %10147 = vmatpush3.bf16.msra.mxu1 %v11037_v9  ;;  %v11083_v9 = vld [vmem:[#allocation20 + $0x930] ss:$12 sps:$4 sm:$0xff]  }
0x12d0   : > { %10148 = vmatprep.subr.bf16.mxu1 %v11041_v10  ;;  %v11088_v10 = vld [vmem:[#allocation20 + $0x94c] ss:$12 sps:$4 sm:$0xff]  }
0x12d1   : > { %v10000_v16 = vpop.f32.mrb[84].mxu1  ;;  %8381 = vmatpush1.bf16.msra.mxu0 %v11038_v22  ;;  %v11086_v22 = vld [vmem:[#allocation20 + $0x948] ss:$12 sps:$4 sm:$0xff]  }
0x12d2   : > { %v10001_v21 = vpop.f32.mrb[85].mxu1  ;;  %8382 = vmatprep.subr.bf16.mxu0 %v11045_v41  ;;  %v11091_v41 = vld [vmem:[#allocation20 + $0x964] ss:$12 sps:$4 sm:$0xff]  }
0x12d3   : > { %v10002_v23 = vadd.f32 %v10001_v21, %v10000_v16  ;;  %v10003_v0 = vpop.f32.mrb[86].mxu1  ;;  %10149 = vmatpush3.bf16.msra.mxu1 %v11042_v51  ;;  %v11089_v51 = vld [vmem:[#allocation20 + $0x960] ss:$12 sps:$4 sm:$0xff]  }
0x12d4   : > { %v10004_v50 = vpop.f32.mrb[87].mxu1  ;;  %10150 = vmatprep.subr.bf16.mxu1 %v11046_v15  ;;  %v11094_v15 = vld [vmem:[#allocation20 + $0x97c] ss:$12 sps:$4 sm:$0xff]   ;;  %v11097_v16 = vld [vmem:[#allocation20 + $0x994] ss:$12 sps:$4 sm:$0xff]  }
0x12d5   : > { %v10005_v62 = vadd.f32 %v10004_v50, %v10003_v0  ;;  %8383 = vmatpush1.bf16.msra.mxu0 %v11043_v19  ;;  %v8534_v2 = vadd.f32 %v10002_v23, %v6103_v61  ;;  %v11095_v19 = vld [vmem:[#allocation20 + $0x990] ss:$12 sps:$4 sm:$0xff]  }
0x12d6   : > { %8384 = vmatprep.subr.bf16.mxu0 %v11050_v3  ;;  %v11100_v3 = vld [vmem:[#allocation20 + $0x9ac] ss:$12 sps:$4 sm:$0xff]  }
0x12d7   : > { %10151 = vmatpush3.bf16.msra.mxu1 %v11047_v49  ;;  %v8537_v31 = vadd.f32 %v10005_v62, %v6103_v61  ;;  %v11098_v62 = vld [vmem:[#allocation20 + $0x9a8] ss:$12 sps:$4 sm:$0xff]   ;;  %v11119_v61 = vld [vmem:[#allocation20 + $0xa50] ss:$12 sps:$4 sm:$0xff]  }
0x12d8   : > { %10152 = vmatprep.subr.bf16.mxu1 %v11051_v11 }
0x12d9   : > { %8385 = vmatpush1.bf16.msra.mxu0 %v11048_v58  ;;  %v11103_v58 = vld [vmem:[#allocation20 + $0x9c4] ss:$12 sps:$4 sm:$0xff]  }
0x12da   : > { %8386 = vmatprep.subr.bf16.mxu0 %v11055_v14 }
0x12db   : > { %10153 = vmatpush3.bf16.msra.mxu1 %v11052_v48  ;;  %v11101_v48 = vld [vmem:[#allocation20 + $0x9c0] ss:$12 sps:$4 sm:$0xff]  }
0x12dd   : > { %8387 = vmatpush1.bf16.msra.mxu0 %v11053_v27  ;;  %v11106_v27 = vld [vmem:[#allocation20 + $0x9dc] ss:$12 sps:$4 sm:$0xff]  }
0x12de   : > { %8819 = vmatmul.mubr.bf16.vlgmr.msra.gmra.mrb[112].mxu1 %v12863_v60  ;;  %8388 = vmatprep.subr.bf16.mxu0 %v11058_v37  ;;  %v11104_v37 = vld [vmem:[#allocation20 + $0x9d8] ss:$12 sps:$4 sm:$0xff]  }
0x12e1   : > { %8389 = vmatpush1.bf16.msra.mxu0 %v11056_v35  ;;  %v11109_v35 = vld [vmem:[#allocation20 + $0x9f4] ss:$12 sps:$4 sm:$0xff]  }
0x12e2   : > { %8390 = vmatprep.subr.bf16.mxu0 %v11061_v17  ;;  %v11107_v17 = vld [vmem:[#allocation20 + $0x9f0] ss:$12 sps:$4 sm:$0xff]  }
0x12e5   : > { %8391 = vmatpush1.bf16.msra.mxu0 %v11059_v42  ;;  %v11112_v42 = vld [vmem:[#allocation20 + $0xa0c] ss:$12 sps:$4 sm:$0xff]  }
0x12e6   : > { %8392 = vmatprep.subr.bf16.mxu0 %v11064_v4  ;;  %v11110_v4 = vld [vmem:[#allocation20 + $0xa08] ss:$12 sps:$4 sm:$0xff]  }
0x12e9   : > { %8393 = vmatpush1.bf16.msra.mxu0 %v11062_v54  ;;  %v11115_v54 = vld [vmem:[#allocation20 + $0xa24] ss:$12 sps:$4 sm:$0xff]  }
0x12ea   : > { %8394 = vmatprep.subr.bf16.mxu0 %v11067_v56  ;;  %v11113_v56 = vld [vmem:[#allocation20 + $0xa20] ss:$12 sps:$4 sm:$0xff]  }
0x12ed   : > { %8395 = vmatpush1.bf16.msra.mxu0 %v11065_v24  ;;  %v11118_v24 = vld [vmem:[#allocation20 + $0xa3c] ss:$12 sps:$4 sm:$0xff]  }
0x12ee   : > { %8396 = vmatprep.subr.bf16.mxu0 %v11070_v36  ;;  %v11116_v36 = vld [vmem:[#allocation20 + $0xa38] ss:$12 sps:$4 sm:$0xff]  }
0x12f1   : > { %v10022_v63 = vpop.f32.mrb[88].mxu1  ;;  %8397 = vmatpush1.bf16.msra.mxu0 %v11068_v57  ;;  %v11121_v57 = vld [vmem:[#allocation20 + $0xa54] ss:$12 sps:$4 sm:$0xff]  }
0x12f2   : > { %v10023_v28 = vpop.f32.mrb[89].mxu1  ;;  %8398 = vmatprep.subr.bf16.mxu0 %v11073_v59 }
0x12f3   : > { %v10024_v5 = vadd.f32 %v10023_v28, %v10022_v63  ;;  %v10025_v55 = vpop.f32.mrb[90].mxu1 }
0x12f4   : > { %v10026_v6 = vpop.f32.mrb[91].mxu1 }
0x12f5   : > { %v8575_v38 = vadd.f32 %v10024_v5, %v8534_v2  ;;  %v10027_v39 = vadd.f32 %v10026_v6, %v10025_v55  ;;  %8399 = vmatpush1.bf16.msra.mxu0 %v11071_v1  ;;  %v11124_v1 = vld [vmem:[#allocation20 + $0xa6c] ss:$12 sps:$4 sm:$0xff]   ;;  %v11122_v6 = vld [vmem:[#allocation20 + $0xa68] ss:$12 sps:$4 sm:$0xff]  }
0x12f6   : > { %8400 = vmatprep.subr.bf16.mxu0 %v11076_v29 }
0x12f7   : > { %v8578_v7 = vadd.f32 %v10027_v39, %v8537_v31  ;;  %v11127_v31 = vld [vmem:[#allocation20 + $0xa84] ss:$12 sps:$4 sm:$0xff]   ;;  %v11125_v39 = vld [vmem:[#allocation20 + $0xa80] ss:$12 sps:$4 sm:$0xff]  }
0x12f9   : > { %8401 = vmatpush1.bf16.msra.mxu0 %v11074_v32  ;;  %v11130_v32 = vld [vmem:[#allocation20 + $0xa9c] ss:$12 sps:$4 sm:$0xff]  }
0x12fa   : > { %8413 = vmatprep.subr.bf16.mxu0 %v11079_v40  ;;  %v11128_v40 = vld [vmem:[#allocation20 + $0xa98] ss:$12 sps:$4 sm:$0xff]  }
0x12fc   : > { %8403 = vmatmul.mubr.bf16.vlgmr.msra.gmra.mrb[32].mxu0 %v12843_v26  ;;  %v11092_v26 = vld [vmem:[#allocation20 + $0x978] ss:$12 sps:$4 sm:$0xff]  }
0x12fd   : > { %8414 = vmatpush1.bf16.msra.mxu0 %v11077_v44  ;;  %8445 = vmatprep.mubr.bf16.mxu0 %v12845_v34  ;;  %v11131_v44 = vld [vmem:[#allocation20 + $0xab0] ss:$12 sps:$4 sm:$0xff]  }
0x12fe   : > { %8415 = vmatprep.subr.bf16.mxu0 %v11082_v13  ;;  %v11136_v13 = vld [vmem:[#allocation20 + $0xacc] ss:$12 sps:$4 sm:$0xff]  }
0x1301   : > { %8416 = vmatpush1.bf16.msra.mxu0 %v11080_v53  ;;  %v11134_v53 = vld [vmem:[#allocation20 + $0xac8] ss:$12 sps:$4 sm:$0xff]  }
0x1302   : > { %8417 = vmatprep.subr.bf16.mxu0 %v11085_v8  ;;  %v11139_v8 = vld [vmem:[#allocation20 + $0xae4] ss:$12 sps:$4 sm:$0xff]  }
0x1305   : > { %8418 = vmatpush1.bf16.msra.mxu0 %v11083_v9  ;;  %v11137_v9 = vld [vmem:[#allocation20 + $0xae0] ss:$12 sps:$4 sm:$0xff]  }
0x1306   : > { %8419 = vmatprep.subr.bf16.mxu0 %v11088_v10  ;;  %v11142_v10 = vld [vmem:[#allocation20 + $0xafc] ss:$12 sps:$4 sm:$0xff]  }
0x1309   : > { %8420 = vmatpush1.bf16.msra.mxu0 %v11086_v22  ;;  %v11145_v22 = vld [vmem:[#allocation20 + $0xb14] ss:$12 sps:$4 sm:$0xff]  }
0x130a   : > { %8421 = vmatprep.subr.bf16.mxu0 %v11091_v41  ;;  %v11143_v41 = vld [vmem:[#allocation20 + $0xb10] ss:$12 sps:$4 sm:$0xff]  }
0x130d   : > { %8422 = vmatpush1.bf16.msra.mxu0 %v11089_v51 }
0x130e   : > { %8423 = vmatprep.subr.bf16.mxu0 %v11094_v15  ;;  %v11148_v15 = vld [vmem:[#allocation20 + $0xb2c] ss:$12 sps:$4 sm:$0xff]  }
0x1311   : > { %v10044_v34 = vpop.f32.mrb[92].mxu1  ;;  %8424 = vmatpush1.bf16.msra.mxu0 %v11092_v26 }
0x1312   : > { %v10045_v21 = vpop.f32.mrb[93].mxu1  ;;  %8425 = vmatprep.subr.bf16.mxu0 %v11097_v16 }
0x1313   : > { %v10046_v23 = vadd.f32 %v10045_v21, %v10044_v34  ;;  %v10047_v0 = vpop.f32.mrb[94].mxu1 }
0x1314   : > { %v10048_v49 = vpop.f32.mrb[95].mxu1 }
0x1315   : > { %v8616_v50 = vadd.f32 %v10046_v23, %v8575_v38  ;;  %v10049_v11 = vadd.f32 %v10048_v49, %v10047_v0  ;;  %8426 = vmatpush1.bf16.msra.mxu0 %v11095_v19  ;;  %v11151_v23 = vld [vmem:[#allocation20 + $0xb44] ss:$12 sps:$4 sm:$0xff]   ;;  %v11149_v49 = vld [vmem:[#allocation20 + $0xb40] ss:$12 sps:$4 sm:$0xff]  }
0x1316   : > { %8427 = vmatprep.subr.bf16.mxu0 %v11100_v3  ;;  %v11146_v3 = vld [vmem:[#allocation20 + $0xb28] ss:$12 sps:$4 sm:$0xff]  }
0x1317   : > { %v8619_v14 = vadd.f32 %v10049_v11, %v8578_v7  ;;  %v11133_v7 = vld [vmem:[#allocation20 + $0xab4] ss:$12 sps:$4 sm:$0xff]   ;;  %v11152_v11 = vld [vmem:[#allocation20 + $0xb58] ss:$12 sps:$4 sm:$0xff]  }
0x1319   : > { %8428 = vmatpush1.bf16.msra.mxu0 %v11098_v62  ;;  %v11157_v62 = vld [vmem:[#allocation20 + $0xb74] ss:$12 sps:$4 sm:$0xff]  }
0x131a   : > { %8429 = vmatprep.subr.bf16.mxu0 %v11103_v58  ;;  %v11155_v58 = vld [vmem:[#allocation20 + $0xb70] ss:$12 sps:$4 sm:$0xff]  }
0x131d   : > { %8430 = vmatpush1.bf16.msra.mxu0 %v11101_v48  ;;  %v11158_v48 = vld [vmem:[#allocation20 + $0xb88] ss:$12 sps:$4 sm:$0xff]  }
0x131e   : > { %8431 = vmatprep.subr.bf16.mxu0 %v11106_v27  ;;  %v11163_v27 = vld [vmem:[#allocation20 + $0xba4] ss:$12 sps:$4 sm:$0xff]  }
0x1321   : > { %8432 = vmatpush1.bf16.msra.mxu0 %v11104_v37  ;;  %v11161_v37 = vld [vmem:[#allocation20 + $0xba0] ss:$12 sps:$4 sm:$0xff]  }
0x1322   : > { %8433 = vmatprep.subr.bf16.mxu0 %v11109_v35  ;;  %v11166_v35 = vld [vmem:[#allocation20 + $0xbbc] ss:$12 sps:$4 sm:$0xff]  }
0x1325   : > { %8434 = vmatpush1.bf16.msra.mxu0 %v11107_v17  ;;  %v11164_v17 = vld [vmem:[#allocation20 + $0xbb8] ss:$12 sps:$4 sm:$0xff]  }
0x1326   : > { %8435 = vmatprep.subr.bf16.mxu0 %v11112_v42  ;;  %v11169_v42 = vld [vmem:[#allocation20 + $0xbd4] ss:$12 sps:$4 sm:$0xff]  }
0x1329   : > { %8436 = vmatpush1.bf16.msra.mxu0 %v11110_v4 }
0x132a   : > { %8437 = vmatprep.subr.bf16.mxu0 %v11115_v54  ;;  %v11167_v54 = vld [vmem:[#allocation20 + $0xbd0] ss:$12 sps:$4 sm:$0xff]  }
0x132d   : > { %8438 = vmatpush1.bf16.msra.mxu0 %v11113_v56 }
0x132e   : > { %8439 = vmatprep.subr.bf16.mxu0 %v11118_v24  ;;  %v11172_v24 = vld [vmem:[#allocation20 + $0xbec] ss:$12 sps:$4 sm:$0xff]  }
0x1331   : > { %v10066_v59 = vpop.f32.mrb[96].mxu1  ;;  %8440 = vmatpush1.bf16.msra.mxu0 %v11116_v36 }
0x1332   : > { %v10067_v63 = vpop.f32.mrb[97].mxu1  ;;  %8441 = vmatprep.subr.bf16.mxu0 %v11121_v57 }
0x1333   : > { %v10068_v28 = vadd.f32 %v10067_v63, %v10066_v59  ;;  %v10069_v29 = vpop.f32.mrb[98].mxu1 }
0x1334   : > { %v10070_v2 = vpop.f32.mrb[99].mxu1 }
0x1335   : > { %v8657_v5 = vadd.f32 %v10068_v28, %v8616_v50  ;;  %v10071_v55 = vadd.f32 %v10070_v2, %v10069_v29  ;;  %8442 = vmatpush1.bf16.msra.mxu0 %v11119_v61  ;;  %v11154_v50 = vld [vmem:[#allocation20 + $0xb5c] ss:$12 sps:$4 sm:$0xff]  }
0x1336   : > { %8443 = vmatprep.subr.bf16.mxu0 %v11124_v1  ;;  %v11170_v1 = vld [vmem:[#allocation20 + $0xbe8] ss:$12 sps:$4 sm:$0xff]  }
0x1337   : > { %v8660_v38 = vadd.f32 %v10071_v55, %v8619_v14  ;;  %v11160_v14 = vld [vmem:[#allocation20 + $0xb8c] ss:$12 sps:$4 sm:$0xff]  }
0x1339   : > { %8444 = vmatpush1.bf16.msra.mxu0 %v11122_v6 }
0x133a   : > { %8456 = vmatprep.subr.bf16.mxu0 %v11127_v31 }
0x133c   : > { %8446 = vmatmul.mubr.bf16.vlgmr.msra.gmra.mrb[32].mxu0 %v12841_v20  ;;  %v11140_v20 = vld [vmem:[#allocation20 + $0xaf8] ss:$12 sps:$4 sm:$0xff]  }
0x133d   : > { %8457 = vmatpush1.bf16.msra.mxu0 %v11125_v39  ;;  %8488 = vmatprep.mubr.bf16.mxu0 %v12865_v12 }
0x133e   : > { %8458 = vmatprep.subr.bf16.mxu0 %v11130_v32 }
0x1341   : > { %8459 = vmatpush1.bf16.msra.mxu0 %v11128_v40 }
0x1342   : > { %8460 = vmatprep.subr.bf16.mxu0 %v11133_v7 }
0x1345   : > { %8461 = vmatpush1.bf16.msra.mxu0 %v11131_v44 }
0x1346   : > { %8462 = vmatprep.subr.bf16.mxu0 %v11136_v13 }
0x1349   : > { %8463 = vmatpush1.bf16.msra.mxu0 %v11134_v53 }
0x134a   : > { %8464 = vmatprep.subr.bf16.mxu0 %v11139_v8 }
0x134d   : > { %8465 = vmatpush1.bf16.msra.mxu0 %v11137_v9 }
0x134e   : > { %8466 = vmatprep.subr.bf16.mxu0 %v11142_v10 }
0x1351   : > { %v10088_v12 = vpop.f32.mrb[100].mxu1  ;;  %8467 = vmatpush1.bf16.msra.mxu0 %v11140_v20  ;;  %v6095_v20 = vrot.slane %v12872_v43, %v12426_v47 }
0x1352   : > { %v10089_v51 = vpop.f32.mrb[101].mxu1  ;;  %8468 = vmatprep.subr.bf16.mxu0 %v11145_v22  ;;  %v6099_v22 = vrot.slane %v12872_v43, %v12423_v46 }
0x1353   : > { %v10090_v26 = vadd.f32 %v10089_v51, %v10088_v12  ;;  %v10091_v16 = vpop.f32.mrb[102].mxu1 }
0x1354   : > { %v10092_v34 = vpop.f32.mrb[103].mxu1 }
0x1355   : > { %v8698_v19 = vadd.f32 %v10090_v26, %v8657_v5  ;;  %v10093_v21 = vadd.f32 %v10092_v34, %v10091_v16  ;;  %8469 = vmatpush1.bf16.msra.mxu0 %v11143_v41 }
0x1356   : > { %8470 = vmatprep.subr.bf16.mxu0 %v11148_v15 }
0x1357   : > { %v8701_v0 = vadd.f32 %v10093_v21, %v8660_v38 }
0x1359   : > { %8471 = vmatpush1.bf16.msra.mxu0 %v11146_v3 }
0x135a   : > { %8472 = vmatprep.subr.bf16.mxu0 %v11151_v23 }
0x135d   : > { %8473 = vmatpush1.bf16.msra.mxu0 %v11149_v49 }
0x135e   : > { %8474 = vmatprep.subr.bf16.mxu0 %v11154_v50 }
0x1361   : > { %8475 = vmatpush1.bf16.msra.mxu0 %v11152_v11 }
0x1362   : > { %8476 = vmatprep.subr.bf16.mxu0 %v11157_v62 }
0x1365   : > { %8477 = vmatpush1.bf16.msra.mxu0 %v11155_v58 }
0x1366   : > { %8478 = vmatprep.subr.bf16.mxu0 %v11160_v14 }
0x1369   : > { %8479 = vmatpush1.bf16.msra.mxu0 %v11158_v48 }
0x136a   : > { %8480 = vmatprep.subr.bf16.mxu0 %v11163_v27 }
0x136d   : > { %8481 = vmatpush1.bf16.msra.mxu0 %v11161_v37 }
0x136e   : > { %8482 = vmatprep.subr.bf16.mxu0 %v11166_v35 }
0x1371   : > { %v10110_v4 = vpop.f32.mrb[104].mxu1  ;;  %8483 = vmatpush1.bf16.msra.mxu0 %v11164_v17 }
0x1372   : > { %v10111_v56 = vpop.f32.mrb[105].mxu1  ;;  %8484 = vmatprep.subr.bf16.mxu0 %v11169_v42 }
0x1373   : > { %v10112_v36 = vadd.f32 %v10111_v56, %v10110_v4  ;;  %v10113_v57 = vpop.f32.mrb[106].mxu1 }
0x1374   : > { %v10114_v59 = vpop.f32.mrb[107].mxu1 }
0x1375   : > { %v8739_v61 = vadd.f32 %v10112_v36, %v8698_v19  ;;  %v10115_v63 = vadd.f32 %v10114_v59, %v10113_v57  ;;  %8485 = vmatpush1.bf16.msra.mxu0 %v11167_v54 }
0x1376   : > { %8486 = vmatprep.subr.bf16.mxu0 %v11172_v24 }
0x1377   : > { %v8742_v28 = vadd.f32 %v10115_v63, %v8701_v0 }
0x1379   : > { %8487 = vmatpush1.bf16.msra.mxu0 %v11170_v1 }
0x137c   : > { %8489 = vmatmul.mubr.bf16.vlgmr.msra.gmra.mrb[32].mxu0 %v12863_v60 }
0x1391   : > { %v10132_v29 = vpop.f32.mrb[108].mxu1 }
0x1392   : > { %v10133_v2 = vpop.f32.mrb[109].mxu1 }
0x1393   : > { %v10134_v5 = vadd.f32 %v10133_v2, %v10132_v29  ;;  %v10135_v55 = vpop.f32.mrb[110].mxu1 }
0x1394   : > { %v10136_v6 = vpop.f32.mrb[111].mxu1 }
0x1395   : > { %v8780_v31 = vadd.f32 %v10134_v5, %v8739_v61  ;;  %v10137_v38 = vadd.f32 %v10136_v6, %v10135_v55 }
0x1397   : > { %v8783_v39 = vadd.f32 %v10137_v38, %v8742_v28 }
0x13b1   : > { %v10154_v32 = vpop.f32.mrb[112].mxu1 }
0x13b2   : > { %v10155_v40 = vpop.f32.mrb[113].mxu1 }
0x13b3   : > { %v10156_v7 = vadd.f32 %v10155_v40, %v10154_v32  ;;  %v10157_v44 = vpop.f32.mrb[114].mxu1 }
0x13b4   : > { %v10158_v13 = vpop.f32.mrb[115].mxu1 }
0x13b5   : > { %v8821_v53 = vadd.f32 %v10156_v7, %v8780_v31  ;;  %v10159_v8 = vadd.f32 %v10158_v13, %v10157_v44 }
0x13b7   : > { %v8829_v9 = vadd.f32 %v8821_v53, %v12647_v33  ;;  %v8824_v60 = vadd.f32 %v10159_v8, %v8783_v39 }
0x13b9   : > { %8835 = vst [vmem:[%s669_s3 + $0x10] sm:$0xff] %v8829_v9  ;;  %v8832_v10 = vadd.f32 %v8824_v60, %v12655_v52 }
0x13bb   : > { %8838 = vst [vmem:[%s669_s3 + $0x28] sm:$0xff] %v8832_v10 }
0x144f   : > { %v8490_v12 = vpop.f32.mrb[32].mxu0 }
0x1450   : > { %v10312_v41 = vadd.f32 %v8490_v12, %v6095_v20  ;;  %v8492_v51 = vpop.f32.mrb[33].mxu0 }
0x1451   : > { %v10313_v15 = vadd.f32 %v8492_v51, %v6099_v22  ;;  %v8494_v33 = vpop.f32.mrb[34].mxu0 }
0x1452   : > { %v8827_v26 = vadd.f32 %v10312_v41, %v12638_v18  ;;  %v10314_v16 = vadd.f32 %v8494_v33, %v6095_v20  ;;  %v8496_v52 = vpop.f32.mrb[35].mxu0 }
0x1453   : > { %v8828_v47 = vadd.f32 %v10313_v15, %v12641_v25  ;;  %v10315_v46 = vadd.f32 %v8496_v52, %v6099_v22 }
0x1454   : > { %8833 = vst [vmem:[%s669_s3] sm:$0xff] %v8827_v26  ;;  %v8830_v43 = vadd.f32 %v10314_v16, %v12644_v30 }
0x1455   : > { %8834 = vst [vmem:[%s669_s3 + $0x8] sm:$0xff] %v8828_v47  ;;  %v8831_v34 = vadd.f32 %v10315_v46, %v12650_v45 }
0x1456   : > { %8836 = vst [vmem:[%s669_s3 + $0x18] sm:$0xff] %v8830_v43 }
0x1457   : > { %8837 = vst [vmem:[%s669_s3 + $0x20] sm:$0xff] %v8831_v34 }
0x1458   : > { %11609 = shalt.err (!%p11606_p0)
}
0x1459   : > { %s11610_s10 = scalar_lea.hbm %s12899_s14, 768  ;;  %s11614_s28 = scalar_lea.hbm %s13017_s0, 1536 }
0x145a   : > { %p11611_p7 = scmp.ne.s32.totalorder %s12899_s14, %s11610_s10  ;;  %p11615_p11 = scmp.lt.u32.totalorder %s12899_s14, %s13017_s0 }
0x145b   : > { %p11616_p5 = scmp.lt.u32.totalorder %s11614_s28, %s11610_s10  ;;  %p11618_p10 = scmp.lt.u32.totalorder %s11610_s10, %s12899_s14 }
0x145c   : > { %p11612_p2 = pnand %p11611_p7, %p13018_p8 }
0x145d   : > { %p11617_p9 = por %p11616_p5, %p11615_p11 }
0x145e   : > { %p11613_p6 = pneg %p11612_p2 }
0x145f   : > { %p11619_p12 = por %p11618_p10, %p11617_p9 }
0x1461   : > { %p11620_p3 = pnand %p11619_p12, %p11613_p6 }
0x1463   : > { %11623 = shalt.err (!%p11620_p3)
}
0x1464   : > { %s11724_s22 = smov 384   ;;  %s11725_s19 = smov 24  }
0x1465   : > { %10424 = dma.vmem_to_hbm [thread:$0]  (%p13018_p8), %s12891_s9, 768, %s12899_s14, %s8840_s2, %s11724_s22, %s11724_s22, %s11725_s19  }
0x1466 PF: > { %s8869_s21 = sand.u32 1, %s11678_s29   ;;  %p13019_p4 = scmp.ne.s32.totalorder %s12998_s6, 0 }
0x1467   : > { %p13020_p1 = scmp.ge.s32.totalorder %s11690_s16, 2  ;;  %s8870_s27 = scalar_lea.sflag [#allocation4], %s8869_s21 }
0x1469   : > { %p10468_p13 = pnand %p13020_p1, %p13019_p4 }
0x146b   : > { %11673 = dma.done.wait (!%p10468_p13), %s8870_s27, 768  }
0x146c   : > { %11675 = vsyncadd (!%p10468_p13), %s8870_s27, 4294966528  ;;  %p35_p0 = scmp.ge.s32.totalorder %s12079_s25, 4   ;;  %s13021_s29 = smov %s11682_s30 }
0x146d   : > { %s13022_s30 = smov %s11686_s15  ;;  %s13023_s15 = smov %s12091_s20 }
0x146e   : > { %s13024_s16 = smov %s12079_s25  ;;  %37 = sbr.rel (!%p35_p0) target bundleno = 25 (0x19), region = 178 }
0x1475   :  { %8875 = vsyncpa [#allocation3], 1 }
0x1476   :  { %8877 = vsyncpa [#allocation3 + $0x1], 1 }
0x1477   :  { %8878 = vsyncpa [#allocation6], 1 }
0x1478   :  { %8880 = vsyncpa [#allocation6 + $0x1], 1 }
0x1479   :  { %8881 = vsyncpa [#allocation9], 1 }
0x147a   :  { %8882 = vsyncpa [#allocation12], 1 }
0x147b   :  { %8883 = vsyncpa [#allocation15], 1 }
0x147c   :  { %8884 = vsyncpa [#allocation18], 1 }
0x147d   :  { %8885 = vsyncpa [#allocation21], 1 }
0x147e   :  { %8886 = vsyncpa [#allocation4], 1 }
0x147f   :  { %8888 = vsyncpa [#allocation4 + $0x1], 1 }

</bundles_post_ra>
